<compile_context>
chip_gen: v5e
topology: v5e:2x2
jax: 0.10.0
libtpu: 0.0.40
codegen_flags: <defaults>
</compile_context>

<pallas_src>
import jax
import jax.numpy as jnp
from jax.experimental import pallas as pl
from jax.experimental.pallas import tpu as pltpu

NUM_CLASSES = 10
EMB_DIM = 10
EMB_PAD = 128                    # embedding lane-padded to one full vreg width
IMG_FEATS = 784                  # 28*28
IN_FEATS = IMG_FEATS + EMB_DIM   # 794 (PyTorch fan_in of layer 1)
H1, H2, H3 = 1024, 512, 256


def _round_up(n, m):
    return ((n + m - 1) // m) * m


def _pick_tile(B):
    """Batch tile: multiple of 16 (bf16 sublane packing); >=2 grid steps when
    B > 128 so both v7x TensorCores are used; 256-row tiles for big batches."""
    rb = _round_up(B, 16)
    if rb <= 128:
        return rb            # single tile, TB == B_pad (block == full array)
    if rb <= 512:
        return 128           # 2-4 tiles -> megacore sharding on v7x
    return 256


def _disc_kernel(x_ref, e_ref, w1a_ref, w1e_ref, b1_ref, w2_ref, b2_ref,
                 w3_ref, b3_ref, w4_ref, b4_ref, o_ref):
    """One batch tile through the whole MLP: bf16 MXU matmuls with f32 accum,
    f32 VPU leaky-relu, lane-reduce final layer, EUP sigmoid, lane-dense store."""
    leaky = lambda h: jnp.where(h > 0, h, 0.2 * h)

    x = x_ref[...].astype(jnp.bfloat16)                                # (TB, 784)
    e = e_ref[...].astype(jnp.bfloat16)                                # (TB, 128)

    # Layer 1: Linear(794, 1024) split as image part + label-embedding part.
    h = jnp.dot(x, w1a_ref[...], preferred_element_type=jnp.float32)   # (TB, 1024)
    h += jnp.dot(e, w1e_ref[...], preferred_element_type=jnp.float32)
    h = leaky(h + b1_ref[...])

    # Layer 2: Linear(1024, 512)
    h = jnp.dot(h.astype(jnp.bfloat16), w2_ref[...],
                preferred_element_type=jnp.float32)                    # (TB, 512)
    h = leaky(h + b2_ref[...])
    # TODO(synk): nn.Dropout(0.4) is identity in eval mode; not applied here.

    # Layer 3: Linear(512, 256)
    h = jnp.dot(h.astype(jnp.bfloat16), w3_ref[...],
                preferred_element_type=jnp.float32)                    # (TB, 256)
    h = leaky(h + b3_ref[...])
    # TODO(synk): second nn.Dropout(0.4) likewise identity in eval mode.

    # Layer 4: Linear(256, 1) as a lane-wise multiply + cross-lane reduce (XLU),
    # bias read from SMEM, sigmoid via EUP reciprocal, lane-dense (1, TB) store.
    logit = jnp.sum(h * w4_ref[...], axis=-1, keepdims=True) + b4_ref[0]   # (TB, 1)
    prob = pl.reciprocal(1.0 + jnp.exp(-logit), approx=True)               # sigmoid
    o_ref[...] = prob.T                                                     # (1, TB)


@jax.jit
def discriminator_forward(x, labels, params):
    """x: (B, 1, 28, 28) float32, labels: (B,) int32 -> (B,) float32."""
    emb_pad, w1a, w1e, b1, w2, b2, w3, b3, w4, b4 = params
    B = x.shape[0]

    # Cheap glue only: flatten (free reshape) + embedding gather (B x 128).
    x_flat = x.reshape(B, IMG_FEATS)                       # (B, 784) f32
    e = jnp.take(emb_pad, labels, axis=0)                  # (B, 128) f32 (cols 10+ are 0)

    TB = _pick_tile(B)
    B_pad = _round_up(B, TB)
    if B_pad != B:
        x_flat = jnp.pad(x_flat, ((0, B_pad - B), (0, 0)))
        e = jnp.pad(e, ((0, B_pad - B), (0, 0)))

    grid = (B_pad // TB,)
    const = lambda shape: pl.BlockSpec(shape, lambda i: (0, 0))  # resident weights

    # Advisory cost for XLA scheduling of the surrounding glue ops.
    weight_bytes = ((w1a.size + w1e.size + w2.size + w3.size) * 2
                    + (b1.size + b2.size + b3.size + w4.size + b4.size) * 4)
    flops = 2 * B_pad * (IMG_FEATS * H1 + EMB_PAD * H1 + H1 * H2 + H2 * H3 + H3)
    bytes_accessed = B_pad * (IMG_FEATS + EMB_PAD) * 4 + weight_bytes + B_pad * 4
    cost = pl.CostEstimate(flops=flops, transcendentals=2 * B_pad,
                           bytes_accessed=bytes_accessed)

    out = pl.pallas_call(
        _disc_kernel,
        out_shape=jax.ShapeDtypeStruct((1, B_pad), jnp.float32),
        grid=grid,
        in_specs=[
            pl.BlockSpec((TB, IMG_FEATS), lambda i: (i, 0)),   # image tile
            pl.BlockSpec((TB, EMB_PAD), lambda i: (i, 0)),     # label-emb tile
            const((IMG_FEATS, H1)),                            # w1a bf16
            const((EMB_PAD, H1)),                              # w1e bf16
            const((1, H1)),                                    # b1 f32
            const((H1, H2)), const((1, H2)),                   # w2 bf16, b2
            const((H2, H3)), const((1, H3)),                   # w3 bf16, b3
            const((1, H3)),                                    # w4 row f32
            pl.BlockSpec(memory_space=pltpu.MemorySpace.SMEM), # b4 scalar in SMEM
        ],
        out_specs=pl.BlockSpec((1, TB), lambda i: (0, i)),     # lane-dense output row
        compiler_params=pltpu.CompilerParams(
            dimension_semantics=("parallel",),                 # shard batch tiles over TCs
            vmem_limit_bytes=32 * 1024 * 1024,
        ),
        cost_estimate=cost,
    )(x_flat, e, w1a, w1e, b1, w2, b2, w3, b3, w4, b4)

    return out[0, :B]   # matches out.view(-1)


def init_params(key):
    """Deterministic init mimicking PyTorch Linear defaults U(-1/sqrt(fan_in), +).

    Hoisted layout work (done once here, not per call):
      * embedding table lane-padded (10, 10) -> (10, 128),
      * layer-1 weight split into image part (784, 1024) and embedding part
        padded to (128, 1024), both cast to bf16,
      * w4 stored as a (1, 256) f32 row for the in-kernel lane reduce,
      * b4 stored as a (1,) f32 scalar for SMEM.
    """
    ks = jax.random.split(key, 9)

    def lin(kw, kb, fan_in, fan_out):
        bound = 1.0 / jnp.sqrt(fan_in)
        w = jax.random.uniform(kw, (fan_in, fan_out), jnp.float32, -bound, bound)
        b = jax.random.uniform(kb, (1, fan_out), jnp.float32, -bound, bound)
        return w, b

    emb = jax.random.normal(ks[0], (NUM_CLASSES, EMB_DIM), jnp.float32)
    w1, b1 = lin(ks[1], ks[2], IN_FEATS, H1)
    w2, b2 = lin(ks[3], ks[4], H1, H2)
    w3, b3 = lin(ks[5], ks[6], H2, H3)
    w4_col, b4 = lin(ks[7], ks[8], H3, 1)

    emb_pad = jnp.pad(emb, ((0, 0), (0, EMB_PAD - EMB_DIM)))              # (10, 128) f32
    w1a = w1[:IMG_FEATS].astype(jnp.bfloat16)                             # (784, 1024)
    w1e = jnp.pad(w1[IMG_FEATS:], ((0, EMB_PAD - EMB_DIM), (0, 0))
                  ).astype(jnp.bfloat16)                                  # (128, 1024)
    w2b = w2.astype(jnp.bfloat16)
    w3b = w3.astype(jnp.bfloat16)
    w4 = w4_col.T                                                         # (1, 256) f32
    b4s = b4.reshape(1)                                                   # (1,) f32
    return (emb_pad, w1a, w1e, b1, w2b, b2, w3b, b3, w4, b4s)


def reference_forward(x, labels, params):
    """Pure-JAX reference using the same bf16 weights / f32 accumulation
    (exact sigmoid; the kernel uses an approx EUP reciprocal)."""
    emb_pad, w1a, w1e, b1, w2, b2, w3, b3, w4, b4 = params
    B = x.shape[0]
    x_flat = x.reshape(B, IMG_FEATS).astype(jnp.bfloat16)
    e = jnp.take(emb_pad, labels, axis=0).astype(jnp.bfloat16)
    leaky = lambda h: jnp.where(h > 0, h, 0.2 * h)

    h = (jnp.dot(x_flat, w1a, preferred_element_type=jnp.float32)
         + jnp.dot(e, w1e, preferred_element_type=jnp.float32))
    h = leaky(h + b1)
    h = leaky(jnp.dot(h.astype(jnp.bfloat16), w2,
                      preferred_element_type=jnp.float32) + b2)
    h = leaky(jnp.dot(h.astype(jnp.bfloat16), w3,
                      preferred_element_type=jnp.float32) + b3)
    logit = jnp.sum(h * w4, axis=-1) + b4[0]
    return jax.nn.sigmoid(logit)


if __name__ == "__main__":
    key = jax.random.PRNGKey(0)
    kx, kl, kp = jax.random.split(key, 3)

    B = 8
    x = jax.random.normal(kx, (B, 1, 28, 28), jnp.float32)       # MNIST-shaped input
    labels = jax.random.randint(kl, (B,), 0, NUM_CLASSES, jnp.int32)
    params = init_params(kp)

    out = jax.block_until_ready(discriminator_forward(x, labels, params))
    ref = reference_forward(x, labels, params)

    assert out.shape == (B,)
    assert jnp.allclose(out, ref, atol=5e-3, rtol=5e-3), (out, ref)
    print("KERNEL_OK")
</pallas_src>

<mosaic_0001>
module attributes {stable_mosaic.version = 11 : i64} {
  func.func @_disc_kernel(%arg0: i32, %arg1: memref<16x784xf32, #tpu.memory_space<vmem>>, %arg2: memref<16x128xf32, #tpu.memory_space<vmem>>, %arg3: memref<784x1024xbf16, #tpu.memory_space<vmem>>, %arg4: memref<128x1024xbf16, #tpu.memory_space<vmem>>, %arg5: memref<1x1024xf32, #tpu.memory_space<vmem>>, %arg6: memref<1024x512xbf16, #tpu.memory_space<vmem>>, %arg7: memref<1x512xf32, #tpu.memory_space<vmem>>, %arg8: memref<512x256xbf16, #tpu.memory_space<vmem>>, %arg9: memref<1x256xf32, #tpu.memory_space<vmem>>, %arg10: memref<1x256xf32, #tpu.memory_space<vmem>>, %arg11: memref<1xf32, #tpu.memory_space<smem>>, %arg12: memref<1x16xf32, #tpu.memory_space<vmem>>) attributes {dimension_semantics = [#tpu.dimension_semantics<parallel>], iteration_bounds = array<i64: 1>, scalar_prefetch = 0 : i64, scratch_operands = 0 : i64, tpu.core_type = #tpu.core_type<tc>, window_params = [{transform_indices = @transform_0, window_bounds = array<i64: 16, 784>}, {transform_indices = @transform_1, window_bounds = array<i64: 16, 128>}, {pipeline_mode = #tpu.pipeline_mode<synchronous>, transform_indices = @transform_2, window_bounds = array<i64: 784, 1024>}, {pipeline_mode = #tpu.pipeline_mode<synchronous>, transform_indices = @transform_3, window_bounds = array<i64: 128, 1024>}, {pipeline_mode = #tpu.pipeline_mode<synchronous>, transform_indices = @transform_4, window_bounds = array<i64: 1, 1024>}, {pipeline_mode = #tpu.pipeline_mode<synchronous>, transform_indices = @transform_5, window_bounds = array<i64: 1024, 512>}, {pipeline_mode = #tpu.pipeline_mode<synchronous>, transform_indices = @transform_6, window_bounds = array<i64: 1, 512>}, {pipeline_mode = #tpu.pipeline_mode<synchronous>, transform_indices = @transform_7, window_bounds = array<i64: 512, 256>}, {pipeline_mode = #tpu.pipeline_mode<synchronous>, transform_indices = @transform_8, window_bounds = array<i64: 1, 256>}, {pipeline_mode = #tpu.pipeline_mode<synchronous>, transform_indices = @transform_9, window_bounds = array<i64: 1, 256>}, {transform_indices = @transform_10, window_bounds = array<i64: 1>}, {transform_indices = @transform_11, window_bounds = array<i64: 1, 16>}]} {
    %c0 = arith.constant 0 : index
    %c0_0 = arith.constant 0 : index
    %0 = vector.load %arg1[%c0, %c0_0] : memref<16x784xf32, #tpu.memory_space<vmem>>, vector<16x784xf32>
    %1 = arith.truncf %0 : vector<16x784xf32> to vector<16x784xbf16>
    %c0_1 = arith.constant 0 : index
    %c0_2 = arith.constant 0 : index
    %2 = vector.load %arg2[%c0_1, %c0_2] : memref<16x128xf32, #tpu.memory_space<vmem>>, vector<16x128xf32>
    %3 = arith.truncf %2 : vector<16x128xf32> to vector<16x128xbf16>
    %c0_3 = arith.constant 0 : index
    %c0_4 = arith.constant 0 : index
    %4 = vector.load %arg3[%c0_3, %c0_4] : memref<784x1024xbf16, #tpu.memory_space<vmem>>, vector<784x1024xbf16>
    %cst = arith.constant dense<0.000000e+00> : vector<16x1024xf32>
    %5 = tpu.matmul %1, %4, %cst {dimension_numbers = #tpu.dot_dimension_numbers<[1], [0], [0], [1], [0, 0, 1, 1], [], []>} : vector<16x784xbf16>, vector<784x1024xbf16>, vector<16x1024xf32> -> vector<16x1024xf32>
    %c0_5 = arith.constant 0 : index
    %c0_6 = arith.constant 0 : index
    %6 = vector.load %arg4[%c0_5, %c0_6] : memref<128x1024xbf16, #tpu.memory_space<vmem>>, vector<128x1024xbf16>
    %cst_7 = arith.constant dense<0.000000e+00> : vector<16x1024xf32>
    %7 = tpu.matmul %3, %6, %cst_7 {dimension_numbers = #tpu.dot_dimension_numbers<[1], [0], [0], [1], [0, 0, 1, 1], [], []>} : vector<16x128xbf16>, vector<128x1024xbf16>, vector<16x1024xf32> -> vector<16x1024xf32>
    %8 = arith.addf %5, %7 : vector<16x1024xf32>
    %c0_8 = arith.constant 0 : index
    %c0_9 = arith.constant 0 : index
    %9 = vector.load %arg5[%c0_8, %c0_9] : memref<1x1024xf32, #tpu.memory_space<vmem>>, vector<1x1024xf32>
    %10 = vector.broadcast %9 : vector<1x1024xf32> to vector<16x1024xf32>
    %11 = arith.addf %8, %10 : vector<16x1024xf32>
    %cst_10 = arith.constant 0.000000e+00 : f32
    %12 = vector.broadcast %cst_10 : f32 to vector<16x1024xf32>
    %13 = arith.cmpf ogt, %11, %12 : vector<16x1024xf32>
    %cst_11 = arith.constant 2.000000e-01 : f32
    %14 = vector.broadcast %cst_11 : f32 to vector<16x1024xf32>
    %15 = arith.mulf %14, %11 : vector<16x1024xf32>
    %16 = arith.select %13, %11, %15 : vector<16x1024xi1>, vector<16x1024xf32>
    %17 = arith.truncf %16 : vector<16x1024xf32> to vector<16x1024xbf16>
    %c0_12 = arith.constant 0 : index
    %c0_13 = arith.constant 0 : index
    %18 = vector.load %arg6[%c0_12, %c0_13] : memref<1024x512xbf16, #tpu.memory_space<vmem>>, vector<1024x512xbf16>
    %cst_14 = arith.constant dense<0.000000e+00> : vector<16x512xf32>
    %19 = tpu.matmul %17, %18, %cst_14 {dimension_numbers = #tpu.dot_dimension_numbers<[1], [0], [0], [1], [0, 0, 1, 1], [], []>} : vector<16x1024xbf16>, vector<1024x512xbf16>, vector<16x512xf32> -> vector<16x512xf32>
    %c0_15 = arith.constant 0 : index
    %c0_16 = arith.constant 0 : index
    %20 = vector.load %arg7[%c0_15, %c0_16] : memref<1x512xf32, #tpu.memory_space<vmem>>, vector<1x512xf32>
    %21 = vector.broadcast %20 : vector<1x512xf32> to vector<16x512xf32>
    %22 = arith.addf %19, %21 : vector<16x512xf32>
    %cst_17 = arith.constant 0.000000e+00 : f32
    %23 = vector.broadcast %cst_17 : f32 to vector<16x512xf32>
    %24 = arith.cmpf ogt, %22, %23 : vector<16x512xf32>
    %cst_18 = arith.constant 2.000000e-01 : f32
    %25 = vector.broadcast %cst_18 : f32 to vector<16x512xf32>
    %26 = arith.mulf %25, %22 : vector<16x512xf32>
    %27 = arith.select %24, %22, %26 : vector<16x512xi1>, vector<16x512xf32>
    %28 = arith.truncf %27 : vector<16x512xf32> to vector<16x512xbf16>
    %c0_19 = arith.constant 0 : index
    %c0_20 = arith.constant 0 : index
    %29 = vector.load %arg8[%c0_19, %c0_20] : memref<512x256xbf16, #tpu.memory_space<vmem>>, vector<512x256xbf16>
    %cst_21 = arith.constant dense<0.000000e+00> : vector<16x256xf32>
    %30 = tpu.matmul %28, %29, %cst_21 {dimension_numbers = #tpu.dot_dimension_numbers<[1], [0], [0], [1], [0, 0, 1, 1], [], []>} : vector<16x512xbf16>, vector<512x256xbf16>, vector<16x256xf32> -> vector<16x256xf32>
    %c0_22 = arith.constant 0 : index
    %c0_23 = arith.constant 0 : index
    %31 = vector.load %arg9[%c0_22, %c0_23] : memref<1x256xf32, #tpu.memory_space<vmem>>, vector<1x256xf32>
    %32 = vector.broadcast %31 : vector<1x256xf32> to vector<16x256xf32>
    %33 = arith.addf %30, %32 : vector<16x256xf32>
    %cst_24 = arith.constant 0.000000e+00 : f32
    %34 = vector.broadcast %cst_24 : f32 to vector<16x256xf32>
    %35 = arith.cmpf ogt, %33, %34 : vector<16x256xf32>
    %cst_25 = arith.constant 2.000000e-01 : f32
    %36 = vector.broadcast %cst_25 : f32 to vector<16x256xf32>
    %37 = arith.mulf %36, %33 : vector<16x256xf32>
    %38 = arith.select %35, %33, %37 : vector<16x256xi1>, vector<16x256xf32>
    %c0_26 = arith.constant 0 : index
    %c0_27 = arith.constant 0 : index
    %39 = vector.load %arg10[%c0_26, %c0_27] : memref<1x256xf32, #tpu.memory_space<vmem>>, vector<1x256xf32>
    %40 = vector.broadcast %39 : vector<1x256xf32> to vector<16x256xf32>
    %41 = arith.mulf %38, %40 : vector<16x256xf32>
    %cst_28 = arith.constant dense<0.000000e+00> : vector<16xf32>
    %42 = vector.multi_reduction <add>, %41, %cst_28 [1] : vector<16x256xf32> to vector<16xf32>
    %43 = vector.shape_cast %42 : vector<16xf32> to vector<16x1xf32>
    %c0_29 = arith.constant 0 : index
    %44 = memref.load %arg11[%c0_29] : memref<1xf32, #tpu.memory_space<smem>>
    %45 = vector.broadcast %44 : f32 to vector<16x1xf32>
    %46 = arith.addf %43, %45 : vector<16x1xf32>
    %cst_30 = arith.constant 0.000000e+00 : f32
    %47 = vector.broadcast %cst_30 : f32 to vector<16x1xf32>
    %48 = arith.subf %47, %46 : vector<16x1xf32>
    %49 = math.exp %48 : vector<16x1xf32>
    %cst_31 = arith.constant 1.000000e+00 : f32
    %50 = vector.broadcast %cst_31 : f32 to vector<16x1xf32>
    %51 = arith.addf %50, %49 : vector<16x1xf32>
    %52 = tpu.reciprocal %51 {approx = true} : vector<16x1xf32> -> vector<16x1xf32>
    %53 = tpu.transpose %52, [1, 0] : vector<16x1xf32> -> vector<1x16xf32>
    %c0_32 = arith.constant 0 : index
    %c0_33 = arith.constant 0 : index
    %54 = vector.load %arg12[%c0_32, %c0_33] : memref<1x16xf32, #tpu.memory_space<vmem>>, vector<1x16xf32>
    tpu.vector_store %arg12[%c0_32, %c0_33], %53 {strides = array<i32>} : memref<1x16xf32, #tpu.memory_space<vmem>>, vector<1x16xf32>,
    return
  }
  func.func @transform_0(%arg0: i32) -> (i32, i32) {
    %c0_i32 = arith.constant 0 : i32
    %c0_i32_0 = arith.constant 0 : i32
    return %arg0, %c0_i32 : i32, i32
  }
  func.func @transform_1(%arg0: i32) -> (i32, i32) {
    %c0_i32 = arith.constant 0 : i32
    %c0_i32_0 = arith.constant 0 : i32
    return %arg0, %c0_i32 : i32, i32
  }
  func.func @transform_2(%arg0: i32) -> (i32, i32) {
    %c0_i32 = arith.constant 0 : i32
    %c0_i32_0 = arith.constant 0 : i32
    %c0_i32_1 = arith.constant 0 : i32
    return %c0_i32, %c0_i32_0 : i32, i32
  }
  func.func @transform_3(%arg0: i32) -> (i32, i32) {
    %c0_i32 = arith.constant 0 : i32
    %c0_i32_0 = arith.constant 0 : i32
    %c0_i32_1 = arith.constant 0 : i32
    return %c0_i32, %c0_i32_0 : i32, i32
  }
  func.func @transform_4(%arg0: i32) -> (i32, i32) {
    %c0_i32 = arith.constant 0 : i32
    %c0_i32_0 = arith.constant 0 : i32
    %c0_i32_1 = arith.constant 0 : i32
    return %c0_i32, %c0_i32_0 : i32, i32
  }
  func.func @transform_5(%arg0: i32) -> (i32, i32) {
    %c0_i32 = arith.constant 0 : i32
    %c0_i32_0 = arith.constant 0 : i32
    %c0_i32_1 = arith.constant 0 : i32
    return %c0_i32, %c0_i32_0 : i32, i32
  }
  func.func @transform_6(%arg0: i32) -> (i32, i32) {
    %c0_i32 = arith.constant 0 : i32
    %c0_i32_0 = arith.constant 0 : i32
    %c0_i32_1 = arith.constant 0 : i32
    return %c0_i32, %c0_i32_0 : i32, i32
  }
  func.func @transform_7(%arg0: i32) -> (i32, i32) {
    %c0_i32 = arith.constant 0 : i32
    %c0_i32_0 = arith.constant 0 : i32
    %c0_i32_1 = arith.constant 0 : i32
    return %c0_i32, %c0_i32_0 : i32, i32
  }
  func.func @transform_8(%arg0: i32) -> (i32, i32) {
    %c0_i32 = arith.constant 0 : i32
    %c0_i32_0 = arith.constant 0 : i32
    %c0_i32_1 = arith.constant 0 : i32
    return %c0_i32, %c0_i32_0 : i32, i32
  }
  func.func @transform_9(%arg0: i32) -> (i32, i32) {
    %c0_i32 = arith.constant 0 : i32
    %c0_i32_0 = arith.constant 0 : i32
    %c0_i32_1 = arith.constant 0 : i32
    return %c0_i32, %c0_i32_0 : i32, i32
  }
  func.func @transform_10(%arg0: i32) -> i32 {
    %c0_i32 = arith.constant 0 : i32
    %c0_i32_0 = arith.constant 0 : i32
    return %c0_i32 : i32
  }
  func.func @transform_11(%arg0: i32) -> (i32, i32) {
    %c0_i32 = arith.constant 0 : i32
    %c0_i32_0 = arith.constant 0 : i32
    return %c0_i32, %arg0 : i32, i32
  }
}

</mosaic_0001>

<bundles_post_ra>
// kernel: discriminator_forward.1
= control target key start
LH: loop header
LB: loop body
LE: loop exit
PB: predicated region body
PF: predicated region fallthrough
CT: control target
= control target key end

     0   :  { %17 = vsyncpa [#allocation4], 0  ;;  %s11238_s0 = inlined_call_operand.vmem [shape: f32[16,784], index: 0, kind: input, shape index: {}]   ;;  %s11239_s1 = inlined_call_operand.vmem [shape: f32[16,128], index: 1, kind: input, shape index: {}]   ;;  %s11240_s2 = inlined_call_operand.hbm [shape: bf16[784,1024], index: 2, kind: input, shape index: {}]   ;;  %s11241_s3 = inlined_call_operand.hbm [shape: bf16[128,1024], index: 3, kind: input, shape index: {}]   ;;  %s11242_s4 = inlined_call_operand.hbm [shape: f32[1,1024], index: 4, kind: input, shape index: {}]   ;;  %s11243_s5 = inlined_call_operand.hbm [shape: bf16[1024,512], index: 5, kind: input, shape index: {}]   ;;  %s11244_s6 = inlined_call_operand.hbm [shape: f32[1,512], index: 6, kind: input, shape index: {}]   ;;  %s11245_s7 = inlined_call_operand.hbm [shape: bf16[512,256], index: 7, kind: input, shape index: {}]   ;;  %s11246_s8 = inlined_call_operand.hbm [shape: f32[1,256], index: 8, kind: input, shape index: {}]   ;;  %s11247_s9 = inlined_call_operand.hbm [shape: f32[1,256], index: 9, kind: input, shape index: {}]   ;;  %s11248_s10 = inlined_call_operand.<no memory space> [shape: f32[1], index: 10, kind: input, shape index: {}]   ;;  %s11249_s11 = inlined_call_operand.vmem [shape: f32[1,16], index: 11, kind: output, shape index: {}]  }
   0x1   :  { %18 = vsyncpa [#allocation6], 0 }
   0x2   :  { %19 = vsyncpa [#allocation9], 0 }
   0x3   :  { %20 = vsyncpa [#allocation12], 0 }
   0x4   :  { %21 = vsyncpa [#allocation15], 0  ;;  %s43_s19 = sshll.u32 %s11241_s3, 4  ;;  %s10630_s20 = smov [#allocation5]   ;;  %s44_s19 = int_to_ptr.hbm [resolvable:$true] %s43_s19 }
   0x5   :  { %s45_s21 = sshll.u32 %s10630_s20, 4  ;;  %s67_s24 = sshll.u32 %s11243_s5, 4  ;;  %s46_s21 = int_to_ptr.vmem [resolvable:$true] %s45_s21  ;;  %s68_s24 = int_to_ptr.hbm [resolvable:$true] %s67_s24 }
   0x6   :  { %s10631_s25 = smov 512   ;;  %s10632_s26 = smov 32  }
   0x7   :  { %51 = dma.hbm_to_vmem [thread:$0]  %s44_s19, 8192, %s46_s21, [#allocation6], %s10631_s25, %s10631_s25, %s10632_s26  }
   0x8   :  { %s10633_s27 = smov [#allocation8]   ;;  %s10634_s29 = smov 256  }
   0x9   :  { %s69_s28 = sshll.u32 %s10633_s27, 4  ;;  %s10635_s30 = smov 16   ;;  %s70_s28 = int_to_ptr.vmem [resolvable:$true] %s69_s28 }
   0xa   :  { %75 = dma.hbm_to_vmem [thread:$0]  %s68_s24, 32768, %s70_s28, [#allocation9], %s10634_s29, %s10634_s29, %s10635_s30  }
   0xb   :  { %s91_s13 = sshll.u32 %s11245_s7, 4  ;;  %s10636_s14 = smov [#allocation11]   ;;  %s92_s13 = int_to_ptr.hbm [resolvable:$true] %s91_s13 }
   0xc   :  { %s93_s15 = sshll.u32 %s10636_s14, 4  ;;  %s30_s17 = sshll.u32 %s11240_s2, 4  ;;  %s94_s15 = int_to_ptr.vmem [resolvable:$true] %s93_s15  ;;  %s31_s17 = int_to_ptr.hbm [resolvable:$true] %s30_s17 }
   0xd   :  { %s10637_s18 = smov 128   ;;  %s10638_s19 = smov 8  }
   0xe   :  { %99 = dma.hbm_to_vmem [thread:$0]  %s92_s13, 8192, %s94_s15, [#allocation12], %s10637_s18, %s10637_s18, %s10638_s19  }
   0xf   :  { %s10639_s20 = smov [#allocation3]   ;;  %s57_s24 = sshll.u32 %s11242_s4, 4  ;;  %s58_s24 = int_to_ptr.hbm [resolvable:$true] %s57_s24 }
  0x10   :  { %s32_s21 = sshll.u32 %s10639_s20, 4  ;;  %s81_s28 = sshll.u32 %s11244_s6, 4  ;;  %s33_s21 = int_to_ptr.vmem [resolvable:$true] %s32_s21  ;;  %s82_s28 = int_to_ptr.hbm [resolvable:$true] %s81_s28 }
  0x11   :  { %38 = dma.hbm_to_vmem [thread:$0]  %s31_s17, 50176, %s33_s21, [#allocation4], %s10631_s25, %s10631_s25, %s10632_s26  }
  0x12   :  { %s10640_s29 = smov [#allocation7]   ;;  %s10641_s2 = smov [#allocation10]  }
  0x13   :  { %s59_s30 = sshll.u32 %s10640_s29, 4  ;;  %s83_s12 = sshll.u32 %s10641_s2, 4  ;;  %s60_s30 = int_to_ptr.vmem [resolvable:$true] %s59_s30  ;;  %s84_s12 = int_to_ptr.vmem [resolvable:$true] %s83_s12 }
  0x14   :  { %62 = dma.hbm_to_vmem [thread:$0]  %s58_s24, 128, %s60_s30, [#allocation6]  }
  0x15   :  { %s105_s14 = sshll.u32 %s11246_s8, 4  ;;  %s116_s26 = sshll.u32 %s11247_s9, 4  ;;  %s106_s14 = int_to_ptr.hbm [resolvable:$true] %s105_s14  ;;  %s117_s26 = int_to_ptr.hbm [resolvable:$true] %s116_s26 }
  0x16   :  { %86 = dma.hbm_to_vmem [thread:$0]  %s82_s28, 64, %s84_s12, [#allocation9]  }
  0x17   :  { %s10642_s15 = smov [#allocation13]   ;;  %s10643_s16 = smov [#allocation14]  }
  0x18   :  { %s107_s6 = sshll.u32 %s10642_s15, 4  ;;  %s118_s5 = sshll.u32 %s10643_s16, 4  ;;  %s108_s6 = int_to_ptr.vmem [resolvable:$true] %s107_s6  ;;  %s119_s5 = int_to_ptr.vmem [resolvable:$true] %s118_s5 }
  0x19   :  { %110 = dma.hbm_to_vmem [thread:$0]  %s106_s14, 32, %s108_s6, [#allocation12]  }
  0x1a   :  { %121 = dma.hbm_to_vmem [thread:$0]  %s117_s26, 32, %s119_s5, [#allocation15]  }
  0x1b   :  { %10620 = dma.done.wait [#allocation4], 50176  }
  0x1c   :  { %10621 = vsyncadd [#allocation4], 4294917120 }
  0x1d   :  { %10622 = dma.done.wait [#allocation6], 8320  }
  0x1e   :  { %10623 = vsyncadd [#allocation6], 4294958976 }
  0x1f   :  { %10624 = dma.done.wait [#allocation9], 32832  }
  0x20   :  { %10625 = vsyncadd [#allocation9], 4294934464 }
  0x21   :  { %10626 = dma.done.wait [#allocation12], 8224  }
  0x22   :  { %10627 = vsyncadd [#allocation12], 4294959072 }
  0x23   :  { %10628 = dma.done.wait [#allocation15], 32  }
  0x24   :  { %10629 = vsyncadd [#allocation15], 4294967264  ;;  %v6742_v0 = vld [vmem:[#allocation5 + $0x1c0] sm:$0xf]  ;;  %v10076_v2 = vld [vmem:[#allocation5 + $0x1c4] sm:$0xf] }
  0x25   :  { %v10080_v1 = vld [vmem:[#allocation5 + $0x1dc] sm:$0xf0]  ;;  %v6744_v4 = vld [vmem:[#allocation5 + $0x1e0] sm:$0xf0]  ;;  %v6750_v5 = vld [vmem:[#allocation5 + $0x1c8] sm:$0xf] }
  0x26   :  { %v6743_v3 = vor.u32 %v10080_v1, %v6742_v0  ;;  %v10081_v6 = vld [vmem:[#allocation5 + $0x1e4] sm:$0xf0]  ;;  %v6747_v7 = vor.u32 %v10076_v2, %v6744_v4  ;;  %v10077_v9 = vld [vmem:[#allocation5 + $0x1cc] sm:$0xf]  ;;  %v6710_v11 = vld [vmem:[#allocation5 + $0x180] sm:$0xf] }
  0x27   :  { %v6751_v8 = vor.u32 %v10081_v6, %v6750_v5  ;;  %v6752_v10 = vld [vmem:[#allocation5 + $0x1e8] sm:$0xf0]  ;;  %v10072_v13 = vld [vmem:[#allocation5 + $0x19c] sm:$0xf0]  ;;  %v10068_v14 = vld [vmem:[#allocation5 + $0x184] sm:$0xf] }
  0x28   :  { %957 = vmatpush.bf16.msra.mxu0 %v6743_v3  ;;  %v6755_v12 = vor.u32 %v10077_v9, %v6752_v10  ;;  %v6712_v15 = vld [vmem:[#allocation5 + $0x1a0] sm:$0xf0]  ;;  %971 = vmatpush.bf16.msra.mxu1 %v6747_v7  ;;  %v6711_v16 = vor.u32 %v10072_v13, %v6710_v11  ;;  %v6718_v18 = vld [vmem:[#allocation5 + $0x188] sm:$0xf]  ;;  %v10069_v20 = vld [vmem:[#allocation5 + $0x18c] sm:$0xf] }
  0x29   :  { %985 = vmatpush.bf16.msra.mxu2 %v6751_v8  ;;  %v6715_v17 = vor.u32 %v10068_v14, %v6712_v15  ;;  %v10073_v19 = vld [vmem:[#allocation5 + $0x1a4] sm:$0xf0]  ;;  %v6720_v22 = vld [vmem:[#allocation5 + $0x1a8] sm:$0xf0]  ;;  %v6678_v23 = vld [vmem:[#allocation5 + $0x140] sm:$0xf] }
  0x2a   :  { %999 = vmatpush.bf16.msra.mxu3 %v6755_v12  ;;  %v6719_v21 = vor.u32 %v10073_v19, %v6718_v18  ;;  %v10064_v24 = vld [vmem:[#allocation5 + $0x15c] sm:$0xf0]  ;;  %v6723_v25 = vor.u32 %v10069_v20, %v6720_v22  ;;  %v10060_v26 = vld [vmem:[#allocation5 + $0x144] sm:$0xf]  ;;  %v6686_v28 = vld [vmem:[#allocation5 + $0x148] sm:$0xf] }
  0x2b   :  { %v6680_v27 = vld [vmem:[#allocation5 + $0x160] sm:$0xf0]  ;;  %v6679_v29 = vor.u32 %v10064_v24, %v6678_v23  ;;  %v10065_v30 = vld [vmem:[#allocation5 + $0x164] sm:$0xf0]  ;;  %v10061_v31 = vld [vmem:[#allocation5 + $0x14c] sm:$0xf] }
  0x2c   :  { %958 = vmatpush.bf16.msra.mxu0 %v6711_v16  ;;  %v6688_v32 = vld [vmem:[#allocation5 + $0x168] sm:$0xf0]  ;;  %972 = vmatpush.bf16.msra.mxu1 %v6715_v17  ;;  %v6683_v33 = vor.u32 %v10060_v26, %v6680_v27  ;;  %v6687_v34 = vor.u32 %v10065_v30, %v6686_v28  ;;  %v6646_v35 = vld [vmem:[#allocation5 + $0x100] sm:$0xf]  ;;  %v10052_v37 = vld [vmem:[#allocation5 + $0x104] sm:$0xf] }
  0x2d   :  { %986 = vmatpush.bf16.msra.mxu2 %v6719_v21  ;;  %v10056_v36 = vld [vmem:[#allocation5 + $0x11c] sm:$0xf0]  ;;  %v6691_v38 = vor.u32 %v10061_v31, %v6688_v32  ;;  %v6648_v39 = vld [vmem:[#allocation5 + $0x120] sm:$0xf0]  ;;  %v6654_v40 = vld [vmem:[#allocation5 + $0x108] sm:$0xf] }
  0x2e   :  { %1000 = vmatpush.bf16.msra.mxu3 %v6723_v25  ;;  %v10057_v41 = vld [vmem:[#allocation5 + $0x124] sm:$0xf0]  ;;  %v10053_v42 = vld [vmem:[#allocation5 + $0x10c] sm:$0xf]  ;;  %v6647_v44 = vor.u32 %v10056_v36, %v6646_v35  ;;  %v6651_v45 = vor.u32 %v10052_v37, %v6648_v39  ;;  %v6614_v47 = vld [vmem:[#allocation5 + $0xc0] sm:$0xf] }
  0x2f   :  { %v6656_v43 = vld [vmem:[#allocation5 + $0x128] sm:$0xf0]  ;;  %v6655_v46 = vor.u32 %v10057_v41, %v6654_v40  ;;  %v10048_v48 = vld [vmem:[#allocation5 + $0xdc] sm:$0xf0]  ;;  %v10044_v49 = vld [vmem:[#allocation5 + $0xc4] sm:$0xf] }
  0x30   :  { %959 = vmatpush.bf16.msra.mxu0 %v6679_v29  ;;  %973 = vmatpush.bf16.msra.mxu1 %v6683_v33  ;;  %v6659_v50 = vor.u32 %v10053_v42, %v6656_v43  ;;  %v6616_v51 = vld [vmem:[#allocation5 + $0xe0] sm:$0xf0]  ;;  %v6622_v52 = vld [vmem:[#allocation5 + $0xc8] sm:$0xf]  ;;  %v10045_v54 = vld [vmem:[#allocation5 + $0xcc] sm:$0xf]  ;;  %v6615_v56 = vor.u32 %v10048_v48, %v6614_v47 }
  0x31   :  { %987 = vmatpush.bf16.msra.mxu2 %v6687_v34  ;;  %v10049_v53 = vld [vmem:[#allocation5 + $0xe4] sm:$0xf0]  ;;  %v6624_v55 = vld [vmem:[#allocation5 + $0xe8] sm:$0xf0]  ;;  %v6619_v57 = vor.u32 %v10044_v49, %v6616_v51  ;;  %v6582_v59 = vld [vmem:[#allocation5 + $0x80] sm:$0xf] }
  0x32   :  { %1001 = vmatpush.bf16.msra.mxu3 %v6691_v38  ;;  %v6623_v58 = vor.u32 %v10049_v53, %v6622_v52  ;;  %v10040_v60 = vld [vmem:[#allocation5 + $0x9c] sm:$0xf0]  ;;  %v10036_v61 = vld [vmem:[#allocation5 + $0x84] sm:$0xf]  ;;  %v6627_v62 = vor.u32 %v10045_v54, %v6624_v55  ;;  %v6590_v0 = vld [vmem:[#allocation5 + $0x88] sm:$0xf] }
  0x33   :  { %v6584_v63 = vld [vmem:[#allocation5 + $0xa0] sm:$0xf0]  ;;  %v10041_v1 = vld [vmem:[#allocation5 + $0xa4] sm:$0xf0]  ;;  %v10037_v2 = vld [vmem:[#allocation5 + $0x8c] sm:$0xf]  ;;  %v6583_v4 = vor.u32 %v10040_v60, %v6582_v59 }
  0x34   :  { %960 = vmatpush.bf16.msra.mxu0 %v6647_v44  ;;  %974 = vmatpush.bf16.msra.mxu1 %v6651_v45  ;;  %v6592_v3 = vld [vmem:[#allocation5 + $0xa8] sm:$0xf0]  ;;  %v6587_v5 = vor.u32 %v10036_v61, %v6584_v63  ;;  %v6591_v6 = vor.u32 %v10041_v1, %v6590_v0  ;;  %v6550_v7 = vld [vmem:[#allocation5 + $0x40] sm:$0xf]  ;;  %v10028_v9 = vld [vmem:[#allocation5 + $0x44] sm:$0xf] }
  0x35   :  { %988 = vmatpush.bf16.msra.mxu2 %v6655_v46  ;;  %v10032_v8 = vld [vmem:[#allocation5 + $0x5c] sm:$0xf0]  ;;  %v6595_v10 = vor.u32 %v10037_v2, %v6592_v3  ;;  %v6552_v11 = vld [vmem:[#allocation5 + $0x60] sm:$0xf0]  ;;  %v6558_v12 = vld [vmem:[#allocation5 + $0x48] sm:$0xf] }
  0x36   :  { %1002 = vmatpush.bf16.msra.mxu3 %v6659_v50  ;;  %v10033_v13 = vld [vmem:[#allocation5 + $0x64] sm:$0xf0]  ;;  %v10029_v14 = vld [vmem:[#allocation5 + $0x4c] sm:$0xf]  ;;  %v6551_v16 = vor.u32 %v10032_v8, %v6550_v7  ;;  %v6518_v17 = vld [vmem:[#allocation5] sm:$0xf]  ;;  %v6555_v19 = vor.u32 %v10028_v9, %v6552_v11 }
  0x37   :  { %v6560_v15 = vld [vmem:[#allocation5 + $0x68] sm:$0xf0]  ;;  %v10024_v18 = vld [vmem:[#allocation5 + $0x1c] sm:$0xf0]  ;;  %v6559_v20 = vor.u32 %v10033_v13, %v6558_v12  ;;  %v10020_v21 = vld [vmem:[#allocation5 + $0x4] sm:$0xf] }
  0x38   :  { %961 = vmatpush.bf16.msra.mxu0 %v6615_v56  ;;  %975 = vmatpush.bf16.msra.mxu1 %v6619_v57  ;;  %v6520_v22 = vld [vmem:[#allocation5 + $0x20] sm:$0xf0]  ;;  %v6526_v23 = vld [vmem:[#allocation5 + $0x8] sm:$0xf]  ;;  %v6563_v24 = vor.u32 %v10029_v14, %v6560_v15  ;;  %v10021_v26 = vld [vmem:[#allocation5 + $0xc] sm:$0xf]  ;;  %v6519_v31 = vor.u32 %v10024_v18, %v6518_v17 }
  0x39   :  { %989 = vmatpush.bf16.msra.mxu2 %v6623_v58  ;;  %v10025_v25 = vld [vmem:[#allocation5 + $0x24] sm:$0xf0]  ;;  %v6528_v27 = vld [vmem:[#allocation5 + $0x28] sm:$0xf0]  ;;  %v6758_v28 = vld [vmem:[#allocation5 + $0x1d0] sm:$0xf]  ;;  %v6523_v35 = vor.u32 %v10020_v21, %v6520_v22 }
  0x3a   :  { %1003 = vmatpush.bf16.msra.mxu3 %v6627_v62  ;;  %v10082_v29 = vld [vmem:[#allocation5 + $0x1ec] sm:$0xf0]  ;;  %v10078_v30 = vld [vmem:[#allocation5 + $0x1d4] sm:$0xf]  ;;  %v6766_v33 = vld [vmem:[#allocation5 + $0x1d8] sm:$0xf]  ;;  %v6527_v36 = vor.u32 %v10025_v25, %v6526_v23  ;;  %v6531_v39 = vor.u32 %v10021_v26, %v6528_v27 }
  0x3b   :  { %v6760_v32 = vld [vmem:[#allocation5 + $0x1f0] sm:$0xf0]  ;;  %v10083_v34 = vld [vmem:[#allocation5 + $0x1f4] sm:$0xf0]  ;;  %v10079_v37 = vld [vmem:[#allocation5 + $0x1dc] sm:$0xf]  ;;  %v6759_v40 = vor.u32 %v10082_v29, %v6758_v28 }
  0x3c   :  { %962 = vmatpush.bf16.msra.mxu0 %v6583_v4  ;;  %976 = vmatpush.bf16.msra.mxu1 %v6587_v5  ;;  %v6768_v38 = vld [vmem:[#allocation5 + $0x1f8] sm:$0xf0]  ;;  %v6763_v41 = vor.u32 %v10078_v30, %v6760_v32  ;;  %v6767_v42 = vor.u32 %v10083_v34, %v6766_v33  ;;  %v6726_v43 = vld [vmem:[#allocation5 + $0x190] sm:$0xf]  ;;  %v10070_v45 = vld [vmem:[#allocation5 + $0x194] sm:$0xf] }
  0x3d   :  { %990 = vmatpush.bf16.msra.mxu2 %v6591_v6  ;;  %v10074_v44 = vld [vmem:[#allocation5 + $0x1ac] sm:$0xf0]  ;;  %v6771_v46 = vor.u32 %v10079_v37, %v6768_v38  ;;  %v6728_v47 = vld [vmem:[#allocation5 + $0x1b0] sm:$0xf0]  ;;  %v6734_v48 = vld [vmem:[#allocation5 + $0x198] sm:$0xf] }
  0x3e   :  { %1004 = vmatpush.bf16.msra.mxu3 %v6595_v10  ;;  %v10075_v49 = vld [vmem:[#allocation5 + $0x1b4] sm:$0xf0]  ;;  %v10071_v50 = vld [vmem:[#allocation5 + $0x19c] sm:$0xf]  ;;  %v6727_v52 = vor.u32 %v10074_v44, %v6726_v43  ;;  %v6731_v53 = vor.u32 %v10070_v45, %v6728_v47  ;;  %v6694_v55 = vld [vmem:[#allocation5 + $0x150] sm:$0xf] }
  0x3f   :  { %v6736_v51 = vld [vmem:[#allocation5 + $0x1b8] sm:$0xf0]  ;;  %v6735_v54 = vor.u32 %v10075_v49, %v6734_v48  ;;  %v10066_v56 = vld [vmem:[#allocation5 + $0x16c] sm:$0xf0]  ;;  %v10062_v57 = vld [vmem:[#allocation5 + $0x154] sm:$0xf] }
  0x40   :  { %963 = vmatpush.bf16.msra.mxu0 %v6551_v16  ;;  %977 = vmatpush.bf16.msra.mxu1 %v6555_v19  ;;  %v6739_v58 = vor.u32 %v10071_v50, %v6736_v51  ;;  %v6696_v59 = vld [vmem:[#allocation5 + $0x170] sm:$0xf0]  ;;  %v6702_v60 = vld [vmem:[#allocation5 + $0x158] sm:$0xf]  ;;  %v10063_v62 = vld [vmem:[#allocation5 + $0x15c] sm:$0xf]  ;;  %v6695_v0 = vor.u32 %v10066_v56, %v6694_v55 }
  0x41   :  { %991 = vmatpush.bf16.msra.mxu2 %v6559_v20  ;;  %v10067_v61 = vld [vmem:[#allocation5 + $0x174] sm:$0xf0]  ;;  %v6704_v63 = vld [vmem:[#allocation5 + $0x178] sm:$0xf0]  ;;  %v178_v1 = vld [vmem:[%s11239_s1] sm:$0xff]  ;;  %v6699_v3 = vor.u32 %v10062_v57, %v6696_v59  ;;  %vm3029_vm0 = vcmask 130048  }
  0x42   :  { %1005 = vmatpush.bf16.msra.mxu3 %v6563_v24  ;;  %v179_v2 = vld [vmem:[%s11239_s1 + $0x8] sm:$0xff]  ;;  %v6703_v4 = vor.u32 %v10067_v61, %v6702_v60  ;;  %v6662_v5 = vld [vmem:[#allocation5 + $0x110] sm:$0xf]  ;;  %v10054_v7 = vld [vmem:[#allocation5 + $0x114] sm:$0xf]  ;;  %v6707_v9 = vor.u32 %v10063_v62, %v6704_v63 }
  0x43   :  { %v10058_v6 = vld [vmem:[#allocation5 + $0x12c] sm:$0xf0]  ;;  %v10734_v8 = vpack.c.bf16 %v179_v2, %v178_v1  ;;  %v6664_v10 = vld [vmem:[#allocation5 + $0x130] sm:$0xf0]  ;;  %v6670_v11 = vld [vmem:[#allocation5 + $0x118] sm:$0xf] }
  0x44   :  { %964 = vmatpush.bf16.msra.mxu0 %v6519_v31  ;;  %978 = vmatpush.bf16.msra.mxu1 %v6523_v35  ;;  %v10059_v12 = vld [vmem:[#allocation5 + $0x134] sm:$0xf0]  ;;  %v10055_v13 = vld [vmem:[#allocation5 + $0x11c] sm:$0xf]  ;;  %v6663_v15 = vor.u32 %v10058_v6, %v6662_v5  ;;  %v6667_v16 = vor.u32 %v10054_v7, %v6664_v10  ;;  %v6630_v18 = vld [vmem:[#allocation5 + $0xd0] sm:$0xf] }
  0x45   :  { %992 = vmatpush.bf16.msra.mxu2 %v6527_v36  ;;  %v6672_v14 = vld [vmem:[#allocation5 + $0x138] sm:$0xf0]  ;;  %v6671_v17 = vor.u32 %v10059_v12, %v6670_v11  ;;  %v10050_v19 = vld [vmem:[#allocation5 + $0xec] sm:$0xf0]  ;;  %v10046_v20 = vld [vmem:[#allocation5 + $0xd4] sm:$0xf] }
  0x46   :  { %1006 = vmatpush.bf16.msra.mxu3 %v6531_v39  ;;  %v6675_v21 = vor.u32 %v10055_v13, %v6672_v14  ;;  %v6632_v22 = vld [vmem:[#allocation5 + $0xf0] sm:$0xf0]  ;;  %v6638_v23 = vld [vmem:[#allocation5 + $0xd8] sm:$0xf]  ;;  %v10047_v25 = vld [vmem:[#allocation5 + $0xdc] sm:$0xf]  ;;  %v6631_v27 = vor.u32 %v10050_v19, %v6630_v18 }
  0x47   :  { %979 = vmatmul.bf16.vlgmr.msra.gmra.mxu1 %v10734_v8  ;;  %v10051_v24 = vld [vmem:[#allocation5 + $0xf4] sm:$0xf0]  ;;  %965 = vmatmul.bf16.vlgmr.msra.gmra.mxu0 %v10734_v8  ;;  %v6640_v26 = vld [vmem:[#allocation5 + $0xf8] sm:$0xf0]  ;;  %v6635_v28 = vor.u32 %v10046_v20, %v6632_v22  ;;  %v6598_v30 = vld [vmem:[#allocation5 + $0x90] sm:$0xf] }
  0x48   :  { %1013 = vmatpush.bf16.msrb.mxu0 %v6759_v40  ;;  %1027 = vmatpush.bf16.msrb.mxu1 %v6763_v41  ;;  %v6639_v29 = vor.u32 %v10051_v24, %v6638_v23  ;;  %v10042_v31 = vld [vmem:[#allocation5 + $0xac] sm:$0xf0]  ;;  %v10038_v32 = vld [vmem:[#allocation5 + $0x94] sm:$0xf]  ;;  %v6643_v33 = vor.u32 %v10047_v25, %v6640_v26  ;;  %v6606_v35 = vld [vmem:[#allocation5 + $0x98] sm:$0xf] }
  0x49   :  { %1041 = vmatpush.bf16.msrb.mxu2 %v6767_v42  ;;  %1007 = vmatmul.bf16.vlgmr.msra.gmra.mxu3 %v10734_v8  ;;  %v6600_v34 = vld [vmem:[#allocation5 + $0xb0] sm:$0xf0]  ;;  %v10043_v36 = vld [vmem:[#allocation5 + $0xb4] sm:$0xf0]  ;;  %v10039_v37 = vld [vmem:[#allocation5 + $0x9c] sm:$0xf]  ;;  %v6599_v39 = vor.u32 %v10042_v31, %v6598_v30 }
  0x4a   :  { %1055 = vmatpush.bf16.msrb.mxu3 %v6771_v46  ;;  %993 = vmatmul.bf16.vlgmr.msra.gmra.mxu2 %v10734_v8  ;;  %v6608_v38 = vld [vmem:[#allocation5 + $0xb8] sm:$0xf0]  ;;  %v6603_v40 = vor.u32 %v10038_v32, %v6600_v34  ;;  %v6607_v41 = vor.u32 %v10043_v36, %v6606_v35  ;;  %v6566_v42 = vld [vmem:[#allocation5 + $0x50] sm:$0xf]  ;;  %v10030_v44 = vld [vmem:[#allocation5 + $0x54] sm:$0xf] }
  0x4b   :  { %v10034_v43 = vld [vmem:[#allocation5 + $0x6c] sm:$0xf0]  ;;  %v6611_v45 = vor.u32 %v10039_v37, %v6608_v38  ;;  %v6568_v46 = vld [vmem:[#allocation5 + $0x70] sm:$0xf0]  ;;  %v6574_v47 = vld [vmem:[#allocation5 + $0x58] sm:$0xf] }
  0x4c   :  { %1014 = vmatpush.bf16.msrb.mxu0 %v6727_v52  ;;  %1028 = vmatpush.bf16.msrb.mxu1 %v6731_v53  ;;  %v10035_v48 = vld [vmem:[#allocation5 + $0x74] sm:$0xf0]  ;;  %v10031_v49 = vld [vmem:[#allocation5 + $0x5c] sm:$0xf]  ;;  %v6567_v51 = vor.u32 %v10034_v43, %v6566_v42  ;;  %v6534_v52 = vld [vmem:[#allocation5 + $0x10] sm:$0xf] }
  0x4d   :  { %1042 = vmatpush.bf16.msrb.mxu2 %v6735_v54  ;;  %v6576_v50 = vld [vmem:[#allocation5 + $0x78] sm:$0xf0]  ;;  %v10026_v53 = vld [vmem:[#allocation5 + $0x2c] sm:$0xf0]  ;;  %v6571_v54 = vor.u32 %v10030_v44, %v6568_v46  ;;  %v6575_v55 = vor.u32 %v10035_v48, %v6574_v47  ;;  %v10022_v56 = vld [vmem:[#allocation5 + $0x14] sm:$0xf] }
  0x4e   :  { %1056 = vmatpush.bf16.msrb.mxu3 %v6739_v58  ;;  %v6536_v57 = vld [vmem:[#allocation5 + $0x30] sm:$0xf0]  ;;  %v6542_v58 = vld [vmem:[#allocation5 + $0x18] sm:$0xf]  ;;  %v6579_v59 = vor.u32 %v10031_v49, %v6576_v50  ;;  %v10023_v61 = vld [vmem:[#allocation5 + $0x1c] sm:$0xf]  ;;  %v6535_v2 = vor.u32 %v10026_v53, %v6534_v52 }
  0x4f   :  { %v10027_v60 = vld [vmem:[#allocation5 + $0x34] sm:$0xf0]  ;;  %v6544_v62 = vld [vmem:[#allocation5 + $0x38] sm:$0xf0]  ;;  %v6998_v63 = vld [vmem:[#allocation3 + $0x1c0] sm:$0xf]  ;;  %v6539_v6 = vor.u32 %v10022_v56, %v6536_v57 }
  0x50   :  { %1015 = vmatpush.bf16.msrb.mxu0 %v6695_v0  ;;  %1029 = vmatpush.bf16.msrb.mxu1 %v6699_v3  ;;  %v9688_v0 = vld [vmem:[#allocation3 + $0x1dc] sm:$0xf0]  ;;  %v6543_v7 = vor.u32 %v10027_v60, %v6542_v58  ;;  %v6547_v11 = vor.u32 %v10023_v61, %v6544_v62 }
  0x51   :  { %1043 = vmatpush.bf16.msrb.mxu2 %v6703_v4  ;;  %v7254_v1 = vld [vmem:[#allocation3 + $0x3c0] sm:$0xf]  ;;  %v6999_v12 = vor.u32 %v9688_v0, %v6998_v63 }
  0x52   :  { %1057 = vmatpush.bf16.msrb.mxu3 %v6707_v9  ;;  %v9752_v3 = vld [vmem:[#allocation3 + $0x3dc] sm:$0xf0] }
  0x53   :  { %v7510_v4 = vld [vmem:[#allocation3 + $0x5c0] sm:$0xf]  ;;  %v7255_v13 = vor.u32 %v9752_v3, %v7254_v1 }
  0x54   :  { %1016 = vmatpush.bf16.msrb.mxu0 %v6663_v15  ;;  %1030 = vmatpush.bf16.msrb.mxu1 %v6667_v16  ;;  %v9816_v5 = vld [vmem:[#allocation3 + $0x5dc] sm:$0xf0] }
  0x55   :  { %1044 = vmatpush.bf16.msrb.mxu2 %v6671_v17  ;;  %v7766_v9 = vld [vmem:[#allocation3 + $0x7c0] sm:$0xf]  ;;  %v7511_v14 = vor.u32 %v9816_v5, %v7510_v4 }
  0x56   :  { %1058 = vmatpush.bf16.msrb.mxu3 %v6675_v21  ;;  %v9880_v10 = vld [vmem:[#allocation3 + $0x7dc] sm:$0xf0] }
  0x57   :  { %v6966_v15 = vld [vmem:[#allocation3 + $0x180] sm:$0xf]  ;;  %v7767_v18 = vor.u32 %v9880_v10, %v7766_v9 }
  0x58   :  { %1017 = vmatpush.bf16.msrb.mxu0 %v6631_v27  ;;  %1031 = vmatpush.bf16.msrb.mxu1 %v6635_v28  ;;  %v9680_v16 = vld [vmem:[#allocation3 + $0x19c] sm:$0xf0] }
  0x59   :  { %1045 = vmatpush.bf16.msrb.mxu2 %v6639_v29  ;;  %v7222_v17 = vld [vmem:[#allocation3 + $0x380] sm:$0xf]  ;;  %v6967_v24 = vor.u32 %v9680_v16, %v6966_v15 }
  0x5a   :  { %1059 = vmatpush.bf16.msrb.mxu3 %v6643_v33  ;;  %v9744_v19 = vld [vmem:[#allocation3 + $0x39c] sm:$0xf0] }
  0x5b   :  { %v7478_v20 = vld [vmem:[#allocation3 + $0x580] sm:$0xf]  ;;  %v7223_v25 = vor.u32 %v9744_v19, %v7222_v17 }
  0x5c   :  { %1018 = vmatpush.bf16.msrb.mxu0 %v6599_v39  ;;  %1032 = vmatpush.bf16.msrb.mxu1 %v6603_v40  ;;  %v9808_v21 = vld [vmem:[#allocation3 + $0x59c] sm:$0xf0] }
  0x5d   :  { %1046 = vmatpush.bf16.msrb.mxu2 %v6607_v41  ;;  %v7734_v22 = vld [vmem:[#allocation3 + $0x780] sm:$0xf]  ;;  %v7479_v26 = vor.u32 %v9808_v21, %v7478_v20 }
  0x5e   :  { %1060 = vmatpush.bf16.msrb.mxu3 %v6611_v45  ;;  %v9872_v23 = vld [vmem:[#allocation3 + $0x79c] sm:$0xf0] }
  0x5f   :  { %v6934_v27 = vld [vmem:[#allocation3 + $0x140] sm:$0xf]  ;;  %v7735_v30 = vor.u32 %v9872_v23, %v7734_v22 }
  0x60   :  { %1019 = vmatpush.bf16.msrb.mxu0 %v6567_v51  ;;  %1033 = vmatpush.bf16.msrb.mxu1 %v6571_v54  ;;  %v9672_v28 = vld [vmem:[#allocation3 + $0x15c] sm:$0xf0] }
  0x61   :  { %1047 = vmatpush.bf16.msrb.mxu2 %v6575_v55  ;;  %v7190_v29 = vld [vmem:[#allocation3 + $0x340] sm:$0xf]  ;;  %v6935_v36 = vor.u32 %v9672_v28, %v6934_v27 }
  0x62   :  { %1061 = vmatpush.bf16.msrb.mxu3 %v6579_v59  ;;  %v9736_v31 = vld [vmem:[#allocation3 + $0x35c] sm:$0xf0] }
  0x63   :  { %v7446_v32 = vld [vmem:[#allocation3 + $0x540] sm:$0xf]  ;;  %v7191_v37 = vor.u32 %v9736_v31, %v7190_v29 }
  0x64   :  { %1020 = vmatpush.bf16.msrb.mxu0 %v6535_v2  ;;  %1034 = vmatpush.bf16.msrb.mxu1 %v6539_v6  ;;  %v9800_v33 = vld [vmem:[#allocation3 + $0x55c] sm:$0xf0] }
  0x65   :  { %1048 = vmatpush.bf16.msrb.mxu2 %v6543_v7  ;;  %v7702_v34 = vld [vmem:[#allocation3 + $0x740] sm:$0xf]  ;;  %v7447_v38 = vor.u32 %v9800_v33, %v7446_v32 }
  0x66   :  { %1062 = vmatpush.bf16.msrb.mxu3 %v6547_v11  ;;  %v9864_v35 = vld [vmem:[#allocation3 + $0x75c] sm:$0xf0] }
  0x67   :  { %1021 = vmatmul.bf16.vlgmr.msrb.gmra.mxu0 %v10734_v8  ;;  %1035 = vmatmul.bf16.vlgmr.msrb.gmra.mxu1 %v10734_v8  ;;  %v6902_v39 = vld [vmem:[#allocation3 + $0x100] sm:$0xf]  ;;  %v7703_v42 = vor.u32 %v9864_v35, %v7702_v34 }
  0x68   :  { %3033 = vmatpush.bf16.msra.mxu0 %v6999_v12  ;;  %3047 = vmatpush.bf16.msra.mxu1 %v7255_v13  ;;  %v9664_v40 = vld [vmem:[#allocation3 + $0x11c] sm:$0xf0] }
  0x69   :  { %3061 = vmatpush.bf16.msra.mxu2 %v7511_v14  ;;  %1063 = vmatmul.bf16.vlgmr.msrb.gmra.mxu3 %v10734_v8  ;;  %v7158_v41 = vld [vmem:[#allocation3 + $0x300] sm:$0xf]  ;;  %v6903_v48 = vor.u32 %v9664_v40, %v6902_v39  ;;  %v164_v40 = vld [vmem:[%s11238_s0 + $0x38] sm:$0xff] }
  0x6a   :  { %3075 = vmatpush.bf16.msra.mxu3 %v7767_v18  ;;  %1049 = vmatmul.bf16.vlgmr.msrb.gmra.mxu2 %v10734_v8  ;;  %v9728_v43 = vld [vmem:[#allocation3 + $0x31c] sm:$0xf0] }
  0x6b   :  { %v7414_v44 = vld [vmem:[#allocation3 + $0x500] sm:$0xf]  ;;  %v7159_v49 = vor.u32 %v9728_v43, %v7158_v41  ;;  %v159_v41 = vld [vmem:[%s11238_s0 + $0x10] sm:$0xff] }
  0x6c   :  { %3034 = vmatpush.bf16.msra.mxu0 %v6967_v24  ;;  %3048 = vmatpush.bf16.msra.mxu1 %v7223_v25  ;;  %v9792_v45 = vld [vmem:[#allocation3 + $0x51c] sm:$0xf0] }
  0x6d   :  { %3062 = vmatpush.bf16.msra.mxu2 %v7479_v26  ;;  %v7670_v46 = vld [vmem:[#allocation3 + $0x700] sm:$0xf]  ;;  %v7415_v8 = vor.u32 %v9792_v45, %v7414_v44 }
  0x6e   :  { %3076 = vmatpush.bf16.msra.mxu3 %v7735_v30  ;;  %v9856_v47 = vld [vmem:[#allocation3 + $0x71c] sm:$0xf0] }
  0x6f   :  { %v6870_v50 = vld [vmem:[#allocation3 + $0xc0] sm:$0xf]  ;;  %v7671_v53 = vor.u32 %v9856_v47, %v7670_v46  ;;  %v9748_v47 = vld [vmem:[#allocation3 + $0x3c4] sm:$0xf] }
  0x70   :  { %3035 = vmatpush.bf16.msra.mxu0 %v6935_v36  ;;  %3049 = vmatpush.bf16.msra.mxu1 %v7191_v37  ;;  %v9656_v51 = vld [vmem:[#allocation3 + $0xdc] sm:$0xf0]  ;;  %v9684_v36 = vld [vmem:[#allocation3 + $0x1c4] sm:$0xf] }
  0x71   :  { %3063 = vmatpush.bf16.msra.mxu2 %v7447_v38  ;;  %v7126_v52 = vld [vmem:[#allocation3 + $0x2c0] sm:$0xf]  ;;  %v6871_v59 = vor.u32 %v9656_v51, %v6870_v50  ;;  %v7000_v37 = vld [vmem:[#allocation3 + $0x1e0] sm:$0xf0]  ;;  %v158_v50 = vld [vmem:[%s11238_s0 + $0x8] sm:$0xff] }
  0x72   :  { %3077 = vmatpush.bf16.msra.mxu3 %v7703_v42  ;;  %v9720_v54 = vld [vmem:[#allocation3 + $0x2dc] sm:$0xf0]  ;;  %v166_v42 = vld [vmem:[%s11238_s0 + $0x48] sm:$0xff] }
  0x73   :  { %v7382_v55 = vld [vmem:[#allocation3 + $0x4c0] sm:$0xf]  ;;  %v7127_v60 = vor.u32 %v9720_v54, %v7126_v52  ;;  %v160_v54 = vld [vmem:[%s11238_s0 + $0x18] sm:$0xff] }
  0x74   :  { %v9784_v56 = vld [vmem:[#allocation3 + $0x4dc] sm:$0xf0]  ;;  %3036 = vmatpush.bf16.msra.mxu0 %v6903_v48  ;;  %3050 = vmatpush.bf16.msra.mxu1 %v7159_v49 }
  0x75   :  { %v7638_v57 = vld [vmem:[#allocation3 + $0x6c0] sm:$0xf]  ;;  %3064 = vmatpush.bf16.msra.mxu2 %v7415_v8  ;;  %v7383_v61 = vor.u32 %v9784_v56, %v7382_v55  ;;  %v7256_v8 = vld [vmem:[#allocation3 + $0x3e0] sm:$0xf0]  ;;  %v167_v55 = vld [vmem:[%s11238_s0 + $0x50] sm:$0xff] }
  0x76   :  { %v9848_v58 = vld [vmem:[#allocation3 + $0x6dc] sm:$0xf0]  ;;  %3078 = vmatpush.bf16.msra.mxu3 %v7671_v53  ;;  %v7003_v53 = vor.u32 %v9684_v36, %v7000_v37 }
  0x77   :  { %v6838_v62 = vld [vmem:[#allocation3 + $0x80] sm:$0xf]  ;;  %v7639_v1 = vor.u32 %v9848_v58, %v7638_v57  ;;  %v10770_v58 = vpack.c.bf16 %v166_v42, %v159_v41  ;;  %v170_v41 = vld [vmem:[%s11238_s0 + $0x68] sm:$0xff] }
  0x78   :  { %v9648_v63 = vld [vmem:[#allocation3 + $0x9c] sm:$0xf0]  ;;  %3037 = vmatpush.bf16.msra.mxu0 %v6871_v59  ;;  %3051 = vmatpush.bf16.msra.mxu1 %v7127_v60 }
  0x79   :  { %v7094_v0 = vld [vmem:[#allocation3 + $0x280] sm:$0xf]  ;;  %v6839_v7 = vor.u32 %v9648_v63, %v6838_v62  ;;  %3065 = vmatpush.bf16.msra.mxu2 %v7383_v61 }
  0x7a   :  { %v9712_v2 = vld [vmem:[#allocation3 + $0x29c] sm:$0xf0]  ;;  %3079 = vmatpush.bf16.msra.mxu3 %v7639_v1  ;;  %v6968_v1 = vld [vmem:[#allocation3 + $0x1a0] sm:$0xf0] }
  0x7b   :  { %v7350_v3 = vld [vmem:[#allocation3 + $0x480] sm:$0xf]  ;;  %v7095_v10 = vor.u32 %v9712_v2, %v7094_v0  ;;  %v9676_v0 = vld [vmem:[#allocation3 + $0x184] sm:$0xf]  ;;  %v7259_v2 = vor.u32 %v9748_v47, %v7256_v8 }
  0x7c   :  { %v9776_v4 = vld [vmem:[#allocation3 + $0x49c] sm:$0xf0]  ;;  %3038 = vmatpush.bf16.msra.mxu0 %v6839_v7  ;;  %v7224_v7 = vld [vmem:[#allocation3 + $0x3a0] sm:$0xf0] }
  0x7d   :  { %v7606_v5 = vld [vmem:[#allocation3 + $0x680] sm:$0xf]  ;;  %v7351_v11 = vor.u32 %v9776_v4, %v7350_v3  ;;  %3052 = vmatpush.bf16.msra.mxu1 %v7095_v10  ;;  %v10774_v3 = vpack.c.bf16 %v167_v55, %v160_v54  ;;  %v6971_v10 = vor.u32 %v9676_v0, %v6968_v1 }
  0x7e   :  { %v9840_v6 = vld [vmem:[#allocation3 + $0x69c] sm:$0xf0] }
  0x7f   :  { %v6806_v9 = vld [vmem:[#allocation3 + $0x40] sm:$0xf]  ;;  %v7607_v15 = vor.u32 %v9840_v6, %v7606_v5  ;;  %3066 = vmatpush.bf16.msra.mxu2 %v7351_v11  ;;  %v9740_v6 = vld [vmem:[#allocation3 + $0x384] sm:$0xf] }
  0x80   :  { %v9640_v12 = vld [vmem:[#allocation3 + $0x5c] sm:$0xf0] }
  0x81   :  { %v7062_v13 = vld [vmem:[#allocation3 + $0x240] sm:$0xf]  ;;  %v6807_v22 = vor.u32 %v9640_v12, %v6806_v9  ;;  %3080 = vmatpush.bf16.msra.mxu3 %v7607_v15  ;;  %v6936_v15 = vld [vmem:[#allocation3 + $0x160] sm:$0xf0] }
  0x82   :  { %v9704_v14 = vld [vmem:[#allocation3 + $0x25c] sm:$0xf0] }
  0x83   :  { %v7318_v16 = vld [vmem:[#allocation3 + $0x440] sm:$0xf]  ;;  %v7063_v27 = vor.u32 %v9704_v14, %v7062_v13  ;;  %3039 = vmatpush.bf16.msra.mxu0 %v6807_v22  ;;  %v9668_v14 = vld [vmem:[#allocation3 + $0x144] sm:$0xf] }
  0x84   :  { %v9768_v17 = vld [vmem:[#allocation3 + $0x45c] sm:$0xf0]  ;;  %v6939_v22 = vor.u32 %v9668_v14, %v6936_v15 }
  0x85   :  { %v7574_v18 = vld [vmem:[#allocation3 + $0x640] sm:$0xf]  ;;  %v7319_v28 = vor.u32 %v9768_v17, %v7318_v16  ;;  %3053 = vmatpush.bf16.msra.mxu1 %v7063_v27  ;;  %v7227_v16 = vor.u32 %v9740_v6, %v7224_v7  ;;  %v6904_v27 = vld [vmem:[#allocation3 + $0x120] sm:$0xf0] }
  0x86   :  { %v9832_v19 = vld [vmem:[#allocation3 + $0x65c] sm:$0xf0]  ;;  %v9700_v6 = vld [vmem:[#allocation3 + $0x244] sm:$0xf] }
  0x87   :  { %v6774_v20 = vld [vmem:[#allocation3] sm:$0xf]  ;;  %v7575_v32 = vor.u32 %v9832_v19, %v7574_v18  ;;  %3067 = vmatpush.bf16.msra.mxu2 %v7319_v28  ;;  %v9732_v19 = vld [vmem:[#allocation3 + $0x344] sm:$0xf] }
  0x88   :  { %v9632_v21 = vld [vmem:[#allocation3 + $0x1c] sm:$0xf0] }
  0x89   :  { %v7030_v23 = vld [vmem:[#allocation3 + $0x200] sm:$0xf]  ;;  %v6775_v39 = vor.u32 %v9632_v21, %v6774_v20  ;;  %3081 = vmatpush.bf16.msra.mxu3 %v7575_v32  ;;  %v7192_v20 = vld [vmem:[#allocation3 + $0x360] sm:$0xf0] }
  0x8a   :  { %v9696_v24 = vld [vmem:[#allocation3 + $0x21c] sm:$0xf0]  ;;  %v7195_v28 = vor.u32 %v9732_v19, %v7192_v20  ;;  %v7160_v32 = vld [vmem:[#allocation3 + $0x320] sm:$0xf0] }
  0x8b   :  { %v7286_v25 = vld [vmem:[#allocation3 + $0x400] sm:$0xf]  ;;  %v7031_v43 = vor.u32 %v9696_v24, %v7030_v23  ;;  %3040 = vmatpush.bf16.msra.mxu0 %v6775_v39  ;;  %v6872_v39 = vld [vmem:[#allocation3 + $0xe0] sm:$0xf0] }
  0x8c   :  { %v9760_v26 = vld [vmem:[#allocation3 + $0x41c] sm:$0xf0]  ;;  %v9812_v19 = vld [vmem:[#allocation3 + $0x5c4] sm:$0xf] }
  0x8d   :  { %v7542_v29 = vld [vmem:[#allocation3 + $0x600] sm:$0xf]  ;;  %v7287_v44 = vor.u32 %v9760_v26, %v7286_v25  ;;  %3054 = vmatpush.bf16.msra.mxu1 %v7031_v43  ;;  %v9660_v26 = vld [vmem:[#allocation3 + $0x104] sm:$0xf] }
  0x8e   :  { %v9824_v30 = vld [vmem:[#allocation3 + $0x61c] sm:$0xf0]  ;;  %v7512_v20 = vld [vmem:[#allocation3 + $0x5e0] sm:$0xf0] }
  0x8f   :  { %v8022_v31 = vld [vmem:[#allocation3 + $0x9c0] sm:$0xf]  ;;  %v7543_v48 = vor.u32 %v9824_v30, %v7542_v29  ;;  %3068 = vmatpush.bf16.msra.mxu2 %v7287_v44  ;;  %v9724_v29 = vld [vmem:[#allocation3 + $0x304] sm:$0xf] }
  0x90   :  { %v9944_v33 = vld [vmem:[#allocation3 + $0x9dc] sm:$0xf0]  ;;  %v7163_v42 = vor.u32 %v9724_v29, %v7160_v32  ;;  %v10004_v32 = vld [vmem:[#allocation3 + $0xbc4] sm:$0xf] }
  0x91   :  { %v8278_v34 = vld [vmem:[#allocation3 + $0xbc0] sm:$0xf]  ;;  %v8023_v49 = vor.u32 %v9944_v33, %v8022_v31  ;;  %3082 = vmatpush.bf16.msra.mxu3 %v7543_v48 }
  0x92   :  { %v10008_v35 = vld [vmem:[#allocation3 + $0xbdc] sm:$0xf0]  ;;  %3069 = vmatmul.bf16.vlgmr.msra.gmra.mxu2 %v10770_v58 }
  0x93   :  { %v157_v38 = vld [vmem:[%s11238_s0] sm:$0xff]  ;;  %v8279_v52 = vor.u32 %v10008_v35, %v8278_v34  ;;  %3089 = vmatpush.bf16.msrb.mxu0 %v8023_v49  ;;  %v6907_v35 = vor.u32 %v9660_v26, %v6904_v27  ;;  %v168_v27 = vld [vmem:[%s11238_s0 + $0x58] sm:$0xff] }
  0x94   :  { %v8310_v45 = vld [vmem:[#allocation3 + $0xc00] sm:$0xf]  ;;  %v10768_v57 = vpack.c.bf16 %v164_v40, %v157_v38  ;;  %3083 = vmatmul.bf16.vlgmr.msra.gmra.mxu3 %v10774_v3  ;;  %v9652_v38 = vld [vmem:[#allocation3 + $0xc4] sm:$0xf]  ;;  %v163_v40 = vld [vmem:[%s11238_s0 + $0x30] sm:$0xff] }
  0x95   :  { %v10016_v46 = vld [vmem:[#allocation3 + $0xc1c] sm:$0xf0]  ;;  %3103 = vmatpush.bf16.msrb.mxu1 %v8279_v52  ;;  %3131 = vmatpush.bf16.msrb.mxu3 %v7003_v53  ;;  %v6875_v48 = vor.u32 %v9652_v38, %v6872_v39  ;;  %v10786_v49 = vpack.c.bf16 %v170_v41, %v163_v40  ;;  %v9644_v52 = vld [vmem:[#allocation3 + $0x84] sm:$0xf] }
  0x96   :  { %v165_v51 = vld [vmem:[%s11238_s0 + $0x40] sm:$0xff]  ;;  %v8311_v62 = vor.u32 %v10016_v46, %v8310_v45  ;;  %3041 = vmatmul.bf16.vlgmr.msra.gmra.mxu0 %v10768_v57 }
  0x97   :  { %v7990_v56 = vld [vmem:[#allocation3 + $0x980] sm:$0xf]  ;;  %v10772_v63 = vpack.c.bf16 %v165_v51, %v158_v50  ;;  %v9716_v45 = vld [vmem:[#allocation3 + $0x2c4] sm:$0xf]  ;;  %11251 = vst [vmem:[#allocation21_spill] sm:$0xff] %v10786_v49 }
  0x98   :  { %v9936_v59 = vld [vmem:[#allocation3 + $0x99c] sm:$0xf0]  ;;  %3124 = vmatpush.bf16.msrb.mxu2 %v8311_v62  ;;  %v7128_v46 = vld [vmem:[#allocation3 + $0x2e0] sm:$0xf0] }
  0x99   :  { %v8246_v60 = vld [vmem:[#allocation3 + $0xb80] sm:$0xf]  ;;  %v7991_v4 = vor.u32 %v9936_v59, %v7990_v56  ;;  %3055 = vmatmul.bf16.vlgmr.msra.gmra.mxu1 %v10772_v63  ;;  %3132 = vmatpush.bf16.msrb.mxu3 %v6971_v10  ;;  %v6840_v53 = vld [vmem:[#allocation3 + $0xa0] sm:$0xf0]  ;;  %v7131_v54 = vor.u32 %v9716_v45, %v7128_v46 }
  0x9a   :  { %v10000_v61 = vld [vmem:[#allocation3 + $0xb9c] sm:$0xf0]  ;;  %v9708_v59 = vld [vmem:[#allocation3 + $0x284] sm:$0xf]  ;;  %v6843_v62 = vor.u32 %v9644_v52, %v6840_v53 }
  0x9b   :  { %v8247_v5 = vor.u32 %v10000_v61, %v8246_v60  ;;  %v7958_v9 = vld [vmem:[#allocation3 + $0x940] sm:$0xf]  ;;  %3090 = vmatpush.bf16.msrb.mxu0 %v7991_v4  ;;  %v7096_v60 = vld [vmem:[#allocation3 + $0x2a0] sm:$0xf0] }
  0x9c   :  { %v9928_v11 = vld [vmem:[#allocation3 + $0x95c] sm:$0xf0]  ;;  %3145 = vmatpush.bf16.msra.mxu2 %v7259_v2  ;;  %v9636_v4 = vld [vmem:[#allocation3 + $0x44] sm:$0xf]  ;;  %v7099_v7 = vor.u32 %v9708_v59, %v7096_v60 }
  0x9d   :  { %v8214_v12 = vld [vmem:[#allocation3 + $0xb40] sm:$0xf]  ;;  %3104 = vmatpush.bf16.msrb.mxu1 %v8247_v5  ;;  %v7959_v17 = vor.u32 %v9928_v11, %v7958_v9  ;;  %3133 = vmatpush.bf16.msrb.mxu3 %v6939_v22  ;;  %v6808_v5 = vld [vmem:[#allocation3 + $0x60] sm:$0xf0] }
  0x9e   :  { %v9992_v13 = vld [vmem:[#allocation3 + $0xb5c] sm:$0xf0]  ;;  %v7064_v9 = vld [vmem:[#allocation3 + $0x260] sm:$0xf0] }
  0x9f   :  { %v8215_v18 = vor.u32 %v9992_v13, %v8214_v12  ;;  %v7926_v21 = vld [vmem:[#allocation3 + $0x900] sm:$0xf]  ;;  %3091 = vmatpush.bf16.msrb.mxu0 %v7959_v17  ;;  %v6811_v17 = vor.u32 %v9636_v4, %v6808_v5  ;;  %v7768_v22 = vld [vmem:[#allocation3 + $0x7e0] sm:$0xf0] }
  0xa0   :  { %v9920_v23 = vld [vmem:[#allocation3 + $0x91c] sm:$0xf0]  ;;  %3146 = vmatpush.bf16.msra.mxu2 %v7227_v16  ;;  %v9628_v16 = vld [vmem:[#allocation3 + $0x4] sm:$0xf] }
  0xa1   :  { %v8182_v24 = vld [vmem:[#allocation3 + $0xb00] sm:$0xf]  ;;  %3105 = vmatpush.bf16.msrb.mxu1 %v8215_v18  ;;  %v7927_v30 = vor.u32 %v9920_v23, %v7926_v21  ;;  %3134 = vmatpush.bf16.msrb.mxu3 %v6907_v35  ;;  %v6776_v18 = vld [vmem:[#allocation3 + $0x20] sm:$0xf0] }
  0xa2   :  { %v9984_v25 = vld [vmem:[#allocation3 + $0xb1c] sm:$0xf0]  ;;  %8340 = vmatmul.msk.bf16.vlgmr.msrb.gmra.mxu2 %vm3029_vm0, %v10786_v49  ;;  %v9876_v21 = vld [vmem:[#allocation3 + $0x7c4] sm:$0xf] }
  0xa3   :  { %v8183_v31 = vor.u32 %v9984_v25, %v8182_v24  ;;  %v7894_v33 = vld [vmem:[#allocation3 + $0x8c0] sm:$0xf]  ;;  %3092 = vmatpush.bf16.msrb.mxu0 %v7927_v30  ;;  %v9940_v23 = vld [vmem:[#allocation3 + $0x9c4] sm:$0xf]  ;;  %v7067_v24 = vor.u32 %v9700_v6, %v7064_v9  ;;  %v7771_v38 = vor.u32 %v9876_v21, %v7768_v22 }
  0xa4   :  { %v9912_v34 = vld [vmem:[#allocation3 + $0x8dc] sm:$0xf0]  ;;  %3147 = vmatpush.bf16.msra.mxu2 %v7195_v28  ;;  %v8024_v25 = vld [vmem:[#allocation3 + $0x9e0] sm:$0xf0] }
  0xa5   :  { %v8150_v36 = vld [vmem:[#allocation3 + $0xac0] sm:$0xf]  ;;  %3106 = vmatpush.bf16.msrb.mxu1 %v8183_v31  ;;  %v7895_v43 = vor.u32 %v9912_v34, %v7894_v33  ;;  %3135 = vmatpush.bf16.msrb.mxu3 %v6875_v48  ;;  %v9692_v30 = vld [vmem:[#allocation3 + $0x204] sm:$0xf]  ;;  %v6779_v33 = vor.u32 %v9628_v16, %v6776_v18  ;;  %v7515_v34 = vor.u32 %v9812_v19, %v7512_v20 }
  0xa6   :  { %v9976_v37 = vld [vmem:[#allocation3 + $0xadc] sm:$0xf0]  ;;  %v7032_v31 = vld [vmem:[#allocation3 + $0x220] sm:$0xf0]  ;;  %v8027_v39 = vor.u32 %v9940_v23, %v8024_v25 }
  0xa7   :  { %v8151_v44 = vor.u32 %v9976_v37, %v8150_v36  ;;  %v7862_v47 = vld [vmem:[#allocation3 + $0x880] sm:$0xf]  ;;  %3093 = vmatpush.bf16.msrb.mxu0 %v7895_v43  ;;  %v8280_v35 = vld [vmem:[#allocation3 + $0xbe0] sm:$0xf0]  ;;  %v162_v36 = vld [vmem:[%s11238_s0 + $0x28] sm:$0xff] }
  0xa8   :  { %v9904_v8 = vld [vmem:[#allocation3 + $0x89c] sm:$0xf0]  ;;  %3148 = vmatpush.bf16.msra.mxu2 %v7163_v42  ;;  %v9804_v40 = vld [vmem:[#allocation3 + $0x584] sm:$0xf]  ;;  %v8283_v48 = vor.u32 %v10004_v32, %v8280_v35 }
  0xa9   :  { %v8118_v50 = vld [vmem:[#allocation3 + $0xa80] sm:$0xf]  ;;  %3107 = vmatpush.bf16.msrb.mxu1 %v8151_v44  ;;  %v7863_v55 = vor.u32 %v9904_v8, %v7862_v47  ;;  %3136 = vmatpush.bf16.msrb.mxu3 %v6843_v62  ;;  %v7480_v41 = vld [vmem:[#allocation3 + $0x5a0] sm:$0xf0]  ;;  %v7035_v44 = vor.u32 %v9692_v30, %v7032_v31 }
  0xaa   :  { %v9968_v51 = vld [vmem:[#allocation3 + $0xa9c] sm:$0xf0]  ;;  %v9868_v42 = vld [vmem:[#allocation3 + $0x784] sm:$0xf] }
  0xab   :  { %v8119_v56 = vor.u32 %v9968_v51, %v8118_v50  ;;  %v7830_v61 = vld [vmem:[#allocation3 + $0x840] sm:$0xf]  ;;  %3094 = vmatpush.bf16.msrb.mxu0 %v7863_v55  ;;  %v7736_v45 = vld [vmem:[#allocation3 + $0x7a0] sm:$0xf0]  ;;  %v7483_v50 = vor.u32 %v9804_v40, %v7480_v41 }
  0xac   :  { %v9896_v0 = vld [vmem:[#allocation3 + $0x85c] sm:$0xf0]  ;;  %3149 = vmatpush.bf16.msra.mxu2 %v7131_v54  ;;  %v9932_v46 = vld [vmem:[#allocation3 + $0x984] sm:$0xf]  ;;  %v7739_v53 = vor.u32 %v9868_v42, %v7736_v45 }
  0xad   :  { %v8086_v1 = vld [vmem:[#allocation3 + $0xa40] sm:$0xf]  ;;  %3108 = vmatpush.bf16.msrb.mxu1 %v8119_v56  ;;  %v7831_v12 = vor.u32 %v9896_v0, %v7830_v61  ;;  %3137 = vmatpush.bf16.msrb.mxu3 %v6811_v17  ;;  %v7992_v47 = vld [vmem:[#allocation3 + $0x9a0] sm:$0xf0] }
  0xae   :  { %v9960_v2 = vld [vmem:[#allocation3 + $0xa5c] sm:$0xf0]  ;;  %v9996_v51 = vld [vmem:[#allocation3 + $0xb84] sm:$0xf]  ;;  %v7995_v54 = vor.u32 %v9932_v46, %v7992_v47 }
  0xaf   :  { %v7798_v10 = vld [vmem:[#allocation3 + $0x800] sm:$0xf]  ;;  %v8087_v13 = vor.u32 %v9960_v2, %v8086_v1  ;;  %3095 = vmatpush.bf16.msrb.mxu0 %v7831_v12  ;;  %v8248_v52 = vld [vmem:[#allocation3 + $0xba0] sm:$0xf0] }
  0xb0   :  { %v9888_v11 = vld [vmem:[#allocation3 + $0x81c] sm:$0xf0]  ;;  %3150 = vmatpush.bf16.msra.mxu2 %v7099_v7  ;;  %v9796_v55 = vld [vmem:[#allocation3 + $0x544] sm:$0xf]  ;;  %v8251_v0 = vor.u32 %v9996_v51, %v8248_v52 }
  0xb1   :  { %v8054_v14 = vld [vmem:[#allocation3 + $0xa00] sm:$0xf]  ;;  %3109 = vmatpush.bf16.msrb.mxu1 %v8087_v13  ;;  %v7799_v28 = vor.u32 %v9888_v11, %v7798_v10  ;;  %3138 = vmatpush.bf16.msrb.mxu3 %v6779_v33  ;;  %v7448_v56 = vld [vmem:[#allocation3 + $0x560] sm:$0xf0] }
  0xb2   :  { %v9952_v15 = vld [vmem:[#allocation3 + $0xa1c] sm:$0xf0]  ;;  %v9860_v59 = vld [vmem:[#allocation3 + $0x744] sm:$0xf]  ;;  %v7451_v1 = vor.u32 %v9796_v55, %v7448_v56 }
  0xb3   :  { %v161_v26 = vld [vmem:[%s11238_s0 + $0x20] sm:$0xff]  ;;  %v8055_v29 = vor.u32 %v9952_v15, %v8054_v14  ;;  %3096 = vmatpush.bf16.msrb.mxu0 %v7799_v28 }
  0xb4   :  { %v169_v37 = vld [vmem:[%s11238_s0 + $0x60] sm:$0xff]  ;;  %3151 = vmatpush.bf16.msra.mxu2 %v7067_v24  ;;  %v10802_v43 = vpack.c.bf16 %v168_v27, %v161_v26  ;;  %3139 = vmatmul.bf16.vlgmr.msrb.gmra.mxu3 %v10768_v57 }
  0xb5   :  { %3110 = vmatpush.bf16.msrb.mxu1 %v8055_v29  ;;  %v10804_v8 = vpack.c.bf16 %v169_v37, %v162_v36  ;;  %3187 = vmatpush.bf16.msra.mxu3 %v8027_v39  ;;  %v7704_v60 = vld [vmem:[#allocation3 + $0x760] sm:$0xf0] }
  0xb6   :  { %3097 = vmatmul.bf16.vlgmr.msrb.gmra.mxu0 %v10802_v43  ;;  %v9924_v61 = vld [vmem:[#allocation3 + $0x944] sm:$0xf]  ;;  %v7707_v5 = vor.u32 %v9860_v59, %v7704_v60 }
  0xb7   :  { %3159 = vmatpush.bf16.msra.mxu0 %v7515_v34  ;;  %v7960_v62 = vld [vmem:[#allocation3 + $0x960] sm:$0xf0] }
  0xb8   :  { %3152 = vmatpush.bf16.msra.mxu2 %v7035_v44  ;;  %3111 = vmatmul.bf16.vlgmr.msrb.gmra.mxu1 %v10804_v8  ;;  %v9988_v2 = vld [vmem:[#allocation3 + $0xb44] sm:$0xf]  ;;  %v7963_v6 = vor.u32 %v9924_v61, %v7960_v62 }
  0xb9   :  { %3173 = vmatpush.bf16.msra.mxu1 %v7771_v38  ;;  %v8216_v4 = vld [vmem:[#allocation3 + $0xb60] sm:$0xf0]  ;;  %3188 = vmatpush.bf16.msra.mxu3 %v7995_v54 }
  0xba   :  { %v9788_v7 = vld [vmem:[#allocation3 + $0x504] sm:$0xf]  ;;  %v8219_v14 = vor.u32 %v9988_v2, %v8216_v4  ;;  %v7006_v4 = vld [vmem:[#allocation3 + $0x1c8] sm:$0xf] }
  0xbb   :  { %3160 = vmatpush.bf16.msra.mxu0 %v7483_v50  ;;  %v7416_v9 = vld [vmem:[#allocation3 + $0x520] sm:$0xf0]  ;;  %3153 = vmatmul.bf16.vlgmr.msra.gmra.mxu2 %v10772_v63 }
  0xbc   :  { %3201 = vmatpush.bf16.msrb.mxu2 %v8283_v48  ;;  %v9852_v10 = vld [vmem:[#allocation3 + $0x704] sm:$0xf]  ;;  %v7419_v15 = vor.u32 %v9788_v7, %v7416_v9  ;;  %v7518_v7 = vld [vmem:[#allocation3 + $0x5c8] sm:$0xf] }
  0xbd   :  { %3174 = vmatpush.bf16.msra.mxu1 %v7739_v53  ;;  %v7672_v11 = vld [vmem:[#allocation3 + $0x720] sm:$0xf0]  ;;  %3189 = vmatpush.bf16.msra.mxu3 %v7963_v6  ;;  %v9689_v6 = vld [vmem:[#allocation3 + $0x1e4] sm:$0xf0] }
  0xbe   :  { %v9916_v12 = vld [vmem:[#allocation3 + $0x904] sm:$0xf]  ;;  %v7675_v18 = vor.u32 %v9852_v10, %v7672_v11  ;;  %v9817_v9 = vld [vmem:[#allocation3 + $0x5e4] sm:$0xf0] }
  0xbf   :  { %v7928_v13 = vld [vmem:[#allocation3 + $0x920] sm:$0xf0]  ;;  %3161 = vmatpush.bf16.msra.mxu0 %v7451_v1 }
  0xc0   :  { %3202 = vmatpush.bf16.msrb.mxu2 %v8251_v0  ;;  %v9980_v16 = vld [vmem:[#allocation3 + $0xb04] sm:$0xf]  ;;  %v7931_v19 = vor.u32 %v9916_v12, %v7928_v13 }
  0xc1   :  { %v8184_v17 = vld [vmem:[#allocation3 + $0xb20] sm:$0xf0]  ;;  %3175 = vmatpush.bf16.msra.mxu1 %v7707_v5 }
  0xc2   :  { %v9780_v20 = vld [vmem:[#allocation3 + $0x4c4] sm:$0xf]  ;;  %v8187_v26 = vor.u32 %v9980_v16, %v8184_v17  ;;  %3190 = vmatpush.bf16.msra.mxu3 %v7931_v19  ;;  %v9881_v16 = vld [vmem:[#allocation3 + $0x7e4] sm:$0xf0]  ;;  %v7007_v17 = vor.u32 %v9689_v6, %v7006_v4 }
  0xc3   :  { %v7384_v21 = vld [vmem:[#allocation3 + $0x4e0] sm:$0xf0]  ;;  %3162 = vmatpush.bf16.msra.mxu0 %v7419_v15  ;;  %v7774_v15 = vld [vmem:[#allocation3 + $0x7c8] sm:$0xf] }
  0xc4   :  { %v9844_v22 = vld [vmem:[#allocation3 + $0x6c4] sm:$0xf]  ;;  %3203 = vmatpush.bf16.msrb.mxu2 %v8219_v14  ;;  %v7387_v27 = vor.u32 %v9780_v20, %v7384_v21  ;;  %v7262_v21 = vld [vmem:[#allocation3 + $0x3c8] sm:$0xf] }
  0xc5   :  { %v7640_v23 = vld [vmem:[#allocation3 + $0x6e0] sm:$0xf0]  ;;  %3176 = vmatpush.bf16.msra.mxu1 %v7675_v18  ;;  %v7519_v18 = vor.u32 %v9817_v9, %v7518_v7  ;;  %v9657_v4 = vld [vmem:[#allocation3 + $0xe4] sm:$0xf0] }
  0xc6   :  { %v9908_v24 = vld [vmem:[#allocation3 + $0x8c4] sm:$0xf]  ;;  %v7643_v30 = vor.u32 %v9844_v22, %v7640_v23  ;;  %v9753_v23 = vld [vmem:[#allocation3 + $0x3e4] sm:$0xf0] }
  0xc7   :  { %v7896_v25 = vld [vmem:[#allocation3 + $0x8e0] sm:$0xf0]  ;;  %3163 = vmatpush.bf16.msra.mxu0 %v7387_v27  ;;  %v7486_v27 = vld [vmem:[#allocation3 + $0x588] sm:$0xf] }
  0xc8   :  { %v9972_v28 = vld [vmem:[#allocation3 + $0xac4] sm:$0xf]  ;;  %v7899_v31 = vor.u32 %v9908_v24, %v7896_v25  ;;  %3204 = vmatpush.bf16.msrb.mxu2 %v8187_v26  ;;  %v6974_v24 = vld [vmem:[#allocation3 + $0x188] sm:$0xf]  ;;  %v7775_v26 = vor.u32 %v9881_v16, %v7774_v15 }
  0xc9   :  { %v8152_v29 = vld [vmem:[#allocation3 + $0xae0] sm:$0xf0]  ;;  %3177 = vmatpush.bf16.msra.mxu1 %v7643_v30  ;;  %v9681_v25 = vld [vmem:[#allocation3 + $0x1a4] sm:$0xf0] }
  0xca   :  { %v9772_v32 = vld [vmem:[#allocation3 + $0x484] sm:$0xf]  ;;  %v8155_v38 = vor.u32 %v9972_v28, %v8152_v29  ;;  %3191 = vmatpush.bf16.msra.mxu3 %v7899_v31  ;;  %v9809_v28 = vld [vmem:[#allocation3 + $0x5a4] sm:$0xf0] }
  0xcb   :  { %v7352_v33 = vld [vmem:[#allocation3 + $0x4a0] sm:$0xf0]  ;;  %v7742_v30 = vld [vmem:[#allocation3 + $0x788] sm:$0xf] }
  0xcc   :  { %v9836_v34 = vld [vmem:[#allocation3 + $0x684] sm:$0xf]  ;;  %v7355_v39 = vor.u32 %v9772_v32, %v7352_v33  ;;  %3205 = vmatpush.bf16.msrb.mxu2 %v8155_v38  ;;  %v9873_v31 = vld [vmem:[#allocation3 + $0x7a4] sm:$0xf0]  ;;  %v7263_v32 = vor.u32 %v9753_v23, %v7262_v21  ;;  %v6975_v33 = vor.u32 %v9681_v25, %v6974_v24 }
  0xcd   :  { %v7608_v35 = vld [vmem:[#allocation3 + $0x6a0] sm:$0xf0]  ;;  %v9673_v38 = vld [vmem:[#allocation3 + $0x164] sm:$0xf0] }
  0xce   :  { %v9900_v36 = vld [vmem:[#allocation3 + $0x884] sm:$0xf]  ;;  %v7611_v42 = vor.u32 %v9836_v34, %v7608_v35  ;;  %3164 = vmatpush.bf16.msra.mxu0 %v7355_v39  ;;  %v7230_v34 = vld [vmem:[#allocation3 + $0x388] sm:$0xf]  ;;  %v7487_v35 = vor.u32 %v9809_v28, %v7486_v27  ;;  %v7743_v39 = vor.u32 %v9873_v31, %v7742_v30 }
  0xcf   :  { %v7864_v37 = vld [vmem:[#allocation3 + $0x8a0] sm:$0xf0]  ;;  %v7390_v6 = vld [vmem:[#allocation3 + $0x4c8] sm:$0xf] }
  0xd0   :  { %v9964_v40 = vld [vmem:[#allocation3 + $0xa84] sm:$0xf]  ;;  %v7867_v44 = vor.u32 %v9900_v36, %v7864_v37  ;;  %3178 = vmatpush.bf16.msra.mxu1 %v7611_v42  ;;  %v9745_v36 = vld [vmem:[#allocation3 + $0x3a4] sm:$0xf0] }
  0xd1   :  { %v8120_v41 = vld [vmem:[#allocation3 + $0xaa0] sm:$0xf0]  ;;  %v6942_v37 = vld [vmem:[#allocation3 + $0x148] sm:$0xf] }
  0xd2   :  { %v9764_v45 = vld [vmem:[#allocation3 + $0x444] sm:$0xf]  ;;  %v8123_v52 = vor.u32 %v9964_v40, %v8120_v41  ;;  %3192 = vmatpush.bf16.msra.mxu3 %v7867_v44  ;;  %v7454_v40 = vld [vmem:[#allocation3 + $0x548] sm:$0xf] }
  0xd3   :  { %v7320_v46 = vld [vmem:[#allocation3 + $0x460] sm:$0xf0]  ;;  %v9801_v41 = vld [vmem:[#allocation3 + $0x564] sm:$0xf0] }
  0xd4   :  { %v9828_v47 = vld [vmem:[#allocation3 + $0x644] sm:$0xf]  ;;  %v7323_v53 = vor.u32 %v9764_v45, %v7320_v46  ;;  %3206 = vmatpush.bf16.msrb.mxu2 %v8123_v52  ;;  %v7710_v42 = vld [vmem:[#allocation3 + $0x748] sm:$0xf]  ;;  %v7231_v45 = vor.u32 %v9745_v36, %v7230_v34  ;;  %v6943_v46 = vor.u32 %v9673_v38, %v6942_v37 }
  0xd5   :  { %v7576_v48 = vld [vmem:[#allocation3 + $0x660] sm:$0xf0]  ;;  %v9865_v44 = vld [vmem:[#allocation3 + $0x764] sm:$0xf0] }
  0xd6   :  { %v9892_v50 = vld [vmem:[#allocation3 + $0x844] sm:$0xf]  ;;  %v7579_v59 = vor.u32 %v9828_v47, %v7576_v48  ;;  %3165 = vmatpush.bf16.msra.mxu0 %v7323_v53  ;;  %v7198_v47 = vld [vmem:[#allocation3 + $0x348] sm:$0xf]  ;;  %v7455_v48 = vor.u32 %v9801_v41, %v7454_v40  ;;  %v7711_v53 = vor.u32 %v9865_v44, %v7710_v42 }
  0xd7   :  { %v7832_v51 = vld [vmem:[#allocation3 + $0x860] sm:$0xf0]  ;;  %v9665_v52 = vld [vmem:[#allocation3 + $0x124] sm:$0xf0] }
  0xd8   :  { %v9956_v54 = vld [vmem:[#allocation3 + $0xa44] sm:$0xf]  ;;  %v7835_v60 = vor.u32 %v9892_v50, %v7832_v51  ;;  %3179 = vmatpush.bf16.msra.mxu1 %v7579_v59  ;;  %v9737_v50 = vld [vmem:[#allocation3 + $0x364] sm:$0xf0] }
  0xd9   :  { %v8088_v55 = vld [vmem:[#allocation3 + $0xa60] sm:$0xf0]  ;;  %v6910_v51 = vld [vmem:[#allocation3 + $0x108] sm:$0xf] }
  0xda   :  { %v9756_v56 = vld [vmem:[#allocation3 + $0x404] sm:$0xf]  ;;  %v8091_v5 = vor.u32 %v9956_v54, %v8088_v55  ;;  %3193 = vmatpush.bf16.msra.mxu3 %v7835_v60  ;;  %v7422_v54 = vld [vmem:[#allocation3 + $0x508] sm:$0xf]  ;;  %v7199_v60 = vor.u32 %v9737_v50, %v7198_v47 }
  0xdb   :  { %v7288_v61 = vld [vmem:[#allocation3 + $0x420] sm:$0xf0]  ;;  %v9793_v55 = vld [vmem:[#allocation3 + $0x524] sm:$0xf0] }
  0xdc   :  { %v9820_v62 = vld [vmem:[#allocation3 + $0x604] sm:$0xf]  ;;  %v7291_v10 = vor.u32 %v9756_v56, %v7288_v61  ;;  %3207 = vmatpush.bf16.msrb.mxu2 %v8091_v5  ;;  %v7678_v56 = vld [vmem:[#allocation3 + $0x708] sm:$0xf]  ;;  %v6911_v61 = vor.u32 %v9665_v52, %v6910_v51 }
  0xdd   :  { %v7544_v0 = vld [vmem:[#allocation3 + $0x620] sm:$0xf0]  ;;  %v9857_v59 = vld [vmem:[#allocation3 + $0x724] sm:$0xf0] }
  0xde   :  { %v9884_v1 = vld [vmem:[#allocation3 + $0x804] sm:$0xf]  ;;  %v7547_v13 = vor.u32 %v9820_v62, %v7544_v0  ;;  %3166 = vmatpush.bf16.msra.mxu0 %v7291_v10  ;;  %v7166_v62 = vld [vmem:[#allocation3 + $0x308] sm:$0xf]  ;;  %v7423_v0 = vor.u32 %v9793_v55, %v7422_v54  ;;  %v7679_v5 = vor.u32 %v9857_v59, %v7678_v56  ;;  %v9685_v55 = vld [vmem:[#allocation3 + $0x1cc] sm:$0xf] }
  0xdf   :  { %v7800_v2 = vld [vmem:[#allocation3 + $0x820] sm:$0xf0]  ;;  %v9785_v7 = vld [vmem:[#allocation3 + $0x4e4] sm:$0xf0]  ;;  %v7008_v56 = vld [vmem:[#allocation3 + $0x1e8] sm:$0xf0] }
  0xe0   :  { %v9948_v11 = vld [vmem:[#allocation3 + $0xa04] sm:$0xf]  ;;  %v7803_v14 = vor.u32 %v9884_v1, %v7800_v2  ;;  %3180 = vmatpush.bf16.msra.mxu1 %v7547_v13  ;;  %v9729_v1 = vld [vmem:[#allocation3 + $0x324] sm:$0xf0] }
  0xe1   :  { %v8056_v12 = vld [vmem:[#allocation3 + $0xa20] sm:$0xf0]  ;;  %3167 = vmatmul.bf16.vlgmr.msra.gmra.mxu0 %v10770_v58  ;;  %v6878_v2 = vld [vmem:[#allocation3 + $0xc8] sm:$0xf] }
  0xe2   :  { %v10012_v19 = vld [vmem:[#allocation3 + $0xc04] sm:$0xf]  ;;  %v8059_v22 = vor.u32 %v9948_v11, %v8056_v12  ;;  %3194 = vmatpush.bf16.msra.mxu3 %v7803_v14  ;;  %3257 = vmatpush.bf16.msrb.mxu0 %v7519_v18  ;;  %v7646_v9 = vld [vmem:[#allocation3 + $0x6c8] sm:$0xf]  ;;  %v7167_v11 = vor.u32 %v9729_v1, %v7166_v62  ;;  %v6879_v12 = vor.u32 %v9657_v4, %v6878_v2 }
  0xe3   :  { %v8312_v20 = vld [vmem:[#allocation3 + $0xc20] sm:$0xf0]  ;;  %3181 = vmatmul.bf16.vlgmr.msra.gmra.mxu1 %v10774_v3  ;;  %v9849_v10 = vld [vmem:[#allocation3 + $0x6e4] sm:$0xf0]  ;;  %v7391_v14 = vor.u32 %v9785_v7, %v7390_v6  ;;  %v7264_v6 = vld [vmem:[#allocation3 + $0x3e8] sm:$0xf0]  ;;  %v7011_v7 = vor.u32 %v9685_v55, %v7008_v56 }
  0xe4   :  { %v8315_v29 = vor.u32 %v10012_v19, %v8312_v20  ;;  %3229 = vmatpush.bf16.msrb.mxu1 %v7007_v17  ;;  %3208 = vmatpush.bf16.msrb.mxu2 %v8059_v22  ;;  %v7134_v13 = vld [vmem:[#allocation3 + $0x2c8] sm:$0xf]  ;;  %v7647_v18 = vor.u32 %v9849_v10, %v7646_v9  ;;  %v9653_v56 = vld [vmem:[#allocation3 + $0xcc] sm:$0xf] }
  0xe5   :  { %3195 = vmatmul.bf16.vlgmr.msra.gmra.mxu3 %v10802_v43  ;;  %v9721_v15 = vld [vmem:[#allocation3 + $0x2e4] sm:$0xf0] }
  0xe6   :  { %3222 = vmatpush.bf16.msrb.mxu3 %v8315_v29  ;;  %3258 = vmatpush.bf16.msrb.mxu0 %v7487_v35  ;;  %v6846_v16 = vld [vmem:[#allocation3 + $0x88] sm:$0xf]  ;;  %v7135_v23 = vor.u32 %v9721_v15, %v7134_v13  ;;  %v9677_v13 = vld [vmem:[#allocation3 + $0x18c] sm:$0xf] }
  0xe7   :  { %3209 = vmatmul.bf16.vlgmr.msrb.gmra.mxu2 %v10804_v8  ;;  %v9649_v17 = vld [vmem:[#allocation3 + $0xa4] sm:$0xf0] }
  0xe8   :  { %3271 = vmatpush.bf16.msra.mxu2 %v7775_v26  ;;  %3230 = vmatpush.bf16.msrb.mxu1 %v6975_v33  ;;  %v7358_v19 = vld [vmem:[#allocation3 + $0x488] sm:$0xf]  ;;  %v6847_v24 = vor.u32 %v9649_v17, %v6846_v16 }
  0xe9   :  { %v9777_v20 = vld [vmem:[#allocation3 + $0x4a4] sm:$0xf0] }
  0xea   :  { %3243 = vmatpush.bf16.msra.mxu3 %v7263_v32  ;;  %3259 = vmatpush.bf16.msrb.mxu0 %v7455_v48  ;;  %v7614_v21 = vld [vmem:[#allocation3 + $0x688] sm:$0xf]  ;;  %v7359_v26 = vor.u32 %v9777_v20, %v7358_v19 }
  0xeb   :  { %v9841_v22 = vld [vmem:[#allocation3 + $0x6a4] sm:$0xf0] }
  0xec   :  { %3272 = vmatpush.bf16.msra.mxu2 %v7743_v39  ;;  %3231 = vmatpush.bf16.msrb.mxu1 %v6943_v46  ;;  %v7102_v25 = vld [vmem:[#allocation3 + $0x288] sm:$0xf]  ;;  %v7615_v30 = vor.u32 %v9841_v22, %v7614_v21  ;;  %v9741_v21 = vld [vmem:[#allocation3 + $0x38c] sm:$0xf] }
  0xed   :  { %v9713_v27 = vld [vmem:[#allocation3 + $0x2a4] sm:$0xf0]  ;;  %v7232_v22 = vld [vmem:[#allocation3 + $0x3a8] sm:$0xf0] }
  0xee   :  { %3244 = vmatpush.bf16.msra.mxu3 %v7231_v45  ;;  %3260 = vmatpush.bf16.msrb.mxu0 %v7423_v0  ;;  %v6814_v28 = vld [vmem:[#allocation3 + $0x48] sm:$0xf]  ;;  %v7103_v35 = vor.u32 %v9713_v27, %v7102_v25  ;;  %v6944_v27 = vld [vmem:[#allocation3 + $0x168] sm:$0xf0] }
  0xef   :  { %v9641_v29 = vld [vmem:[#allocation3 + $0x64] sm:$0xf0] }
  0xf0   :  { %3273 = vmatpush.bf16.msra.mxu2 %v7711_v53  ;;  %3232 = vmatpush.bf16.msrb.mxu1 %v6911_v61  ;;  %v7326_v31 = vld [vmem:[#allocation3 + $0x448] sm:$0xf]  ;;  %v6815_v36 = vor.u32 %v9641_v29, %v6814_v28  ;;  %v7235_v29 = vor.u32 %v9741_v21, %v7232_v22 }
  0xf1   :  { %v9769_v32 = vld [vmem:[#allocation3 + $0x464] sm:$0xf0] }
  0xf2   :  { %3245 = vmatpush.bf16.msra.mxu3 %v7199_v60  ;;  %3261 = vmatpush.bf16.msrb.mxu0 %v7391_v14  ;;  %v7582_v33 = vld [vmem:[#allocation3 + $0x648] sm:$0xf]  ;;  %v7327_v40 = vor.u32 %v9769_v32, %v7326_v31  ;;  %v6976_v14 = vld [vmem:[#allocation3 + $0x1a8] sm:$0xf0] }
  0xf3   :  { %v9833_v34 = vld [vmem:[#allocation3 + $0x664] sm:$0xf0] }
  0xf4   :  { %3274 = vmatpush.bf16.msra.mxu2 %v7679_v5  ;;  %3233 = vmatpush.bf16.msrb.mxu1 %v6879_v12  ;;  %v7070_v37 = vld [vmem:[#allocation3 + $0x248] sm:$0xf]  ;;  %v7583_v45 = vor.u32 %v9833_v34, %v7582_v33  ;;  %v9749_v5 = vld [vmem:[#allocation3 + $0x3cc] sm:$0xf] }
  0xf5   :  { %8341 = vmatmul.msk.bf16.vlgmr.msrb.gmra.mxu3 %vm3029_vm0, %v10786_v49  ;;  %v9705_v38 = vld [vmem:[#allocation3 + $0x264] sm:$0xf0]  ;;  %v7267_v16 = vor.u32 %v9749_v5, %v7264_v6  ;;  %v9733_v33 = vld [vmem:[#allocation3 + $0x34c] sm:$0xf] }
  0xf6   :  { %3246 = vmatpush.bf16.msra.mxu3 %v7167_v11  ;;  %v6782_v39 = vld [vmem:[#allocation3 + $0x8] sm:$0xf]  ;;  %3262 = vmatpush.bf16.msrb.mxu0 %v7359_v26  ;;  %v7071_v53 = vor.u32 %v9705_v38, %v7070_v37  ;;  %v10816_v11 = vpop.f32.mrf.mxu0  ;;  %v9669_v26 = vld [vmem:[#allocation3 + $0x14c] sm:$0xf] }
  0xf7   :  { %v9633_v41 = vld [vmem:[#allocation3 + $0x24] sm:$0xf0]  ;;  %v7200_v34 = vld [vmem:[#allocation3 + $0x368] sm:$0xf0] }
  0xf8   :  { %3275 = vmatpush.bf16.msra.mxu2 %v7647_v18  ;;  %3234 = vmatpush.bf16.msrb.mxu1 %v6847_v24  ;;  %v7294_v42 = vld [vmem:[#allocation3 + $0x408] sm:$0xf]  ;;  %v6783_v54 = vor.u32 %v9633_v41, %v6782_v39  ;;  %v10818_v18 = vpop.f32.mrf.mxu1  ;;  %v9661_v39 = vld [vmem:[#allocation3 + $0x10c] sm:$0xf]  ;;  %v10826_v41 = vpop.f32.mrf.mxu3 }
  0xf9   :  { %v9761_v44 = vld [vmem:[#allocation3 + $0x424] sm:$0xf0] }
  0xfa   :  { %3247 = vmatpush.bf16.msra.mxu3 %v7135_v23  ;;  %v8030_v46 = vld [vmem:[#allocation3 + $0x9c8] sm:$0xf]  ;;  %3263 = vmatpush.bf16.msrb.mxu0 %v7327_v40  ;;  %v7295_v59 = vor.u32 %v9761_v44, %v7294_v42  ;;  %v6979_v23 = vor.u32 %v9677_v13, %v6976_v14  ;;  %v6912_v40 = vld [vmem:[#allocation3 + $0x128] sm:$0xf0]  ;;  %v7203_v44 = vor.u32 %v9733_v33, %v7200_v34 }
  0xfb   :  { %v9945_v47 = vld [vmem:[#allocation3 + $0x9e4] sm:$0xf0]  ;;  %v9701_v34 = vld [vmem:[#allocation3 + $0x24c] sm:$0xf] }
  0xfc   :  { %3276 = vmatpush.bf16.msra.mxu2 %v7615_v30  ;;  %v7550_v48 = vld [vmem:[#allocation3 + $0x608] sm:$0xf]  ;;  %3235 = vmatpush.bf16.msrb.mxu1 %v6815_v36  ;;  %v8031_v60 = vor.u32 %v9945_v47, %v8030_v46  ;;  %v6947_v36 = vor.u32 %v9669_v26, %v6944_v27  ;;  %v9637_v27 = vld [vmem:[#allocation3 + $0x4c] sm:$0xf] }
  0xfd   :  { %v9825_v50 = vld [vmem:[#allocation3 + $0x624] sm:$0xf0] }
  0xfe   :  { %v8318_v51 = vld [vmem:[#allocation3 + $0xc08] sm:$0xf]  ;;  %3248 = vmatpush.bf16.msra.mxu3 %v7103_v35  ;;  %v7551_v1 = vor.u32 %v9825_v50, %v7550_v48  ;;  %3264 = vmatpush.bf16.msrb.mxu0 %v7295_v59  ;;  %v10824_v35 = vpop.f32.mrf.mxu2  ;;  %v10828_v46 = vpop.f32.mrf.mxu0  ;;  %v9725_v50 = vld [vmem:[#allocation3 + $0x30c] sm:$0xf] }
  0xff   :  { %v10017_v52 = vld [vmem:[#allocation3 + $0xc24] sm:$0xf0]  ;;  %v6880_v59 = vld [vmem:[#allocation3 + $0xe8] sm:$0xf0] }
 0x100   :  { %v7038_v61 = vld [vmem:[#allocation3 + $0x208] sm:$0xf]  ;;  %3277 = vmatpush.bf16.msra.mxu2 %v7583_v45  ;;  %v8319_v2 = vor.u32 %v10017_v52, %v8318_v51  ;;  %3236 = vmatpush.bf16.msrb.mxu1 %v6783_v54  ;;  %v7168_v51 = vld [vmem:[#allocation3 + $0x328] sm:$0xf0]  ;;  %v6915_v52 = vor.u32 %v9661_v39, %v6912_v40  ;;  %v10830_v55 = vpop.f32.mrf.mxu1  ;;  %v6883_v5 = vor.u32 %v9653_v56, %v6880_v59  ;;  %v10834_v21 = vpop.f32.mrf.mxu3 }
 0x101   :  { %v9697_v62 = vld [vmem:[#allocation3 + $0x224] sm:$0xf0]  ;;  %3265 = vmatmul.bf16.vlgmr.msrb.gmra.mxu0 %v10770_v58  ;;  %v9813_v40 = vld [vmem:[#allocation3 + $0x5cc] sm:$0xf] }
 0x102   :  { %v8286_v0 = vld [vmem:[#allocation3 + $0xbc8] sm:$0xf]  ;;  %3249 = vmatpush.bf16.msra.mxu3 %v7071_v53  ;;  %v7039_v12 = vor.u32 %v9697_v62, %v7038_v61  ;;  %3320 = vmatpush.bf16.msra.mxu0 %v8319_v2  ;;  %v7171_v61 = vor.u32 %v9725_v50, %v7168_v51  ;;  %v9717_v2 = vld [vmem:[#allocation3 + $0x2cc] sm:$0xf] }
 0x103   :  { %v10009_v4 = vld [vmem:[#allocation3 + $0xbe4] sm:$0xf0]  ;;  %3237 = vmatmul.bf16.vlgmr.msrb.gmra.mxu1 %v10768_v57  ;;  %v9941_v51 = vld [vmem:[#allocation3 + $0x9cc] sm:$0xf] }
 0x104   :  { %v7998_v9 = vld [vmem:[#allocation3 + $0x988] sm:$0xf]  ;;  %3285 = vmatpush.bf16.msra.mxu1 %v8031_v60  ;;  %v8287_v15 = vor.u32 %v10009_v4, %v8286_v0  ;;  %3278 = vmatpush.bf16.msra.mxu2 %v7551_v1  ;;  %v7136_v4 = vld [vmem:[#allocation3 + $0x2e8] sm:$0xf0] }
 0x105   :  { %v9937_v10 = vld [vmem:[#allocation3 + $0x9a4] sm:$0xf0]  ;;  %v7139_v14 = vor.u32 %v9717_v2, %v7136_v4  ;;  %v9693_v56 = vld [vmem:[#allocation3 + $0x20c] sm:$0xf] }
 0x106   :  { %v8254_v17 = vld [vmem:[#allocation3 + $0xb88] sm:$0xf]  ;;  %v7999_v19 = vor.u32 %v9937_v10, %v7998_v9  ;;  %3250 = vmatpush.bf16.msra.mxu3 %v7039_v12  ;;  %3341 = vmatpush.bf16.msrb.mxu0 %v7267_v16  ;;  %v9645_v9 = vld [vmem:[#allocation3 + $0x8c] sm:$0xf]  ;;  %v10832_v12 = vpop.f32.mrf.mxu2 }
 0x107   :  { %v10001_v20 = vld [vmem:[#allocation3 + $0xba4] sm:$0xf0]  ;;  %3279 = vmatmul.bf16.vlgmr.msra.gmra.mxu2 %v10774_v3  ;;  %v6848_v10 = vld [vmem:[#allocation3 + $0xa8] sm:$0xf0] }
 0x108   :  { %3327 = vmatpush.bf16.msrb.mxu2 %v7011_v7  ;;  %v7966_v24 = vld [vmem:[#allocation3 + $0x948] sm:$0xf]  ;;  %v8255_v28 = vor.u32 %v10001_v20, %v8254_v17  ;;  %3286 = vmatpush.bf16.msra.mxu1 %v7999_v19  ;;  %v9709_v19 = vld [vmem:[#allocation3 + $0x28c] sm:$0xf]  ;;  %v6851_v22 = vor.u32 %v9645_v9, %v6848_v10  ;;  %v10838_v26 = vpop.f32.mrf.mxu1 }
 0x109   :  { %v9929_v25 = vld [vmem:[#allocation3 + $0x964] sm:$0xf0]  ;;  %3251 = vmatmul.bf16.vlgmr.msra.gmra.mxu3 %v10772_v63  ;;  %v7104_v20 = vld [vmem:[#allocation3 + $0x2a8] sm:$0xf0]  ;;  %11253 = vst [vmem:[#allocation23_spill] sm:$0xff] %v10838_v26 }
 0x10a   :  { %3299 = vmatpush.bf16.msrb.mxu3 %v8287_v15  ;;  %v8222_v30 = vld [vmem:[#allocation3 + $0xb48] sm:$0xf]  ;;  %v7967_v31 = vor.u32 %v9929_v25, %v7966_v24  ;;  %3342 = vmatpush.bf16.msrb.mxu0 %v7235_v29  ;;  %v7040_v59 = vld [vmem:[#allocation3 + $0x228] sm:$0xf0]  ;;  %v9899_v26 = vld [vmem:[#allocation3 + $0x874] sm:$0xf0] }
 0x10b   :  { %v9993_v32 = vld [vmem:[#allocation3 + $0xb64] sm:$0xf0]  ;;  %v7776_v2 = vld [vmem:[#allocation3 + $0x7e8] sm:$0xf0] }
 0x10c   :  { %3328 = vmatpush.bf16.msrb.mxu2 %v6979_v23  ;;  %v7934_v37 = vld [vmem:[#allocation3 + $0x908] sm:$0xf]  ;;  %v8223_v42 = vor.u32 %v9993_v32, %v8222_v30  ;;  %3287 = vmatpush.bf16.msra.mxu1 %v7967_v31  ;;  %v10836_v23 = vpop.f32.mrf.mxu0  ;;  %v7107_v30 = vor.u32 %v9709_v19, %v7104_v20  ;;  %v10005_v4 = vld [vmem:[#allocation3 + $0xbcc] sm:$0xf] }
 0x10d   :  { %v9921_v38 = vld [vmem:[#allocation3 + $0x924] sm:$0xf0]  ;;  %11252 = vst [vmem:[#allocation22_spill] sm:$0xff] %v10836_v23  ;;  %v7488_v9 = vld [vmem:[#allocation3 + $0x5a8] sm:$0xf0] }
 0x10e   :  { %3300 = vmatpush.bf16.msrb.mxu3 %v8255_v28  ;;  %v8190_v45 = vld [vmem:[#allocation3 + $0xb08] sm:$0xf]  ;;  %v7935_v47 = vor.u32 %v9921_v38, %v7934_v37  ;;  %3343 = vmatpush.bf16.msrb.mxu0 %v7203_v44  ;;  %v6816_v28 = vld [vmem:[#allocation3 + $0x68] sm:$0xf0] }
 0x10f   :  { %v9985_v48 = vld [vmem:[#allocation3 + $0xb24] sm:$0xf0]  ;;  %v6819_v37 = vor.u32 %v9637_v27, %v6816_v28  ;;  %v9629_v44 = vld [vmem:[#allocation3 + $0xc] sm:$0xf] }
 0x110   :  { %3329 = vmatpush.bf16.msrb.mxu2 %v6947_v36  ;;  %v7902_v53 = vld [vmem:[#allocation3 + $0x8c8] sm:$0xf]  ;;  %v8191_v60 = vor.u32 %v9985_v48, %v8190_v45  ;;  %3288 = vmatpush.bf16.msra.mxu1 %v7935_v47  ;;  %v7072_v36 = vld [vmem:[#allocation3 + $0x268] sm:$0xf0] }
 0x111   :  { %v9913_v54 = vld [vmem:[#allocation3 + $0x8e4] sm:$0xf0]  ;;  %8342 = vmatmul.msk.bf16.vlgmr.msra.gmra.mxu0 %vm3029_vm0, %v10786_v49  ;;  %v6784_v45 = vld [vmem:[#allocation3 + $0x28] sm:$0xf0]  ;;  %v7075_v48 = vor.u32 %v9701_v34, %v7072_v36 }
 0x112   :  { %3301 = vmatpush.bf16.msrb.mxu3 %v8223_v42  ;;  %v8158_v62 = vld [vmem:[#allocation3 + $0xac8] sm:$0xf]  ;;  %v7903_v0 = vor.u32 %v9913_v54, %v7902_v53  ;;  %3344 = vmatpush.bf16.msrb.mxu0 %v7171_v61  ;;  %v7520_v42 = vld [vmem:[#allocation3 + $0x5e8] sm:$0xf0] }
 0x113   :  { %v9977_v1 = vld [vmem:[#allocation3 + $0xae4] sm:$0xf0]  ;;  %v7523_v61 = vor.u32 %v9813_v40, %v7520_v42  ;;  %v8000_v19 = vld [vmem:[#allocation3 + $0x9a8] sm:$0xf0] }
 0x114   :  { %3330 = vmatpush.bf16.msrb.mxu2 %v6915_v52  ;;  %v7870_v6 = vld [vmem:[#allocation3 + $0x888] sm:$0xf]  ;;  %v8159_v13 = vor.u32 %v9977_v1, %v8158_v62  ;;  %3289 = vmatpush.bf16.msra.mxu1 %v7903_v0  ;;  %v8032_v52 = vld [vmem:[#allocation3 + $0x9e8] sm:$0xf0]  ;;  %v6787_v62 = vor.u32 %v9629_v44, %v6784_v45  ;;  %v10844_v0 = vpop.f32.mrf.mxu3 }
 0x115   :  { %v9905_v7 = vld [vmem:[#allocation3 + $0x8a4] sm:$0xf0]  ;;  %11255 = vst [vmem:[#allocation25_spill] sm:$0xff] %v10844_v0  ;;  %v9877_v1 = vld [vmem:[#allocation3 + $0x7cc] sm:$0xf] }
 0x116   :  { %3302 = vmatpush.bf16.msrb.mxu3 %v8191_v60  ;;  %v8126_v15 = vld [vmem:[#allocation3 + $0xa88] sm:$0xf]  ;;  %v7871_v16 = vor.u32 %v9905_v7, %v7870_v6  ;;  %3345 = vmatpush.bf16.msrb.mxu0 %v7139_v14  ;;  %v10842_v60 = vpop.f32.mrf.mxu2  ;;  %v8288_v6 = vld [vmem:[#allocation3 + $0xbe8] sm:$0xf0]  ;;  %v7043_v14 = vor.u32 %v9693_v56, %v7040_v59  ;;  %v6992_v0 = vld [vmem:[#allocation3 + $0x1b8] sm:$0xf0] }
 0x117   :  { %v9969_v17 = vld [vmem:[#allocation3 + $0xaa4] sm:$0xf0]  ;;  %11254 = vst [vmem:[#allocation24_spill] sm:$0xff] %v10842_v60  ;;  %v9805_v7 = vld [vmem:[#allocation3 + $0x58c] sm:$0xf]  ;;  %v8291_v20 = vor.u32 %v10005_v4, %v8288_v6 }
 0x118   :  { %3331 = vmatpush.bf16.msrb.mxu2 %v6883_v5  ;;  %v7838_v24 = vld [vmem:[#allocation3 + $0x848] sm:$0xf]  ;;  %v8127_v29 = vor.u32 %v9969_v17, %v8126_v15  ;;  %3290 = vmatpush.bf16.msra.mxu1 %v7871_v16  ;;  %v8035_v5 = vor.u32 %v9941_v51, %v8032_v52  ;;  %v7779_v15 = vor.u32 %v9877_v1, %v7776_v2  ;;  %v10848_v16 = vpop.f32.mrf.mxu1  ;;  %v9933_v17 = vld [vmem:[#allocation3 + $0x98c] sm:$0xf]  ;;  %v7886_v60 = vld [vmem:[#allocation3 + $0x898] sm:$0xf] }
 0x119   :  { %v9897_v25 = vld [vmem:[#allocation3 + $0x864] sm:$0xf0]  ;;  %11257 = vst [vmem:[#allocation27_spill] sm:$0xff] %v10848_v16  ;;  %v9997_v27 = vld [vmem:[#allocation3 + $0xb8c] sm:$0xf] }
 0x11a   :  { %3303 = vmatpush.bf16.msrb.mxu3 %v8159_v13  ;;  %v8094_v31 = vld [vmem:[#allocation3 + $0xa48] sm:$0xf]  ;;  %v7839_v32 = vor.u32 %v9897_v25, %v7838_v24  ;;  %3346 = vmatpush.bf16.msrb.mxu0 %v7107_v30  ;;  %v10846_v13 = vpop.f32.mrf.mxu0  ;;  %v9869_v24 = vld [vmem:[#allocation3 + $0x78c] sm:$0xf]  ;;  %v9907_v16 = vld [vmem:[#allocation3 + $0x8b4] sm:$0xf0] }
 0x11b   :  { %v9961_v33 = vld [vmem:[#allocation3 + $0xa64] sm:$0xf0]  ;;  %11256 = vst [vmem:[#allocation26_spill] sm:$0xff] %v10846_v13  ;;  %v7744_v25 = vld [vmem:[#allocation3 + $0x7a8] sm:$0xf0] }
 0x11c   :  { %3332 = vmatpush.bf16.msrb.mxu2 %v6851_v22  ;;  %v7806_v38 = vld [vmem:[#allocation3 + $0x808] sm:$0xf]  ;;  %v8095_v47 = vor.u32 %v9961_v33, %v8094_v31  ;;  %3291 = vmatpush.bf16.msra.mxu1 %v7839_v32  ;;  %v7491_v22 = vor.u32 %v9805_v7, %v7488_v9  ;;  %v8256_v28 = vld [vmem:[#allocation3 + $0xba8] sm:$0xf0]  ;;  %v8003_v31 = vor.u32 %v9933_v17, %v8000_v19  ;;  %v9815_v13 = vld [vmem:[#allocation3 + $0x5dc] sm:$0xf] }
 0x11d   :  { %v9889_v39 = vld [vmem:[#allocation3 + $0x824] sm:$0xf0]  ;;  %v7456_v30 = vld [vmem:[#allocation3 + $0x568] sm:$0xf0]  ;;  %v7747_v32 = vor.u32 %v9869_v24, %v7744_v25  ;;  %v8259_v36 = vor.u32 %v9997_v27, %v8256_v28 }
 0x11e   :  { %3304 = vmatpush.bf16.msrb.mxu3 %v8127_v29  ;;  %v8062_v50 = vld [vmem:[#allocation3 + $0xa08] sm:$0xf]  ;;  %v7807_v53 = vor.u32 %v9889_v39, %v7806_v38  ;;  %3347 = vmatpush.bf16.msrb.mxu0 %v7075_v48  ;;  %v9797_v29 = vld [vmem:[#allocation3 + $0x54c] sm:$0xf]  ;;  %v10855_v48 = vpop.f32.mrf.mxu3 }
 0x11f   :  { %v9953_v54 = vld [vmem:[#allocation3 + $0xa24] sm:$0xf0]  ;;  %v9925_v33 = vld [vmem:[#allocation3 + $0x94c] sm:$0xf]  ;;  %11259 = vst [vmem:[#allocation29_spill] sm:$0xff] %v10855_v48 }
 0x120   :  { %3333 = vmatpush.bf16.msrb.mxu2 %v6819_v37  ;;  %v8063_v10 = vor.u32 %v9953_v54, %v8062_v50  ;;  %3292 = vmatpush.bf16.msra.mxu1 %v7807_v53  ;;  %v7968_v34 = vld [vmem:[#allocation3 + $0x968] sm:$0xf0]  ;;  %v7459_v37 = vor.u32 %v9797_v29, %v7456_v30  ;;  %v3056_v4 = vpop.f32.mrf.mxu1  ;;  %v9870_v48 = vld [vmem:[#allocation3 + $0x794] sm:$0xf] }
 0x121   :  { %v9861_v38 = vld [vmem:[#allocation3 + $0x74c] sm:$0xf]  ;;  %v7971_v50 = vor.u32 %v9925_v33, %v7968_v34 }
 0x122   :  { %3305 = vmatpush.bf16.msrb.mxu3 %v8095_v47  ;;  %3348 = vmatpush.bf16.msrb.mxu0 %v7043_v14  ;;  %v7712_v39 = vld [vmem:[#allocation3 + $0x768] sm:$0xf0]  ;;  %v10853_v47 = vpop.f32.mrf.mxu2  ;;  %v3042_v54 = vpop.f32.mrf.mxu0 }
 0x123   :  { %3293 = vmatmul.bf16.vlgmr.msra.gmra.mxu1 %v10802_v43  ;;  %v9989_v40 = vld [vmem:[#allocation3 + $0xb4c] sm:$0xf]  ;;  %11258 = vst [vmem:[#allocation28_spill] sm:$0xff] %v10853_v47  ;;  %v7715_v51 = vor.u32 %v9861_v38, %v7712_v39  ;;  %v3043_v2 = vadd.f32 %v3042_v54, %v10816_v11  ;;  %v9743_v47 = vld [vmem:[#allocation3 + $0x39c] sm:$0xf] }
 0x124   :  { %3355 = vmatpush.bf16.msrb.mxu1 %v7523_v61  ;;  %3334 = vmatpush.bf16.msrb.mxu2 %v6787_v62  ;;  %v8224_v42 = vld [vmem:[#allocation3 + $0xb68] sm:$0xf0] }
 0x125   :  { %v9789_v44 = vld [vmem:[#allocation3 + $0x50c] sm:$0xf]  ;;  %3349 = vmatmul.bf16.vlgmr.msrb.gmra.mxu0 %v10772_v63  ;;  %v8227_v56 = vor.u32 %v9989_v40, %v8224_v42 }
 0x126   :  { %3306 = vmatpush.bf16.msrb.mxu3 %v8063_v10  ;;  %3397 = vmatpush.bf16.msra.mxu0 %v8291_v20  ;;  %v7424_v45 = vld [vmem:[#allocation3 + $0x528] sm:$0xf0]  ;;  %v3057_v10 = vadd.f32 %v3056_v4, %v3043_v2 }
 0x127   :  { %3335 = vmatmul.bf16.vlgmr.msrb.gmra.mxu2 %v10768_v57  ;;  %v9917_v52 = vld [vmem:[#allocation3 + $0x90c] sm:$0xf]  ;;  %v7427_v59 = vor.u32 %v9789_v44, %v7424_v45 }
 0x128   :  { %3383 = vmatpush.bf16.msra.mxu2 %v8035_v5  ;;  %3356 = vmatpush.bf16.msrb.mxu1 %v7491_v22  ;;  %v7936_v53 = vld [vmem:[#allocation3 + $0x928] sm:$0xf0] }
 0x129   :  { %3307 = vmatmul.bf16.vlgmr.msrb.gmra.mxu3 %v10804_v8  ;;  %v9853_v61 = vld [vmem:[#allocation3 + $0x70c] sm:$0xf]  ;;  %v7939_v9 = vor.u32 %v9917_v52, %v7936_v53 }
 0x12a   :  { %3369 = vmatpush.bf16.msra.mxu3 %v7779_v15  ;;  %3398 = vmatpush.bf16.msra.mxu0 %v8259_v36  ;;  %v7680_v62 = vld [vmem:[#allocation3 + $0x728] sm:$0xf0]  ;;  %v3070_v29 = vpop.f32.mrf.mxu2  ;;  %v3084_v36 = vpop.f32.mrf.mxu3 }
 0x12b   :  { %v9981_v1 = vld [vmem:[#allocation3 + $0xb0c] sm:$0xf]  ;;  %v7683_v14 = vor.u32 %v9853_v61, %v7680_v62 }
 0x12c   :  { %3384 = vmatpush.bf16.msra.mxu2 %v8003_v31  ;;  %3357 = vmatpush.bf16.msrb.mxu1 %v7459_v37  ;;  %v8192_v5 = vld [vmem:[#allocation3 + $0xb28] sm:$0xf0]  ;;  %v3071_v31 = vadd.f32 %v3070_v29, %v3057_v10  ;;  %v7014_v29 = vld [vmem:[#allocation3 + $0x1d0] sm:$0xf] }
 0x12d   :  { %v9781_v6 = vld [vmem:[#allocation3 + $0x4cc] sm:$0xf]  ;;  %v8195_v19 = vor.u32 %v9981_v1, %v8192_v5 }
 0x12e   :  { %3370 = vmatpush.bf16.msra.mxu3 %v7747_v32  ;;  %v7392_v7 = vld [vmem:[#allocation3 + $0x4e8] sm:$0xf0]  ;;  %3399 = vmatpush.bf16.msra.mxu0 %v8227_v56  ;;  %v10859_v44 = vadd.f32 %v3084_v36, %v3071_v31  ;;  %v7270_v31 = vld [vmem:[#allocation3 + $0x3d0] sm:$0xf] }
 0x12f   :  { %v9909_v15 = vld [vmem:[#allocation3 + $0x8cc] sm:$0xf]  ;;  %v7395_v20 = vor.u32 %v9781_v6, %v7392_v7  ;;  %v9818_v36 = vld [vmem:[#allocation3 + $0x5ec] sm:$0xf0] }
 0x130   :  { %3385 = vmatpush.bf16.msra.mxu2 %v7971_v50  ;;  %v7904_v17 = vld [vmem:[#allocation3 + $0x8e8] sm:$0xf0]  ;;  %3358 = vmatpush.bf16.msrb.mxu1 %v7427_v59 }
 0x131   :  { %v9845_v22 = vld [vmem:[#allocation3 + $0x6cc] sm:$0xf]  ;;  %v7907_v30 = vor.u32 %v9909_v15, %v7904_v17 }
 0x132   :  { %3371 = vmatpush.bf16.msra.mxu3 %v7715_v51  ;;  %v7648_v24 = vld [vmem:[#allocation3 + $0x6e8] sm:$0xf0]  ;;  %3400 = vmatpush.bf16.msra.mxu0 %v8195_v19  ;;  %v10861_v7 = vpop.f32.mrf.mxu2 }
 0x133   :  { %v9973_v25 = vld [vmem:[#allocation3 + $0xacc] sm:$0xf]  ;;  %v7651_v32 = vor.u32 %v9845_v22, %v7648_v24 }
 0x134   :  { %v8160_v27 = vld [vmem:[#allocation3 + $0xae8] sm:$0xf0]  ;;  %3386 = vmatpush.bf16.msra.mxu2 %v7939_v9  ;;  %3359 = vmatpush.bf16.msrb.mxu1 %v7395_v20 }
 0x135   :  { %v9773_v11 = vld [vmem:[#allocation3 + $0x48c] sm:$0xf]  ;;  %v8163_v37 = vor.u32 %v9973_v25, %v8160_v27 }
 0x136   :  { %v7360_v28 = vld [vmem:[#allocation3 + $0x4a8] sm:$0xf0]  ;;  %3372 = vmatpush.bf16.msra.mxu3 %v7683_v14 }
 0x137   :  { %v9901_v33 = vld [vmem:[#allocation3 + $0x88c] sm:$0xf]  ;;  %v7363_v38 = vor.u32 %v9773_v11, %v7360_v28  ;;  %3401 = vmatpush.bf16.msra.mxu0 %v8163_v37 }
 0x138   :  { %v7872_v34 = vld [vmem:[#allocation3 + $0x8a8] sm:$0xf0]  ;;  %3387 = vmatpush.bf16.msra.mxu2 %v7907_v30  ;;  %v9690_v30 = vld [vmem:[#allocation3 + $0x1ec] sm:$0xf0] }
 0x139   :  { %v9837_v39 = vld [vmem:[#allocation3 + $0x68c] sm:$0xf]  ;;  %v7875_v52 = vor.u32 %v9901_v33, %v7872_v34  ;;  %3360 = vmatpush.bf16.msrb.mxu1 %v7363_v38  ;;  %v9754_v33 = vld [vmem:[#allocation3 + $0x3ec] sm:$0xf0] }
 0x13a   :  { %v7616_v40 = vld [vmem:[#allocation3 + $0x6a8] sm:$0xf0]  ;;  %3373 = vmatpush.bf16.msra.mxu3 %v7651_v32  ;;  %v7526_v34 = vld [vmem:[#allocation3 + $0x5d0] sm:$0xf] }
 0x13b   :  { %v9965_v42 = vld [vmem:[#allocation3 + $0xa8c] sm:$0xf]  ;;  %v7619_v53 = vor.u32 %v9837_v39, %v7616_v40  ;;  %v7782_v38 = vld [vmem:[#allocation3 + $0x7d0] sm:$0xf] }
 0x13c   :  { %v8128_v45 = vld [vmem:[#allocation3 + $0xaa8] sm:$0xf0]  ;;  %3388 = vmatpush.bf16.msra.mxu2 %v7875_v52  ;;  %v9882_v39 = vld [vmem:[#allocation3 + $0x7ec] sm:$0xf0] }
 0x13d   :  { %v9765_v50 = vld [vmem:[#allocation3 + $0x44c] sm:$0xf]  ;;  %v8131_v59 = vor.u32 %v9965_v42, %v8128_v45  ;;  %v7015_v42 = vor.u32 %v9690_v30, %v7014_v29  ;;  %v7271_v45 = vor.u32 %v9754_v33, %v7270_v31  ;;  %v9682_v52 = vld [vmem:[#allocation3 + $0x1ac] sm:$0xf0] }
 0x13e   :  { %v7328_v51 = vld [vmem:[#allocation3 + $0x468] sm:$0xf0]  ;;  %3374 = vmatpush.bf16.msra.mxu3 %v7619_v53  ;;  %v7238_v53 = vld [vmem:[#allocation3 + $0x390] sm:$0xf] }
 0x13f   :  { %v9893_v54 = vld [vmem:[#allocation3 + $0x84c] sm:$0xf]  ;;  %v7331_v61 = vor.u32 %v9765_v50, %v7328_v51  ;;  %3402 = vmatpush.bf16.msra.mxu0 %v8131_v59  ;;  %v7527_v50 = vor.u32 %v9818_v36, %v7526_v34  ;;  %v6982_v51 = vld [vmem:[#allocation3 + $0x190] sm:$0xf]  ;;  %v10865_v59 = vpop.f32.mrf.mxu2 }
 0x140   :  { %v7840_v56 = vld [vmem:[#allocation3 + $0x868] sm:$0xf0]  ;;  %v6918_v31 = vld [vmem:[#allocation3 + $0x110] sm:$0xf] }
 0x141   :  { %v9829_v62 = vld [vmem:[#allocation3 + $0x64c] sm:$0xf]  ;;  %v7843_v9 = vor.u32 %v9893_v54, %v7840_v56  ;;  %3361 = vmatpush.bf16.msrb.mxu1 %v7331_v61  ;;  %v10863_v54 = vpop.f32.mrf.mxu0  ;;  %v7783_v56 = vor.u32 %v9882_v39, %v7782_v38  ;;  %v9746_v61 = vld [vmem:[#allocation3 + $0x3ac] sm:$0xf0] }
 0x142   :  { %v7584_v1 = vld [vmem:[#allocation3 + $0x668] sm:$0xf0]  ;;  %v7174_v33 = vld [vmem:[#allocation3 + $0x310] sm:$0xf] }
 0x143   :  { %v9957_v2 = vld [vmem:[#allocation3 + $0xa4c] sm:$0xf]  ;;  %v7587_v15 = vor.u32 %v9829_v62, %v7584_v1  ;;  %3389 = vmatpush.bf16.msra.mxu2 %v7843_v9  ;;  %v7494_v62 = vld [vmem:[#allocation3 + $0x590] sm:$0xf]  ;;  %v7239_v9 = vor.u32 %v9746_v61, %v7238_v53 }
 0x144   :  { %v8096_v4 = vld [vmem:[#allocation3 + $0xa68] sm:$0xf0]  ;;  %v9810_v1 = vld [vmem:[#allocation3 + $0x5ac] sm:$0xf0] }
 0x145   :  { %v9757_v5 = vld [vmem:[#allocation3 + $0x40c] sm:$0xf]  ;;  %v8099_v22 = vor.u32 %v9957_v2, %v8096_v4  ;;  %3375 = vmatpush.bf16.msra.mxu3 %v7587_v15  ;;  %v7750_v2 = vld [vmem:[#allocation3 + $0x790] sm:$0xf] }
 0x146   :  { %v7296_v6 = vld [vmem:[#allocation3 + $0x428] sm:$0xf0]  ;;  %v9874_v4 = vld [vmem:[#allocation3 + $0x7ac] sm:$0xf0] }
 0x147   :  { %v10013_v10 = vld [vmem:[#allocation3 + $0xc0c] sm:$0xf]  ;;  %v7299_v24 = vor.u32 %v9757_v5, %v7296_v6  ;;  %3403 = vmatpush.bf16.msra.mxu0 %v8099_v22  ;;  %v10868_v5 = vpop.f32.mrf.mxu1  ;;  %v6983_v6 = vor.u32 %v9682_v52, %v6982_v51  ;;  %v9674_v15 = vld [vmem:[#allocation3 + $0x16c] sm:$0xf0] }
 0x148   :  { %v8320_v14 = vld [vmem:[#allocation3 + $0xc28] sm:$0xf0]  ;;  %v7462_v22 = vld [vmem:[#allocation3 + $0x550] sm:$0xf] }
 0x149   :  { %v9821_v17 = vld [vmem:[#allocation3 + $0x60c] sm:$0xf]  ;;  %v8323_v28 = vor.u32 %v10013_v10, %v8320_v14  ;;  %3362 = vmatpush.bf16.msrb.mxu1 %v7299_v24  ;;  %v7495_v10 = vor.u32 %v9810_v1, %v7494_v62  ;;  %v6950_v14 = vld [vmem:[#allocation3 + $0x150] sm:$0xf]  ;;  %v3098_v34 = vpop.f32.mrf.mxu0 }
 0x14a   :  { %v9885_v19 = vld [vmem:[#allocation3 + $0x80c] sm:$0xf]  ;;  %v9802_v24 = vld [vmem:[#allocation3 + $0x56c] sm:$0xf0] }
 0x14b   :  { %v7808_v20 = vld [vmem:[#allocation3 + $0x828] sm:$0xf0]  ;;  %v7463_v30 = vor.u32 %v9802_v24, %v7462_v22  ;;  %v9730_v38 = vld [vmem:[#allocation3 + $0x32c] sm:$0xf0] }
 0x14c   :  { %v7552_v25 = vld [vmem:[#allocation3 + $0x628] sm:$0xf0]  ;;  %v7811_v32 = vor.u32 %v9885_v19, %v7808_v20  ;;  %3363 = vmatmul.bf16.vlgmr.msrb.gmra.mxu1 %v10770_v58  ;;  %v7751_v19 = vor.u32 %v9874_v4, %v7750_v2  ;;  %v9738_v20 = vld [vmem:[#allocation3 + $0x36c] sm:$0xf0] }
 0x14d   :  { %v9949_v27 = vld [vmem:[#allocation3 + $0xa0c] sm:$0xf]  ;;  %v7555_v37 = vor.u32 %v9821_v17, %v7552_v25  ;;  %3418 = vmatpush.bf16.msra.mxu1 %v8323_v28  ;;  %v7206_v17 = vld [vmem:[#allocation3 + $0x350] sm:$0xf]  ;;  %v10873_v28 = vpop.f32.mrf.mxu3 }
 0x14e   :  { %v8064_v11 = vld [vmem:[#allocation3 + $0xa28] sm:$0xf0]  ;;  %3390 = vmatpush.bf16.msra.mxu2 %v7811_v32  ;;  %v7718_v25 = vld [vmem:[#allocation3 + $0x750] sm:$0xf]  ;;  %v7207_v29 = vor.u32 %v9738_v20, %v7206_v17 }
 0x14f   :  { %v8067_v40 = vor.u32 %v9949_v27, %v8064_v11  ;;  %3376 = vmatpush.bf16.msra.mxu3 %v7555_v37  ;;  %v9866_v27 = vld [vmem:[#allocation3 + $0x76c] sm:$0xf0]  ;;  %v6951_v11 = vor.u32 %v9674_v15, %v6950_v14  ;;  %v10875_v37 = vpop.f32.mrf.mxu2  ;;  %v3112_v51 = vpop.f32.mrf.mxu1 }
 0x150   :  { %v9666_v32 = vld [vmem:[#allocation3 + $0x12c] sm:$0xf0]  ;;  %v7719_v36 = vor.u32 %v9866_v27, %v7718_v25 }
 0x151   :  { %3404 = vmatpush.bf16.msra.mxu0 %v8067_v40  ;;  %3439 = vmatpush.bf16.msrb.mxu1 %v7271_v45  ;;  %v7430_v39 = vld [vmem:[#allocation3 + $0x510] sm:$0xf]  ;;  %v6919_v52 = vor.u32 %v9666_v32, %v6918_v31 }
 0x152   :  { %3453 = vmatpush.bf16.msrb.mxu2 %v7527_v50  ;;  %3377 = vmatmul.bf16.vlgmr.msra.gmra.mxu3 %v10774_v3  ;;  %v9794_v40 = vld [vmem:[#allocation3 + $0x52c] sm:$0xf0] }
 0x153   :  { %3425 = vmatpush.bf16.msrb.mxu3 %v7015_v42  ;;  %3391 = vmatmul.bf16.vlgmr.msra.gmra.mxu2 %v10802_v43  ;;  %v3099_v42 = vadd.f32 %v3098_v34, %v10859_v44  ;;  %v7686_v45 = vld [vmem:[#allocation3 + $0x710] sm:$0xf]  ;;  %v7431_v61 = vor.u32 %v9794_v40, %v7430_v39 }
 0x154   :  { %3405 = vmatmul.bf16.vlgmr.msra.gmra.mxu0 %v10804_v8  ;;  %v9858_v50 = vld [vmem:[#allocation3 + $0x72c] sm:$0xf0] }
 0x155   :  { %3467 = vmatpush.bf16.msrb.mxu0 %v7783_v56  ;;  %3440 = vmatpush.bf16.msrb.mxu1 %v7239_v9  ;;  %v3113_v53 = vadd.f32 %v3112_v51, %v3099_v42  ;;  %v7175_v56 = vor.u32 %v9730_v38, %v7174_v33  ;;  %v6886_v62 = vld [vmem:[#allocation3 + $0xd0] sm:$0xf]  ;;  %v7687_v4 = vor.u32 %v9858_v50, %v7686_v45 }
 0x156   :  { %3454 = vmatpush.bf16.msrb.mxu2 %v7495_v10  ;;  %v9658_v1 = vld [vmem:[#allocation3 + $0xec] sm:$0xf0] }
 0x157   :  { %3426 = vmatpush.bf16.msrb.mxu3 %v6983_v6  ;;  %v7142_v2 = vld [vmem:[#allocation3 + $0x2d0] sm:$0xf]  ;;  %v10879_v44 = vadd.f32 %v10865_v59, %v3113_v53  ;;  %v6887_v17 = vor.u32 %v9658_v1, %v6886_v62  ;;  %v3154_v34 = vpop.f32.mrf.mxu2 }
 0x158   :  { %v9722_v6 = vld [vmem:[#allocation3 + $0x2ec] sm:$0xf0] }
 0x159   :  { %3468 = vmatpush.bf16.msrb.mxu0 %v7751_v19  ;;  %3441 = vmatpush.bf16.msrb.mxu1 %v7207_v29  ;;  %v7398_v9 = vld [vmem:[#allocation3 + $0x4d0] sm:$0xf]  ;;  %v3140_v19 = vpop.f32.mrf.mxu3  ;;  %v7143_v20 = vor.u32 %v9722_v6, %v7142_v2 }
 0x15a   :  { %3455 = vmatpush.bf16.msrb.mxu2 %v7463_v30  ;;  %v9786_v10 = vld [vmem:[#allocation3 + $0x4ec] sm:$0xf0] }
 0x15b   :  { %3427 = vmatpush.bf16.msrb.mxu3 %v6951_v11  ;;  %v7654_v14 = vld [vmem:[#allocation3 + $0x6d0] sm:$0xf]  ;;  %v7399_v22 = vor.u32 %v9786_v10, %v7398_v9  ;;  %v3141_v11 = vadd.f32 %v3140_v19, %v10818_v18 }
 0x15c   :  { %v9850_v15 = vld [vmem:[#allocation3 + $0x6ec] sm:$0xf0]  ;;  %8343 = vmatmul.msk.bf16.vlgmr.msra.gmra.mxu1 %vm3029_vm0, %v10786_v49 }
 0x15d   :  { %3469 = vmatpush.bf16.msrb.mxu0 %v7719_v36  ;;  %3442 = vmatpush.bf16.msrb.mxu1 %v7175_v56  ;;  %v6854_v24 = vld [vmem:[#allocation3 + $0x90] sm:$0xf]  ;;  %v7655_v29 = vor.u32 %v9850_v15, %v7654_v14  ;;  %v10884_v38 = vadd.f32 %v3154_v34, %v3141_v11 }
 0x15e   :  { %3456 = vmatpush.bf16.msrb.mxu2 %v7431_v61  ;;  %v9650_v25 = vld [vmem:[#allocation3 + $0xac] sm:$0xf0] }
 0x15f   :  { %3428 = vmatpush.bf16.msrb.mxu3 %v6919_v52  ;;  %v7110_v27 = vld [vmem:[#allocation3 + $0x290] sm:$0xf]  ;;  %v6855_v36 = vor.u32 %v9650_v25, %v6854_v24 }
 0x160   :  { %v9714_v30 = vld [vmem:[#allocation3 + $0x2ac] sm:$0xf0] }
 0x161   :  { %3470 = vmatpush.bf16.msrb.mxu0 %v7687_v4  ;;  %v7366_v31 = vld [vmem:[#allocation3 + $0x490] sm:$0xf]  ;;  %3443 = vmatpush.bf16.msrb.mxu1 %v7143_v20  ;;  %v7111_v39 = vor.u32 %v9714_v30, %v7110_v27  ;;  %v7016_v30 = vld [vmem:[#allocation3 + $0x1f0] sm:$0xf0] }
 0x162   :  { %v9778_v59 = vld [vmem:[#allocation3 + $0x4ac] sm:$0xf0]  ;;  %3457 = vmatpush.bf16.msrb.mxu2 %v7399_v22 }
 0x163   :  { %v7622_v32 = vld [vmem:[#allocation3 + $0x690] sm:$0xf]  ;;  %3429 = vmatpush.bf16.msrb.mxu3 %v6887_v17  ;;  %v7367_v40 = vor.u32 %v9778_v59, %v7366_v31 }
 0x164   :  { %v9842_v33 = vld [vmem:[#allocation3 + $0x6ac] sm:$0xf0] }
 0x165   :  { %v6822_v42 = vld [vmem:[#allocation3 + $0x50] sm:$0xf]  ;;  %3471 = vmatpush.bf16.msrb.mxu0 %v7655_v29  ;;  %v7623_v50 = vor.u32 %v9842_v33, %v7622_v32  ;;  %3444 = vmatpush.bf16.msrb.mxu1 %v7111_v39  ;;  %v9686_v29 = vld [vmem:[#allocation3 + $0x1d4] sm:$0xf] }
 0x166   :  { %v9642_v18 = vld [vmem:[#allocation3 + $0x6c] sm:$0xf0]  ;;  %3458 = vmatpush.bf16.msrb.mxu2 %v7367_v40  ;;  %v9750_v39 = vld [vmem:[#allocation3 + $0x3d4] sm:$0xf] }
 0x167   :  { %v7078_v45 = vld [vmem:[#allocation3 + $0x250] sm:$0xf]  ;;  %3430 = vmatpush.bf16.msrb.mxu3 %v6855_v36  ;;  %v6823_v62 = vor.u32 %v9642_v18, %v6822_v42  ;;  %v7272_v40 = vld [vmem:[#allocation3 + $0x3f0] sm:$0xf0]  ;;  %v10886_v42 = vpop.f32.mrf.mxu0 }
 0x168   :  { %v9706_v51 = vld [vmem:[#allocation3 + $0x26c] sm:$0xf0] }
 0x169   :  { %v7334_v52 = vld [vmem:[#allocation3 + $0x450] sm:$0xf]  ;;  %v7079_v4 = vor.u32 %v9706_v51, %v7078_v45  ;;  %3472 = vmatpush.bf16.msrb.mxu0 %v7623_v50  ;;  %v7019_v45 = vor.u32 %v9686_v29, %v7016_v30  ;;  %v9734_v29 = vld [vmem:[#allocation3 + $0x354] sm:$0xf] }
 0x16a   :  { %v9770_v53 = vld [vmem:[#allocation3 + $0x46c] sm:$0xf0]  ;;  %v7208_v30 = vld [vmem:[#allocation3 + $0x370] sm:$0xf0] }
 0x16b   :  { %v7590_v56 = vld [vmem:[#allocation3 + $0x650] sm:$0xf]  ;;  %v7335_v6 = vor.u32 %v9770_v53, %v7334_v52  ;;  %3431 = vmatpush.bf16.msrb.mxu3 %v6823_v62  ;;  %3445 = vmatpush.bf16.msrb.mxu1 %v7079_v4  ;;  %v10888_v62 = vpop.f32.mrf.mxu1 }
 0x16c   :  { %v9834_v61 = vld [vmem:[#allocation3 + $0x66c] sm:$0xf0] }
 0x16d   :  { %v6790_v1 = vld [vmem:[#allocation3 + $0x10] sm:$0xf]  ;;  %v7591_v15 = vor.u32 %v9834_v61, %v7590_v56  ;;  %3459 = vmatpush.bf16.msrb.mxu2 %v7335_v6  ;;  %v9678_v56 = vld [vmem:[#allocation3 + $0x194] sm:$0xf] }
 0x16e   :  { %v9634_v2 = vld [vmem:[#allocation3 + $0x2c] sm:$0xf0]  ;;  %v6984_v61 = vld [vmem:[#allocation3 + $0x1b0] sm:$0xf0] }
 0x16f   :  { %v7046_v9 = vld [vmem:[#allocation3 + $0x210] sm:$0xf]  ;;  %v6791_v27 = vor.u32 %v9634_v2, %v6790_v1  ;;  %3473 = vmatpush.bf16.msrb.mxu0 %v7591_v15  ;;  %v7275_v2 = vor.u32 %v9750_v39, %v7272_v40  ;;  %v9742_v6 = vld [vmem:[#allocation3 + $0x394] sm:$0xf] }
 0x170   :  { %v9698_v10 = vld [vmem:[#allocation3 + $0x22c] sm:$0xf0] }
 0x171   :  { %v7302_v14 = vld [vmem:[#allocation3 + $0x410] sm:$0xf]  ;;  %v7047_v31 = vor.u32 %v9698_v10, %v7046_v9  ;;  %3432 = vmatpush.bf16.msrb.mxu3 %v6791_v27  ;;  %v7240_v9 = vld [vmem:[#allocation3 + $0x3b0] sm:$0xf0] }
 0x172   :  { %v9762_v17 = vld [vmem:[#allocation3 + $0x42c] sm:$0xf0]  ;;  %v7243_v27 = vor.u32 %v9742_v6, %v7240_v9 }
 0x173   :  { %v7558_v19 = vld [vmem:[#allocation3 + $0x610] sm:$0xf]  ;;  %v7303_v59 = vor.u32 %v9762_v17, %v7302_v14  ;;  %3446 = vmatpush.bf16.msrb.mxu1 %v7047_v31  ;;  %v6987_v14 = vor.u32 %v9678_v56, %v6984_v61  ;;  %v3168_v31 = vpop.f32.mrf.mxu0  ;;  %v9726_v61 = vld [vmem:[#allocation3 + $0x314] sm:$0xf] }
 0x174   :  { %v9826_v20 = vld [vmem:[#allocation3 + $0x62c] sm:$0xf0]  ;;  %3433 = vmatmul.bf16.vlgmr.msrb.gmra.mxu3 %v10768_v57  ;;  %v3169_v39 = vadd.f32 %v3168_v31, %v10884_v38 }
 0x175   :  { %v8038_v22 = vld [vmem:[#allocation3 + $0x9d0] sm:$0xf]  ;;  %v7559_v33 = vor.u32 %v9826_v20, %v7558_v19  ;;  %3460 = vmatpush.bf16.msrb.mxu2 %v7303_v59 }
 0x176   :  { %v9946_v24 = vld [vmem:[#allocation3 + $0x9ec] sm:$0xf0]  ;;  %3447 = vmatmul.bf16.vlgmr.msrb.gmra.mxu1 %v10772_v63 }
 0x177   :  { %v8294_v25 = vld [vmem:[#allocation3 + $0xbd0] sm:$0xf]  ;;  %v8039_v34 = vor.u32 %v9946_v24, %v8038_v22  ;;  %3474 = vmatpush.bf16.msrb.mxu0 %v7559_v33  ;;  %v9670_v22 = vld [vmem:[#allocation3 + $0x154] sm:$0xf] }
 0x178   :  { %v10010_v11 = vld [vmem:[#allocation3 + $0xbec] sm:$0xf0]  ;;  %3461 = vmatmul.bf16.vlgmr.msrb.gmra.mxu2 %v10770_v58  ;;  %v6952_v24 = vld [vmem:[#allocation3 + $0x170] sm:$0xf0] }
 0x179   :  { %v8326_v32 = vld [vmem:[#allocation3 + $0xc10] sm:$0xf]  ;;  %v8295_v18 = vor.u32 %v10010_v11, %v8294_v25  ;;  %3481 = vmatpush.bf16.msra.mxu3 %v8039_v34  ;;  %v10893_v25 = vpop.f32.mrf.mxu3 }
 0x17a   :  { %v10018_v36 = vld [vmem:[#allocation3 + $0xc2c] sm:$0xf0]  ;;  %3475 = vmatmul.bf16.vlgmr.msrb.gmra.mxu0 %v10774_v3 }
 0x17b   :  { %v8006_v50 = vld [vmem:[#allocation3 + $0x990] sm:$0xf]  ;;  %v8327_v1 = vor.u32 %v10018_v36, %v8326_v32  ;;  %3495 = vmatpush.bf16.msra.mxu1 %v8295_v18  ;;  %3523 = vmatpush.bf16.msra.mxu0 %v7019_v45  ;;  %v6955_v32 = vor.u32 %v9670_v22, %v6952_v24  ;;  %v9662_v18 = vld [vmem:[#allocation3 + $0x114] sm:$0xf] }
 0x17c   :  { %v9938_v51 = vld [vmem:[#allocation3 + $0x9ac] sm:$0xf0]  ;;  %v6920_v45 = vld [vmem:[#allocation3 + $0x130] sm:$0xf0] }
 0x17d   :  { %v8262_v52 = vld [vmem:[#allocation3 + $0xb90] sm:$0xf]  ;;  %v8007_v4 = vor.u32 %v9938_v51, %v8006_v50  ;;  %3516 = vmatpush.bf16.msra.mxu2 %v8327_v1  ;;  %v10897_v50 = vpop.f32.mrf.mxu2  ;;  %v3182_v51 = vpop.f32.mrf.mxu1  ;;  %v7176_v1 = vld [vmem:[#allocation3 + $0x330] sm:$0xf0] }
 0x17e   :  { %v10002_v53 = vld [vmem:[#allocation3 + $0xbac] sm:$0xf0]  ;;  %v9718_v22 = vld [vmem:[#allocation3 + $0x2d4] sm:$0xf] }
 0x17f   :  { %v8263_v10 = vor.u32 %v10002_v53, %v8262_v52  ;;  %v7974_v15 = vld [vmem:[#allocation3 + $0x950] sm:$0xf]  ;;  %3482 = vmatpush.bf16.msra.mxu3 %v8007_v4  ;;  %3524 = vmatpush.bf16.msra.mxu0 %v6987_v14  ;;  %v3183_v52 = vadd.f32 %v3182_v51, %v3169_v39  ;;  %v7211_v53 = vor.u32 %v9734_v29, %v7208_v30  ;;  %v9654_v14 = vld [vmem:[#allocation3 + $0xd4] sm:$0xf] }
 0x180   :  { %v9930_v17 = vld [vmem:[#allocation3 + $0x96c] sm:$0xf0]  ;;  %v6923_v4 = vor.u32 %v9662_v18, %v6920_v45  ;;  %v7144_v24 = vld [vmem:[#allocation3 + $0x2f0] sm:$0xf0] }
 0x181   :  { %v8230_v19 = vld [vmem:[#allocation3 + $0xb50] sm:$0xf]  ;;  %3537 = vmatpush.bf16.msrb.mxu2 %v7275_v2  ;;  %v7975_v11 = vor.u32 %v9930_v17, %v7974_v15  ;;  %3496 = vmatpush.bf16.msra.mxu1 %v8263_v10  ;;  %v6888_v15 = vld [vmem:[#allocation3 + $0xf0] sm:$0xf0]  ;;  %v3196_v17 = vpop.f32.mrf.mxu3 }
 0x182   :  { %v9994_v20 = vld [vmem:[#allocation3 + $0xb6c] sm:$0xf0]  ;;  %v6891_v29 = vor.u32 %v9654_v14, %v6888_v15  ;;  %v9710_v45 = vld [vmem:[#allocation3 + $0x294] sm:$0xf] }
 0x183   :  { %v8231_v59 = vor.u32 %v9994_v20, %v8230_v19  ;;  %v7942_v33 = vld [vmem:[#allocation3 + $0x910] sm:$0xf]  ;;  %3483 = vmatpush.bf16.msra.mxu3 %v7975_v11  ;;  %3525 = vmatpush.bf16.msra.mxu0 %v6955_v32  ;;  %v7179_v19 = vor.u32 %v9726_v61, %v7176_v1  ;;  %v7112_v51 = vld [vmem:[#allocation3 + $0x2b0] sm:$0xf0] }
 0x184   :  { %v9922_v34 = vld [vmem:[#allocation3 + $0x92c] sm:$0xf0]  ;;  %v9702_v14 = vld [vmem:[#allocation3 + $0x254] sm:$0xf] }
 0x185   :  { %v8198_v36 = vld [vmem:[#allocation3 + $0xb10] sm:$0xf]  ;;  %3538 = vmatpush.bf16.msrb.mxu2 %v7243_v27  ;;  %v7943_v56 = vor.u32 %v9922_v34, %v7942_v33  ;;  %3497 = vmatpush.bf16.msra.mxu1 %v8231_v59  ;;  %v3197_v27 = vadd.f32 %v3196_v17, %v3183_v52  ;;  %v9646_v33 = vld [vmem:[#allocation3 + $0x94] sm:$0xf] }
 0x186   :  { %v9986_v40 = vld [vmem:[#allocation3 + $0xb2c] sm:$0xf0]  ;;  %v6856_v34 = vld [vmem:[#allocation3 + $0xb0] sm:$0xf0] }
 0x187   :  { %v8199_v2 = vor.u32 %v9986_v40, %v8198_v36  ;;  %v7910_v38 = vld [vmem:[#allocation3 + $0x8d0] sm:$0xf]  ;;  %3484 = vmatpush.bf16.msra.mxu3 %v7943_v56  ;;  %3526 = vmatpush.bf16.msra.mxu0 %v6923_v4  ;;  %v3210_v36 = vpop.f32.mrf.mxu2  ;;  %v7147_v40 = vor.u32 %v9718_v22, %v7144_v24  ;;  %v9638_v4 = vld [vmem:[#allocation3 + $0x54] sm:$0xf] }
 0x188   :  { %v9914_v6 = vld [vmem:[#allocation3 + $0x8ec] sm:$0xf0]  ;;  %v10899_v39 = vadd.f32 %v3210_v36, %v3197_v27  ;;  %8344 = vmatmul.msk.bf16.vlgmr.msra.gmra.mxu2 %vm3029_vm0, %v10786_v49  ;;  %v7080_v15 = vld [vmem:[#allocation3 + $0x270] sm:$0xf0] }
 0x189   :  { %v8166_v9 = vld [vmem:[#allocation3 + $0xad0] sm:$0xf]  ;;  %3539 = vmatpush.bf16.msrb.mxu2 %v7211_v53  ;;  %v7911_v20 = vor.u32 %v9914_v6, %v7910_v38  ;;  %3498 = vmatpush.bf16.msra.mxu1 %v8199_v2  ;;  %v6859_v53 = vor.u32 %v9646_v33, %v6856_v34  ;;  %v6824_v38 = vld [vmem:[#allocation3 + $0x70] sm:$0xf0]  ;;  %v10903_v6 = vpop.f32.mrf.mxu3  ;;  %v7083_v33 = vor.u32 %v9702_v14, %v7080_v15 }
 0x18a   :  { %v9978_v10 = vld [vmem:[#allocation3 + $0xaec] sm:$0xf0]  ;;  %v9942_v36 = vld [vmem:[#allocation3 + $0x9d4] sm:$0xf] }
 0x18b   :  { %v8167_v11 = vor.u32 %v9978_v10, %v8166_v9  ;;  %v7878_v30 = vld [vmem:[#allocation3 + $0x890] sm:$0xf]  ;;  %3485 = vmatpush.bf16.msra.mxu3 %v7911_v20  ;;  %3527 = vmatpush.bf16.msra.mxu0 %v6891_v29  ;;  %v7115_v9 = vor.u32 %v9710_v45, %v7112_v51  ;;  %v6827_v20 = vor.u32 %v9638_v4, %v6824_v38  ;;  %v6792_v29 = vld [vmem:[#allocation3 + $0x30] sm:$0xf0] }
 0x18c   :  { %v9906_v31 = vld [vmem:[#allocation3 + $0x8ac] sm:$0xf0]  ;;  %v9694_v51 = vld [vmem:[#allocation3 + $0x214] sm:$0xf] }
 0x18d   :  { %v8134_v59 = vld [vmem:[#allocation3 + $0xa90] sm:$0xf]  ;;  %3540 = vmatpush.bf16.msrb.mxu2 %v7179_v19  ;;  %v7879_v18 = vor.u32 %v9906_v31, %v7878_v30  ;;  %3499 = vmatpush.bf16.msra.mxu1 %v8167_v11  ;;  %v9630_v11 = vld [vmem:[#allocation3 + $0x14] sm:$0xf] }
 0x18e   :  { %v9970_v32 = vld [vmem:[#allocation3 + $0xaac] sm:$0xf0]  ;;  %v9814_v30 = vld [vmem:[#allocation3 + $0x5d4] sm:$0xf]  ;;  %v6795_v45 = vor.u32 %v9630_v11, %v6792_v29 }
 0x18f   :  { %v8135_v52 = vor.u32 %v9970_v32, %v8134_v59  ;;  %v7846_v56 = vld [vmem:[#allocation3 + $0x850] sm:$0xf]  ;;  %3486 = vmatpush.bf16.msra.mxu3 %v7879_v18  ;;  %3528 = vmatpush.bf16.msra.mxu0 %v6859_v53  ;;  %v7528_v31 = vld [vmem:[#allocation3 + $0x5f0] sm:$0xf0] }
 0x190   :  { %v9898_v61 = vld [vmem:[#allocation3 + $0x86c] sm:$0xf0]  ;;  %v9878_v59 = vld [vmem:[#allocation3 + $0x7d4] sm:$0xf]  ;;  %v7531_v53 = vor.u32 %v9814_v30, %v7528_v31 }
 0x191   :  { %v8102_v1 = vld [vmem:[#allocation3 + $0xa50] sm:$0xf]  ;;  %3541 = vmatpush.bf16.msrb.mxu2 %v7147_v40  ;;  %v7847_v10 = vor.u32 %v9898_v61, %v7846_v56  ;;  %3500 = vmatpush.bf16.msra.mxu1 %v8135_v52  ;;  %v7784_v32 = vld [vmem:[#allocation3 + $0x7f0] sm:$0xf0] }
 0x192   :  { %v9962_v2 = vld [vmem:[#allocation3 + $0xa6c] sm:$0xf0]  ;;  %v8040_v40 = vld [vmem:[#allocation3 + $0x9f0] sm:$0xf0]  ;;  %v7787_v56 = vor.u32 %v9878_v59, %v7784_v32 }
 0x193   :  { %v7814_v17 = vld [vmem:[#allocation3 + $0x810] sm:$0xf]  ;;  %v8103_v19 = vor.u32 %v9962_v2, %v8102_v1  ;;  %3487 = vmatpush.bf16.msra.mxu3 %v7847_v10  ;;  %3529 = vmatpush.bf16.msra.mxu0 %v6827_v20  ;;  %v7048_v52 = vld [vmem:[#allocation3 + $0x230] sm:$0xf0]  ;;  %v8043_v4 = vor.u32 %v9942_v36, %v8040_v40  ;;  %v3224_v10 = vpop.f32.mrf.mxu3 }
 0x194   :  { %v9890_v22 = vld [vmem:[#allocation3 + $0x82c] sm:$0xf0]  ;;  %v10006_v61 = vld [vmem:[#allocation3 + $0xbd4] sm:$0xf]  ;;  %v7051_v14 = vor.u32 %v9694_v51, %v7048_v52 }
 0x195   :  { %v8070_v24 = vld [vmem:[#allocation3 + $0xa10] sm:$0xf]  ;;  %3542 = vmatpush.bf16.msrb.mxu2 %v7115_v9  ;;  %v7815_v34 = vor.u32 %v9890_v22, %v7814_v17  ;;  %3501 = vmatpush.bf16.msra.mxu1 %v8103_v19  ;;  %v8296_v1 = vld [vmem:[#allocation3 + $0xbf0] sm:$0xf0]  ;;  %v10906_v19 = vadd.f32 %v3224_v10, %v10899_v39 }
 0x196   :  { %v9954_v27 = vld [vmem:[#allocation3 + $0xa2c] sm:$0xf0]  ;;  %v9806_v2 = vld [vmem:[#allocation3 + $0x594] sm:$0xf]  ;;  %v8299_v20 = vor.u32 %v10006_v61, %v8296_v1 }
 0x197   :  { %v8071_v18 = vor.u32 %v9954_v27, %v8070_v24  ;;  %v7496_v38 = vld [vmem:[#allocation3 + $0x5b0] sm:$0xf0]  ;;  %3488 = vmatpush.bf16.msra.mxu3 %v7815_v34  ;;  %3530 = vmatpush.bf16.msra.mxu0 %v6795_v45  ;;  %11260 = vst [vmem:[#allocation30_spill] sm:$0xff] %v10906_v19  ;;  %v9935_v19 = vld [vmem:[#allocation3 + $0x99c] sm:$0xf] }
 0x198   :  { %v7752_v9 = vld [vmem:[#allocation3 + $0x7b0] sm:$0xf0]  ;;  %v7499_v22 = vor.u32 %v9806_v2, %v7496_v38 }
 0x199   :  { %3543 = vmatpush.bf16.msrb.mxu2 %v7083_v33  ;;  %v9934_v15 = vld [vmem:[#allocation3 + $0x994] sm:$0xf]  ;;  %3502 = vmatpush.bf16.msra.mxu1 %v8071_v18  ;;  %v7755_v24 = vor.u32 %v9870_v48, %v7752_v9 }
 0x19a   :  { %v8008_v17 = vld [vmem:[#allocation3 + $0x9b0] sm:$0xf0]  ;;  %3489 = vmatmul.bf16.vlgmr.msra.gmra.mxu3 %v10802_v43  ;;  %3531 = vmatmul.bf16.vlgmr.msra.gmra.mxu0 %v10768_v57 }
 0x19b   :  { %3551 = vmatpush.bf16.msrb.mxu3 %v7531_v53  ;;  %v9998_v27 = vld [vmem:[#allocation3 + $0xb94] sm:$0xf]  ;;  %3579 = vmatpush.bf16.msrb.mxu0 %v8043_v4  ;;  %v8011_v30 = vor.u32 %v9934_v15, %v8008_v17 }
 0x19c   :  { %v8264_v11 = vld [vmem:[#allocation3 + $0xbb0] sm:$0xf0]  ;;  %3503 = vmatmul.bf16.vlgmr.msra.gmra.mxu1 %v10804_v8 }
 0x19d   :  { %3565 = vmatpush.bf16.msrb.mxu1 %v7787_v56  ;;  %v9798_v29 = vld [vmem:[#allocation3 + $0x554] sm:$0xf]  ;;  %3544 = vmatpush.bf16.msrb.mxu2 %v7051_v14  ;;  %v8267_v34 = vor.u32 %v9998_v27, %v8264_v11 }
 0x19e   :  { %v7464_v31 = vld [vmem:[#allocation3 + $0x570] sm:$0xf0] }
 0x19f   :  { %v9862_v59 = vld [vmem:[#allocation3 + $0x754] sm:$0xf]  ;;  %3552 = vmatpush.bf16.msrb.mxu3 %v7499_v22  ;;  %v7467_v48 = vor.u32 %v9798_v29, %v7464_v31  ;;  %3580 = vmatpush.bf16.msrb.mxu0 %v8011_v30 }
 0x1a0   :  { %v7720_v32 = vld [vmem:[#allocation3 + $0x770] sm:$0xf0]  ;;  %3545 = vmatmul.bf16.vlgmr.msrb.gmra.mxu2 %v10772_v63 }
 0x1a1   :  { %v9926_v39 = vld [vmem:[#allocation3 + $0x954] sm:$0xf]  ;;  %3593 = vmatpush.bf16.msra.mxu2 %v8299_v20  ;;  %3566 = vmatpush.bf16.msrb.mxu1 %v7755_v24  ;;  %v7723_v36 = vor.u32 %v9862_v59, %v7720_v32 }
 0x1a2   :  { %v7976_v33 = vld [vmem:[#allocation3 + $0x970] sm:$0xf0] }
 0x1a3   :  { %v9990_v40 = vld [vmem:[#allocation3 + $0xb54] sm:$0xf]  ;;  %v7979_v51 = vor.u32 %v9926_v39, %v7976_v33  ;;  %3553 = vmatpush.bf16.msrb.mxu3 %v7467_v48 }
 0x1a4   :  { %v8232_v18 = vld [vmem:[#allocation3 + $0xb70] sm:$0xf0] }
 0x1a5   :  { %v9790_v45 = vld [vmem:[#allocation3 + $0x514] sm:$0xf]  ;;  %3594 = vmatpush.bf16.msra.mxu2 %v8267_v34  ;;  %v8235_v2 = vor.u32 %v9990_v40, %v8232_v18  ;;  %3567 = vmatpush.bf16.msrb.mxu1 %v7723_v36 }
 0x1a6   :  { %v7432_v52 = vld [vmem:[#allocation3 + $0x530] sm:$0xf0]  ;;  %3581 = vmatpush.bf16.msrb.mxu0 %v7979_v51 }
 0x1a7   :  { %v9854_v53 = vld [vmem:[#allocation3 + $0x714] sm:$0xf]  ;;  %v7435_v4 = vor.u32 %v9790_v45, %v7432_v52 }
 0x1a8   :  { %v7688_v56 = vld [vmem:[#allocation3 + $0x730] sm:$0xf0] }
 0x1a9   :  { %v9918_v61 = vld [vmem:[#allocation3 + $0x914] sm:$0xf]  ;;  %v7691_v38 = vor.u32 %v9854_v53, %v7688_v56  ;;  %3595 = vmatpush.bf16.msra.mxu2 %v8235_v2  ;;  %3554 = vmatpush.bf16.msrb.mxu3 %v7435_v4 }
 0x1aa   :  { %v7944_v1 = vld [vmem:[#allocation3 + $0x930] sm:$0xf0] }
 0x1ab   :  { %v9982_v9 = vld [vmem:[#allocation3 + $0xb14] sm:$0xf]  ;;  %v7947_v15 = vor.u32 %v9918_v61, %v7944_v1  ;;  %3568 = vmatpush.bf16.msrb.mxu1 %v7691_v38 }
 0x1ac   :  { %v8200_v10 = vld [vmem:[#allocation3 + $0xb30] sm:$0xf0] }
 0x1ad   :  { %v9782_v14 = vld [vmem:[#allocation3 + $0x4d4] sm:$0xf]  ;;  %v8203_v11 = vor.u32 %v9982_v9, %v8200_v10  ;;  %3582 = vmatpush.bf16.msrb.mxu0 %v7947_v15 }
 0x1ae   :  { %v7400_v17 = vld [vmem:[#allocation3 + $0x4f0] sm:$0xf0] }
 0x1af   :  { %v9846_v20 = vld [vmem:[#allocation3 + $0x6d4] sm:$0xf]  ;;  %v7403_v29 = vor.u32 %v9782_v14, %v7400_v17  ;;  %3596 = vmatpush.bf16.msra.mxu2 %v8203_v11 }
 0x1b0   :  { %v7656_v22 = vld [vmem:[#allocation3 + $0x6f0] sm:$0xf0] }
 0x1b1   :  { %v9910_v24 = vld [vmem:[#allocation3 + $0x8d4] sm:$0xf]  ;;  %v7659_v30 = vor.u32 %v9846_v20, %v7656_v22  ;;  %3555 = vmatpush.bf16.msrb.mxu3 %v7403_v29 }
 0x1b2   :  { %v7912_v27 = vld [vmem:[#allocation3 + $0x8f0] sm:$0xf0] }
 0x1b3   :  { %v9974_v31 = vld [vmem:[#allocation3 + $0xad4] sm:$0xf]  ;;  %v7915_v39 = vor.u32 %v9910_v24, %v7912_v27  ;;  %3569 = vmatpush.bf16.msrb.mxu1 %v7659_v30 }
 0x1b4   :  { %v8168_v59 = vld [vmem:[#allocation3 + $0xaf0] sm:$0xf0] }
 0x1b5   :  { %v9774_v32 = vld [vmem:[#allocation3 + $0x494] sm:$0xf]  ;;  %v8171_v18 = vor.u32 %v9974_v31, %v8168_v59  ;;  %3583 = vmatpush.bf16.msrb.mxu0 %v7915_v39  ;;  %v7022_v59 = vld [vmem:[#allocation3 + $0x1d8] sm:$0xf] }
 0x1b6   :  { %v7368_v33 = vld [vmem:[#allocation3 + $0x4b0] sm:$0xf0]  ;;  %v7534_v39 = vld [vmem:[#allocation3 + $0x5d8] sm:$0xf] }
 0x1b7   :  { %v9838_v34 = vld [vmem:[#allocation3 + $0x694] sm:$0xf]  ;;  %v7371_v45 = vor.u32 %v9774_v32, %v7368_v33  ;;  %3597 = vmatpush.bf16.msra.mxu2 %v8171_v18  ;;  %v9691_v32 = vld [vmem:[#allocation3 + $0x1f4] sm:$0xf0] }
 0x1b8   :  { %v7624_v48 = vld [vmem:[#allocation3 + $0x6b0] sm:$0xf0] }
 0x1b9   :  { %v9902_v36 = vld [vmem:[#allocation3 + $0x894] sm:$0xf]  ;;  %v7627_v51 = vor.u32 %v9838_v34, %v7624_v48  ;;  %3556 = vmatpush.bf16.msrb.mxu3 %v7371_v45  ;;  %v9819_v34 = vld [vmem:[#allocation3 + $0x5f4] sm:$0xf0] }
 0x1ba   :  { %v7880_v40 = vld [vmem:[#allocation3 + $0x8b0] sm:$0xf0] }
 0x1bb   :  { %v9966_v52 = vld [vmem:[#allocation3 + $0xa94] sm:$0xf]  ;;  %v7883_v61 = vor.u32 %v9902_v36, %v7880_v40  ;;  %3570 = vmatpush.bf16.msrb.mxu1 %v7627_v51 }
 0x1bc   :  { %v8136_v53 = vld [vmem:[#allocation3 + $0xab0] sm:$0xf0] }
 0x1bd   :  { %v9766_v56 = vld [vmem:[#allocation3 + $0x454] sm:$0xf]  ;;  %v8139_v10 = vor.u32 %v9966_v52, %v8136_v53  ;;  %3584 = vmatpush.bf16.msrb.mxu0 %v7883_v61  ;;  %v7278_v52 = vld [vmem:[#allocation3 + $0x3d8] sm:$0xf] }
 0x1be   :  { %v7336_v1 = vld [vmem:[#allocation3 + $0x470] sm:$0xf0]  ;;  %v9755_v61 = vld [vmem:[#allocation3 + $0x3f4] sm:$0xf0] }
 0x1bf   :  { %v9830_v2 = vld [vmem:[#allocation3 + $0x654] sm:$0xf]  ;;  %v7339_v17 = vor.u32 %v9766_v56, %v7336_v1  ;;  %3598 = vmatpush.bf16.msra.mxu2 %v8139_v10  ;;  %v7023_v56 = vor.u32 %v9691_v32, %v7022_v59  ;;  %v7790_v1 = vld [vmem:[#allocation3 + $0x7d8] sm:$0xf] }
 0x1c0   :  { %v7592_v4 = vld [vmem:[#allocation3 + $0x670] sm:$0xf0]  ;;  %v9683_v10 = vld [vmem:[#allocation3 + $0x1b4] sm:$0xf0] }
 0x1c1   :  { %v9894_v38 = vld [vmem:[#allocation3 + $0x854] sm:$0xf]  ;;  %v7595_v20 = vor.u32 %v9830_v2, %v7592_v4  ;;  %3557 = vmatpush.bf16.msrb.mxu3 %v7339_v17  ;;  %v9883_v2 = vld [vmem:[#allocation3 + $0x7f4] sm:$0xf0]  ;;  %v7535_v4 = vor.u32 %v9819_v34, %v7534_v39 }
 0x1c2   :  { %v7848_v9 = vld [vmem:[#allocation3 + $0x870] sm:$0xf0]  ;;  %v9811_v17 = vld [vmem:[#allocation3 + $0x5b4] sm:$0xf0] }
 0x1c3   :  { %v9958_v14 = vld [vmem:[#allocation3 + $0xa54] sm:$0xf]  ;;  %v7851_v11 = vor.u32 %v9894_v38, %v7848_v9  ;;  %3571 = vmatpush.bf16.msrb.mxu1 %v7595_v20  ;;  %v6990_v9 = vld [vmem:[#allocation3 + $0x198] sm:$0xf]  ;;  %v7279_v20 = vor.u32 %v9755_v61, %v7278_v52 }
 0x1c4   :  { %v8104_v15 = vld [vmem:[#allocation3 + $0xa70] sm:$0xf0]  ;;  %v6958_v59 = vld [vmem:[#allocation3 + $0x158] sm:$0xf] }
 0x1c5   :  { %v9758_v22 = vld [vmem:[#allocation3 + $0x414] sm:$0xf]  ;;  %v8107_v33 = vor.u32 %v9958_v14, %v8104_v15  ;;  %3585 = vmatpush.bf16.msrb.mxu0 %v7851_v11  ;;  %v7502_v15 = vld [vmem:[#allocation3 + $0x598] sm:$0xf] }
 0x1c6   :  { %v7304_v24 = vld [vmem:[#allocation3 + $0x430] sm:$0xf0]  ;;  %v9747_v11 = vld [vmem:[#allocation3 + $0x3b4] sm:$0xf0] }
 0x1c7   :  { %v9822_v27 = vld [vmem:[#allocation3 + $0x614] sm:$0xf]  ;;  %v7307_v40 = vor.u32 %v9758_v22, %v7304_v24  ;;  %3599 = vmatpush.bf16.msra.mxu2 %v8107_v33  ;;  %v7791_v22 = vor.u32 %v9883_v2, %v7790_v1  ;;  %v7246_v24 = vld [vmem:[#allocation3 + $0x398] sm:$0xf] }
 0x1c8   :  { %v7560_v29 = vld [vmem:[#allocation3 + $0x630] sm:$0xf0]  ;;  %v9675_v32 = vld [vmem:[#allocation3 + $0x174] sm:$0xf0]  ;;  %v7247_v34 = vor.u32 %v9747_v11, %v7246_v24 }
 0x1c9   :  { %v9886_v30 = vld [vmem:[#allocation3 + $0x814] sm:$0xf]  ;;  %v7563_v18 = vor.u32 %v9822_v27, %v7560_v29  ;;  %3558 = vmatpush.bf16.msrb.mxu3 %v7307_v40  ;;  %v6991_v27 = vor.u32 %v9683_v10, %v6990_v9  ;;  %v7758_v29 = vld [vmem:[#allocation3 + $0x798] sm:$0xf]  ;;  %v6959_v40 = vor.u32 %v9675_v32, %v6958_v59 }
 0x1ca   :  { %v7816_v31 = vld [vmem:[#allocation3 + $0x830] sm:$0xf0]  ;;  %v7470_v39 = vld [vmem:[#allocation3 + $0x558] sm:$0xf] }
 0x1cb   :  { %v10014_v48 = vld [vmem:[#allocation3 + $0xc14] sm:$0xf]  ;;  %v7819_v53 = vor.u32 %v9886_v30, %v7816_v31  ;;  %3572 = vmatpush.bf16.msrb.mxu1 %v7563_v18  ;;  %v9875_v30 = vld [vmem:[#allocation3 + $0x7b4] sm:$0xf0]  ;;  %v7503_v31 = vor.u32 %v9811_v17, %v7502_v15 }
 0x1cc   :  { %v8328_v36 = vld [vmem:[#allocation3 + $0xc30] sm:$0xf0]  ;;  %3559 = vmatmul.bf16.vlgmr.msrb.gmra.mxu3 %v10770_v58  ;;  %v9803_v33 = vld [vmem:[#allocation3 + $0x574] sm:$0xf0] }
 0x1cd   :  { %v9950_v45 = vld [vmem:[#allocation3 + $0xa14] sm:$0xf]  ;;  %v8331_v38 = vor.u32 %v10014_v48, %v8328_v36  ;;  %3586 = vmatpush.bf16.msrb.mxu0 %v7819_v53  ;;  %v7759_v48 = vor.u32 %v9875_v30, %v7758_v29  ;;  %v7214_v36 = vld [vmem:[#allocation3 + $0x358] sm:$0xf]  ;;  %v7471_v52 = vor.u32 %v9803_v33, %v7470_v39 }
 0x1ce   :  { %v8072_v51 = vld [vmem:[#allocation3 + $0xa30] sm:$0xf0]  ;;  %v9739_v18 = vld [vmem:[#allocation3 + $0x374] sm:$0xf0]  ;;  %3573 = vmatmul.bf16.vlgmr.msrb.gmra.mxu1 %v10774_v3 }
 0x1cf   :  { %v8075_v14 = vor.u32 %v9950_v45, %v8072_v51  ;;  %3621 = vmatpush.bf16.msra.mxu1 %v7023_v56  ;;  %3614 = vmatpush.bf16.msra.mxu3 %v8331_v38  ;;  %v7726_v45 = vld [vmem:[#allocation3 + $0x758] sm:$0xf]  ;;  %v7215_v2 = vor.u32 %v9739_v18, %v7214_v36 }
 0x1d0   :  { %v9867_v51 = vld [vmem:[#allocation3 + $0x774] sm:$0xf0]  ;;  %3587 = vmatmul.bf16.vlgmr.msrb.gmra.mxu0 %v10802_v43 }
 0x1d1   :  { %3649 = vmatpush.bf16.msra.mxu0 %v7535_v4  ;;  %3600 = vmatpush.bf16.msra.mxu2 %v8075_v14  ;;  %v6926_v53 = vld [vmem:[#allocation3 + $0x118] sm:$0xf]  ;;  %v7727_v4 = vor.u32 %v9867_v51, %v7726_v45 }
 0x1d2   :  { %v9667_v56 = vld [vmem:[#allocation3 + $0x134] sm:$0xf0] }
 0x1d3   :  { %3635 = vmatpush.bf16.msrb.mxu3 %v7279_v20  ;;  %3622 = vmatpush.bf16.msra.mxu1 %v6991_v27  ;;  %v7438_v61 = vld [vmem:[#allocation3 + $0x518] sm:$0xf]  ;;  %v6927_v9 = vor.u32 %v9667_v56, %v6926_v53 }
 0x1d4   :  { %3601 = vmatmul.bf16.vlgmr.msra.gmra.mxu2 %v10804_v8  ;;  %v9795_v1 = vld [vmem:[#allocation3 + $0x534] sm:$0xf0] }
 0x1d5   :  { %3663 = vmatpush.bf16.msrb.mxu2 %v7791_v22  ;;  %3650 = vmatpush.bf16.msra.mxu0 %v7503_v31  ;;  %v7182_v38 = vld [vmem:[#allocation3 + $0x318] sm:$0xf]  ;;  %v7439_v17 = vor.u32 %v9795_v1, %v7438_v61  ;;  %v10916_v1 = vpop.f32.mrf.mxu1 }
 0x1d6   :  { %v9731_v10 = vld [vmem:[#allocation3 + $0x334] sm:$0xf0] }
 0x1d7   :  { %3636 = vmatpush.bf16.msrb.mxu3 %v7247_v34  ;;  %3623 = vmatpush.bf16.msra.mxu1 %v6959_v40  ;;  %v7694_v14 = vld [vmem:[#allocation3 + $0x718] sm:$0xf]  ;;  %v7183_v11 = vor.u32 %v9731_v10, %v7182_v38 }
 0x1d8   :  { %v9859_v15 = vld [vmem:[#allocation3 + $0x734] sm:$0xf0] }
 0x1d9   :  { %3664 = vmatpush.bf16.msrb.mxu2 %v7759_v48  ;;  %3651 = vmatpush.bf16.msra.mxu0 %v7471_v52  ;;  %v6894_v20 = vld [vmem:[#allocation3 + $0xd8] sm:$0xf]  ;;  %v7695_v29 = vor.u32 %v9859_v15, %v7694_v14  ;;  %v10920_v14 = vpop.f32.mrf.mxu0 }
 0x1da   :  { %v9659_v22 = vld [vmem:[#allocation3 + $0xf4] sm:$0xf0] }
 0x1db   :  { %v7406_v24 = vld [vmem:[#allocation3 + $0x4d8] sm:$0xf]  ;;  %3637 = vmatpush.bf16.msrb.mxu3 %v7215_v2  ;;  %3624 = vmatpush.bf16.msra.mxu1 %v6927_v9  ;;  %v6895_v31 = vor.u32 %v9659_v22, %v6894_v20 }
 0x1dc   :  { %v9787_v27 = vld [vmem:[#allocation3 + $0x4f4] sm:$0xf0]  ;;  %8345 = vmatmul.msk.bf16.vlgmr.msra.gmra.mxu3 %vm3029_vm0, %v10786_v49 }
 0x1dd   :  { %3665 = vmatpush.bf16.msrb.mxu2 %v7727_v4  ;;  %v7150_v30 = vld [vmem:[#allocation3 + $0x2d8] sm:$0xf]  ;;  %3652 = vmatpush.bf16.msra.mxu0 %v7439_v17  ;;  %v7407_v33 = vor.u32 %v9787_v27, %v7406_v24 }
 0x1de   :  { %v9723_v59 = vld [vmem:[#allocation3 + $0x2f4] sm:$0xf0] }
 0x1df   :  { %v7662_v32 = vld [vmem:[#allocation3 + $0x6d8] sm:$0xf]  ;;  %3638 = vmatpush.bf16.msrb.mxu3 %v7183_v11  ;;  %v7151_v18 = vor.u32 %v9723_v59, %v7150_v30  ;;  %3625 = vmatpush.bf16.msra.mxu1 %v6895_v31 }
 0x1e0   :  { %v9851_v39 = vld [vmem:[#allocation3 + $0x6f4] sm:$0xf0] }
 0x1e1   :  { %v6862_v34 = vld [vmem:[#allocation3 + $0x98] sm:$0xf]  ;;  %3666 = vmatpush.bf16.msrb.mxu2 %v7695_v29  ;;  %v7663_v45 = vor.u32 %v9851_v39, %v7662_v32  ;;  %3653 = vmatpush.bf16.msra.mxu0 %v7407_v33 }
 0x1e2   :  { %v9651_v48 = vld [vmem:[#allocation3 + $0xb4] sm:$0xf0] }
 0x1e3   :  { %v7374_v36 = vld [vmem:[#allocation3 + $0x498] sm:$0xf]  ;;  %v6863_v52 = vor.u32 %v9651_v48, %v6862_v34  ;;  %3639 = vmatpush.bf16.msrb.mxu3 %v7151_v18  ;;  %v10922_v34 = vpop.f32.mrf.mxu2 }
 0x1e4   :  { %v9779_v40 = vld [vmem:[#allocation3 + $0x4b4] sm:$0xf0] }
 0x1e5   :  { %v7118_v51 = vld [vmem:[#allocation3 + $0x298] sm:$0xf]  ;;  %v7375_v2 = vor.u32 %v9779_v40, %v7374_v36  ;;  %3667 = vmatpush.bf16.msrb.mxu2 %v7663_v45  ;;  %3626 = vmatpush.bf16.msra.mxu1 %v6863_v52 }
 0x1e6   :  { %v9715_v53 = vld [vmem:[#allocation3 + $0x2b4] sm:$0xf0] }
 0x1e7   :  { %v7630_v56 = vld [vmem:[#allocation3 + $0x698] sm:$0xf]  ;;  %v7119_v15 = vor.u32 %v9715_v53, %v7118_v51  ;;  %3654 = vmatpush.bf16.msra.mxu0 %v7375_v2 }
 0x1e8   :  { %v9843_v61 = vld [vmem:[#allocation3 + $0x6b4] sm:$0xf0] }
 0x1e9   :  { %v6830_v4 = vld [vmem:[#allocation3 + $0x58] sm:$0xf]  ;;  %v7631_v17 = vor.u32 %v9843_v61, %v7630_v56  ;;  %3640 = vmatpush.bf16.msrb.mxu3 %v7119_v15  ;;  %v10924_v56 = vpop.f32.mrf.mxu1  ;;  %v9687_v15 = vld [vmem:[#allocation3 + $0x1dc] sm:$0xf] }
 0x1ea   :  { %v9643_v38 = vld [vmem:[#allocation3 + $0x74] sm:$0xf0] }
 0x1eb   :  { %v7342_v9 = vld [vmem:[#allocation3 + $0x458] sm:$0xf]  ;;  %v6831_v22 = vor.u32 %v9643_v38, %v6830_v4  ;;  %3668 = vmatpush.bf16.msrb.mxu2 %v7631_v17  ;;  %v7024_v17 = vld [vmem:[#allocation3 + $0x1f8] sm:$0xf0] }
 0x1ec   :  { %v9771_v10 = vld [vmem:[#allocation3 + $0x474] sm:$0xf0] }
 0x1ed   :  { %v7086_v20 = vld [vmem:[#allocation3 + $0x258] sm:$0xf]  ;;  %v7343_v29 = vor.u32 %v9771_v10, %v7342_v9  ;;  %3627 = vmatpush.bf16.msra.mxu1 %v6831_v22 }
 0x1ee   :  { %v9707_v24 = vld [vmem:[#allocation3 + $0x274] sm:$0xf0] }
 0x1ef   :  { %v7598_v27 = vld [vmem:[#allocation3 + $0x658] sm:$0xf]  ;;  %v7087_v48 = vor.u32 %v9707_v24, %v7086_v20  ;;  %3655 = vmatpush.bf16.msra.mxu0 %v7343_v29  ;;  %v9751_v20 = vld [vmem:[#allocation3 + $0x3dc] sm:$0xf]  ;;  %v10926_v24 = vpop.f32.mrf.mxu0 }
 0x1f0   :  { %v9835_v11 = vld [vmem:[#allocation3 + $0x674] sm:$0xf0] }
 0x1f1   :  { %v6798_v30 = vld [vmem:[#allocation3 + $0x18] sm:$0xf]  ;;  %v7599_v36 = vor.u32 %v9835_v11, %v7598_v27  ;;  %3641 = vmatpush.bf16.msrb.mxu3 %v7087_v48  ;;  %v7280_v27 = vld [vmem:[#allocation3 + $0x3f8] sm:$0xf0]  ;;  %v10928_v48 = vpop.f32.mrf.mxu2 }
 0x1f2   :  { %v9635_v31 = vld [vmem:[#allocation3 + $0x34] sm:$0xf0] }
 0x1f3   :  { %v7310_v59 = vld [vmem:[#allocation3 + $0x418] sm:$0xf]  ;;  %v6799_v45 = vor.u32 %v9635_v31, %v6798_v30  ;;  %3669 = vmatpush.bf16.msrb.mxu2 %v7599_v36  ;;  %v7248_v36 = vld [vmem:[#allocation3 + $0x3b8] sm:$0xf0] }
 0x1f4   :  { %v9763_v32 = vld [vmem:[#allocation3 + $0x434] sm:$0xf0] }
 0x1f5   :  { %v8046_v39 = vld [vmem:[#allocation3 + $0x9d8] sm:$0xf]  ;;  %v7311_v61 = vor.u32 %v9763_v32, %v7310_v59  ;;  %3628 = vmatpush.bf16.msra.mxu1 %v6799_v45  ;;  %v7027_v59 = vor.u32 %v9687_v15, %v7024_v17  ;;  %v6960_v15 = vld [vmem:[#allocation3 + $0x178] sm:$0xf0] }
 0x1f6   :  { %v9947_v33 = vld [vmem:[#allocation3 + $0x9f4] sm:$0xf0]  ;;  %v9735_v17 = vld [vmem:[#allocation3 + $0x35c] sm:$0xf] }
 0x1f7   :  { %v8334_v40 = vld [vmem:[#allocation3 + $0xc18] sm:$0xf]  ;;  %v8047_v2 = vor.u32 %v9947_v33, %v8046_v39  ;;  %3656 = vmatpush.bf16.msra.mxu0 %v7311_v61  ;;  %v7283_v33 = vor.u32 %v9751_v20, %v7280_v27  ;;  %v10934_v20 = vpop.f32.mrf.mxu1 }
 0x1f8   :  { %v10019_v18 = vld [vmem:[#allocation3 + $0xc34] sm:$0xf0]  ;;  %3629 = vmatmul.bf16.vlgmr.msra.gmra.mxu1 %v10768_v57 }
 0x1f9   :  { %v7054_v51 = vld [vmem:[#allocation3 + $0x218] sm:$0xf]  ;;  %v8335_v10 = vor.u32 %v10019_v18, %v8334_v40  ;;  %3677 = vmatpush.bf16.msrb.mxu1 %v8047_v2  ;;  %v9679_v18 = vld [vmem:[#allocation3 + $0x19c] sm:$0xf] }
 0x1fa   :  { %v9699_v52 = vld [vmem:[#allocation3 + $0x234] sm:$0xf0]  ;;  %3657 = vmatmul.bf16.vlgmr.msra.gmra.mxu0 %v10770_v58  ;;  %v6995_v61 = vor.u32 %v9679_v18, %v6992_v0  ;;  %v7184_v18 = vld [vmem:[#allocation3 + $0x338] sm:$0xf0] }
 0x1fb   :  { %v7566_v53 = vld [vmem:[#allocation3 + $0x618] sm:$0xf]  ;;  %v7055_v22 = vor.u32 %v9699_v52, %v7054_v51  ;;  %3712 = vmatpush.bf16.msrb.mxu0 %v8335_v10  ;;  %v10932_v52 = vpop.f32.mrf.mxu3  ;;  %v9671_v10 = vld [vmem:[#allocation3 + $0x15c] sm:$0xf] }
 0x1fc   :  { %v9827_v4 = vld [vmem:[#allocation3 + $0x634] sm:$0xf0]  ;;  %11261 = vst [vmem:[#allocation31_spill] sm:$0xff] %v10932_v52  ;;  %v7056_v52 = vld [vmem:[#allocation3 + $0x238] sm:$0xf0] }
 0x1fd   :  { %v8302_v38 = vld [vmem:[#allocation3 + $0xbd8] sm:$0xf]  ;;  %v7567_v31 = vor.u32 %v9827_v4, %v7566_v53  ;;  %3642 = vmatpush.bf16.msrb.mxu3 %v7055_v22  ;;  %v7216_v22 = vld [vmem:[#allocation3 + $0x378] sm:$0xf0] }
 0x1fe   :  { %v10011_v9 = vld [vmem:[#allocation3 + $0xbf4] sm:$0xf0] }
 0x1ff   :  { %v8014_v11 = vld [vmem:[#allocation3 + $0x998] sm:$0xf]  ;;  %v8303_v29 = vor.u32 %v10011_v9, %v8302_v38  ;;  %3670 = vmatpush.bf16.msrb.mxu2 %v7567_v31  ;;  %3733 = vmatpush.bf16.msra.mxu0 %v7283_v33  ;;  %v7251_v38 = vor.u32 %v9743_v47, %v7248_v36  ;;  %v6963_v31 = vor.u32 %v9671_v10, %v6960_v15  ;;  %v6928_v33 = vld [vmem:[#allocation3 + $0x138] sm:$0xf0] }
 0x200   :  { %v9939_v30 = vld [vmem:[#allocation3 + $0x9b4] sm:$0xf0]  ;;  %3643 = vmatmul.bf16.vlgmr.msrb.gmra.mxu3 %v10772_v63  ;;  %v9655_v10 = vld [vmem:[#allocation3 + $0xdc] sm:$0xf] }
 0x201   :  { %v8270_v32 = vld [vmem:[#allocation3 + $0xb98] sm:$0xf]  ;;  %v8015_v40 = vor.u32 %v9939_v30, %v8014_v11  ;;  %3691 = vmatpush.bf16.msra.mxu3 %v8303_v29  ;;  %v10938_v30 = vpop.f32.mrf.mxu0  ;;  %v6896_v15 = vld [vmem:[#allocation3 + $0xf8] sm:$0xf0] }
 0x202   :  { %v10003_v39 = vld [vmem:[#allocation3 + $0xbb4] sm:$0xf0]  ;;  %3671 = vmatmul.bf16.vlgmr.msrb.gmra.mxu2 %v10774_v3 }
 0x203   :  { %v7982_v45 = vld [vmem:[#allocation3 + $0x958] sm:$0xf]  ;;  %3719 = vmatpush.bf16.msra.mxu2 %v7027_v59  ;;  %v8271_v53 = vor.u32 %v10003_v39, %v8270_v32  ;;  %3678 = vmatpush.bf16.msrb.mxu1 %v8015_v40  ;;  %v7219_v59 = vor.u32 %v9735_v17, %v7216_v22  ;;  %v9663_v39 = vld [vmem:[#allocation3 + $0x11c] sm:$0xf]  ;;  %v10942_v22 = vpop.f32.mrf.mxu3 }
 0x204   :  { %v9931_v51 = vld [vmem:[#allocation3 + $0x974] sm:$0xf0]  ;;  %3734 = vmatpush.bf16.msra.mxu0 %v7251_v38  ;;  %v9727_v40 = vld [vmem:[#allocation3 + $0x31c] sm:$0xf] }
 0x205   :  { %v8238_v2 = vld [vmem:[#allocation3 + $0xb58] sm:$0xf]  ;;  %v7983_v9 = vor.u32 %v9931_v51, %v7982_v45  ;;  %3692 = vmatpush.bf16.msra.mxu3 %v8271_v53  ;;  %v10940_v51 = vpop.f32.mrf.mxu2  ;;  %v7187_v38 = vor.u32 %v9727_v40, %v7184_v18  ;;  %v9719_v17 = vld [vmem:[#allocation3 + $0x2dc] sm:$0xf] }
 0x206   :  { %v9995_v4 = vld [vmem:[#allocation3 + $0xb74] sm:$0xf0]  ;;  %11262 = vst [vmem:[#allocation32_spill] sm:$0xff] %v10940_v51  ;;  %v6864_v40 = vld [vmem:[#allocation3 + $0xb8] sm:$0xf0] }
 0x207   :  { %v7950_v27 = vld [vmem:[#allocation3 + $0x918] sm:$0xf]  ;;  %3720 = vmatpush.bf16.msra.mxu2 %v6995_v61  ;;  %v8239_v0 = vor.u32 %v9995_v4, %v8238_v2  ;;  %3679 = vmatpush.bf16.msrb.mxu1 %v7983_v9  ;;  %v6931_v61 = vor.u32 %v9663_v39, %v6928_v33  ;;  %v7887_v39 = vor.u32 %v9907_v16, %v7886_v60  ;;  %v9647_v33 = vld [vmem:[#allocation3 + $0x9c] sm:$0xf] }
 0x208   :  { %v9923_v11 = vld [vmem:[#allocation3 + $0x934] sm:$0xf0]  ;;  %3735 = vmatpush.bf16.msra.mxu0 %v7219_v59  ;;  %v9711_v18 = vld [vmem:[#allocation3 + $0x29c] sm:$0xf] }
 0x209   :  { %v8206_v47 = vld [vmem:[#allocation3 + $0xb18] sm:$0xf]  ;;  %v7951_v32 = vor.u32 %v9923_v11, %v7950_v27  ;;  %3693 = vmatpush.bf16.msra.mxu3 %v8239_v0  ;;  %v10944_v27 = vpop.f32.mrf.mxu1  ;;  %v7152_v11 = vld [vmem:[#allocation3 + $0x2f8] sm:$0xf0]  ;;  %v10946_v0 = vpop.f32.mrf.mxu0 }
 0x20a   :  { %v9987_v29 = vld [vmem:[#allocation3 + $0xb34] sm:$0xf0]  ;;  %11263 = vst [vmem:[#allocation33_spill] sm:$0xff] %v10944_v27  ;;  %8346 = vmatmul.msk.bf16.vlgmr.msrb.gmra.mxu0 %vm3029_vm0, %v10786_v49  ;;  %v7536_v49 = vld [vmem:[#allocation3 + $0x5f8] sm:$0xf0] }
 0x20b   :  { %v7918_v36 = vld [vmem:[#allocation3 + $0x8d8] sm:$0xf]  ;;  %3721 = vmatpush.bf16.msra.mxu2 %v6963_v31  ;;  %v8207_v53 = vor.u32 %v9987_v29, %v8206_v47  ;;  %3680 = vmatpush.bf16.msrb.mxu1 %v7951_v32  ;;  %11264 = vst [vmem:[#allocation34_spill] sm:$0xff] %v10946_v0  ;;  %v6899_v47 = vor.u32 %v9655_v10, %v6896_v15  ;;  %v9703_v10 = vld [vmem:[#allocation3 + $0x25c] sm:$0xf]  ;;  %v10952_v0 = vpop.f32.mrf.mxu3 }
 0x20c   :  { %v9915_v45 = vld [vmem:[#allocation3 + $0x8f4] sm:$0xf0]  ;;  %3736 = vmatpush.bf16.msra.mxu0 %v7187_v38  ;;  %v7155_v32 = vor.u32 %v9719_v17, %v7152_v11  ;;  %v9639_v38 = vld [vmem:[#allocation3 + $0x5c] sm:$0xf] }
 0x20d   :  { %v8174_v2 = vld [vmem:[#allocation3 + $0xad8] sm:$0xf]  ;;  %v7919_v9 = vor.u32 %v9915_v45, %v7918_v36  ;;  %3694 = vmatpush.bf16.msra.mxu3 %v8207_v53  ;;  %v7120_v36 = vld [vmem:[#allocation3 + $0x2b8] sm:$0xf0]  ;;  %v10950_v23 = vpop.f32.mrf.mxu2 }
 0x20e   :  { %v9979_v4 = vld [vmem:[#allocation3 + $0xaf4] sm:$0xf0]  ;;  %v7123_v60 = vor.u32 %v9711_v18, %v7120_v36  ;;  %v7088_v15 = vld [vmem:[#allocation3 + $0x278] sm:$0xf0] }
 0x20f   :  { %3722 = vmatpush.bf16.msra.mxu2 %v6931_v61  ;;  %v8175_v31 = vor.u32 %v9979_v4, %v8174_v2  ;;  %v8142_v29 = vld [vmem:[#allocation3 + $0xa98] sm:$0xf]  ;;  %3681 = vmatpush.bf16.msrb.mxu1 %v7919_v9  ;;  %v6867_v61 = vor.u32 %v9647_v33, %v6864_v40  ;;  %v6832_v9 = vld [vmem:[#allocation3 + $0x78] sm:$0xf0] }
 0x210   :  { %v9971_v59 = vld [vmem:[#allocation3 + $0xab4] sm:$0xf0]  ;;  %3737 = vmatpush.bf16.msra.mxu0 %v7155_v32  ;;  %v9631_v33 = vld [vmem:[#allocation3 + $0x1c] sm:$0xf] }
 0x211   :  { %v7854_v45 = vld [vmem:[#allocation3 + $0x858] sm:$0xf]  ;;  %3695 = vmatpush.bf16.msra.mxu3 %v8175_v31  ;;  %v8143_v53 = vor.u32 %v9971_v59, %v8142_v29  ;;  %v10954_v31 = vpop.f32.mrf.mxu1  ;;  %v6835_v29 = vor.u32 %v9639_v38, %v6832_v9  ;;  %v6800_v40 = vld [vmem:[#allocation3 + $0x38] sm:$0xf0]  ;;  %v10956_v36 = vpop.f32.mrf.mxu0 }
 0x212   :  { %v8110_v2 = vld [vmem:[#allocation3 + $0xa58] sm:$0xf]  ;;  %v7855_v16 = vor.u32 %v9899_v26, %v7854_v45  ;;  %11265 = vst [vmem:[#allocation35_spill] sm:$0xff] %v10954_v31  ;;  %v7091_v26 = vor.u32 %v9703_v10, %v7088_v15  ;;  %v9695_v18 = vld [vmem:[#allocation3 + $0x21c] sm:$0xf]  ;;  %v7539_v45 = vor.u32 %v9815_v13, %v7536_v49  ;;  %v6803_v38 = vor.u32 %v9631_v33, %v6800_v40 }
 0x213   :  { %3723 = vmatpush.bf16.msra.mxu2 %v6899_v47  ;;  %v9963_v4 = vld [vmem:[#allocation3 + $0xa74] sm:$0xf0]  ;;  %3682 = vmatpush.bf16.msrb.mxu1 %v7887_v39  ;;  %11266 = vst [vmem:[#allocation36_spill] sm:$0xff] %v10956_v36  ;;  %v9879_v27 = vld [vmem:[#allocation3 + $0x7dc] sm:$0xf]  ;;  %v7059_v9 = vor.u32 %v9695_v18, %v7056_v52 }
 0x214   :  { %v7822_v17 = vld [vmem:[#allocation3 + $0x818] sm:$0xf]  ;;  %v8111_v47 = vor.u32 %v9963_v4, %v8110_v2  ;;  %3738 = vmatpush.bf16.msra.mxu0 %v7123_v60  ;;  %v7792_v51 = vld [vmem:[#allocation3 + $0x7f8] sm:$0xf0] }
 0x215   :  { %v9891_v11 = vld [vmem:[#allocation3 + $0x834] sm:$0xf0]  ;;  %3696 = vmatpush.bf16.msra.mxu3 %v8143_v53  ;;  %v9943_v31 = vld [vmem:[#allocation3 + $0x9dc] sm:$0xf]  ;;  %v10958_v10 = vpop.f32.mrf.mxu2  ;;  %v7795_v49 = vor.u32 %v9879_v27, %v7792_v51 }
 0x216   :  { %v8078_v59 = vld [vmem:[#allocation3 + $0xa18] sm:$0xf]  ;;  %v7823_v39 = vor.u32 %v9891_v11, %v7822_v17  ;;  %v8048_v53 = vld [vmem:[#allocation3 + $0x9f8] sm:$0xf0] }
 0x217   :  { %3724 = vmatpush.bf16.msra.mxu2 %v6867_v61  ;;  %v9955_v32 = vld [vmem:[#allocation3 + $0xa34] sm:$0xf0]  ;;  %3683 = vmatpush.bf16.msrb.mxu1 %v7855_v16  ;;  %v10007_v61 = vld [vmem:[#allocation3 + $0xbdc] sm:$0xf]  ;;  %v8051_v13 = vor.u32 %v9943_v31, %v8048_v53 }
 0x218   :  { %v8079_v2 = vor.u32 %v9955_v32, %v8078_v59  ;;  %v8304_v4 = vld [vmem:[#allocation3 + $0xbf8] sm:$0xf0]  ;;  %3739 = vmatpush.bf16.msra.mxu0 %v7091_v26  ;;  %v10960_v59 = vpop.f32.mrf.mxu3 }
 0x219   :  { %3697 = vmatpush.bf16.msra.mxu3 %v8111_v47  ;;  %v9807_v60 = vld [vmem:[#allocation3 + $0x59c] sm:$0xf]  ;;  %v8307_v11 = vor.u32 %v10007_v61, %v8304_v4  ;;  %v10962_v32 = vpop.f32.mrf.mxu1  ;;  %v10965_v4 = vpop.f32.mrf.mxu0 }
 0x21a   :  { %v7504_v16 = vld [vmem:[#allocation3 + $0x5b8] sm:$0xf0] }
 0x21b   :  { %3725 = vmatpush.bf16.msra.mxu2 %v6835_v29  ;;  %3684 = vmatpush.bf16.msrb.mxu1 %v7823_v39  ;;  %v9871_v15 = vld [vmem:[#allocation3 + $0x79c] sm:$0xf]  ;;  %v7507_v36 = vor.u32 %v9807_v60, %v7504_v16 }
 0x21c   :  { %v7760_v17 = vld [vmem:[#allocation3 + $0x7b8] sm:$0xf0]  ;;  %3740 = vmatpush.bf16.msra.mxu0 %v7059_v9 }
 0x21d   :  { %v8016_v47 = vld [vmem:[#allocation3 + $0x9b8] sm:$0xf0]  ;;  %3698 = vmatpush.bf16.msra.mxu3 %v8079_v2  ;;  %v7763_v51 = vor.u32 %v9871_v15, %v7760_v17 }
 0x21e   :  { %v9999_v29 = vld [vmem:[#allocation3 + $0xb9c] sm:$0xf]  ;;  %3685 = vmatmul.bf16.vlgmr.msrb.gmra.mxu1 %v10802_v43  ;;  %v8019_v27 = vor.u32 %v9935_v19, %v8016_v47  ;;  %v10970_v19 = vpop.f32.mrf.mxu2 }
 0x21f   :  { %3747 = vmatpush.bf16.msra.mxu1 %v7539_v45  ;;  %v8272_v52 = vld [vmem:[#allocation3 + $0xbb8] sm:$0xf0]  ;;  %3726 = vmatpush.bf16.msra.mxu2 %v6803_v38 }
 0x220   :  { %v9799_v26 = vld [vmem:[#allocation3 + $0x55c] sm:$0xf]  ;;  %3789 = vmatpush.bf16.msrb.mxu0 %v8307_v11  ;;  %v8275_v40 = vor.u32 %v9999_v29, %v8272_v52  ;;  %3699 = vmatmul.bf16.vlgmr.msra.gmra.mxu3 %v10804_v8 }
 0x221   :  { %v7472_v39 = vld [vmem:[#allocation3 + $0x578] sm:$0xf0]  ;;  %3761 = vmatpush.bf16.msrb.mxu3 %v7795_v49  ;;  %3741 = vmatmul.bf16.vlgmr.msra.gmra.mxu0 %v10772_v63  ;;  %v3045_v63 = vadd.f32 %v10863_v54, %v10828_v46 }
 0x222   :  { %v9863_v31 = vld [vmem:[#allocation3 + $0x75c] sm:$0xf]  ;;  %v7475_v18 = vor.u32 %v9799_v26, %v7472_v39  ;;  %3727 = vmatmul.bf16.vlgmr.msra.gmra.mxu2 %v10768_v57  ;;  %v10974_v26 = vpop.f32.mrf.mxu3  ;;  %v10976_v39 = vpop.f32.mrf.mxu1 }
 0x223   :  { %3775 = vmatpush.bf16.msrb.mxu2 %v8051_v13  ;;  %v7728_v33 = vld [vmem:[#allocation3 + $0x778] sm:$0xf0]  ;;  %3748 = vmatpush.bf16.msra.mxu1 %v7507_v36  ;;  %v3059_v54 = vadd.f32 %v10868_v5, %v3045_v63 }
 0x224   :  { %v9927_v45 = vld [vmem:[#allocation3 + $0x95c] sm:$0xf]  ;;  %v7731_v36 = vor.u32 %v9863_v31, %v7728_v33  ;;  %3790 = vmatpush.bf16.msrb.mxu0 %v8275_v40 }
 0x225   :  { %v7984_v53 = vld [vmem:[#allocation3 + $0x978] sm:$0xf0]  ;;  %3762 = vmatpush.bf16.msrb.mxu3 %v7763_v51 }
 0x226   :  { %v9991_v61 = vld [vmem:[#allocation3 + $0xb5c] sm:$0xf]  ;;  %v7987_v38 = vor.u32 %v9927_v45, %v7984_v53 }
 0x227   :  { %v8240_v2 = vld [vmem:[#allocation3 + $0xb78] sm:$0xf0]  ;;  %3776 = vmatpush.bf16.msrb.mxu2 %v8019_v27  ;;  %3749 = vmatpush.bf16.msra.mxu1 %v7475_v18 }
 0x228   :  { %v9791_v60 = vld [vmem:[#allocation3 + $0x51c] sm:$0xf]  ;;  %v8243_v13 = vor.u32 %v9991_v61, %v8240_v2 }
 0x229   :  { %v7440_v16 = vld [vmem:[#allocation3 + $0x538] sm:$0xf0]  ;;  %3763 = vmatpush.bf16.msrb.mxu3 %v7731_v36 }
 0x22a   :  { %v9855_v9 = vld [vmem:[#allocation3 + $0x71c] sm:$0xf]  ;;  %v7443_v15 = vor.u32 %v9791_v60, %v7440_v16  ;;  %3791 = vmatpush.bf16.msrb.mxu0 %v8243_v13  ;;  %v10979_v16 = vpop.f32.mrf.mxu0  ;;  %v3073_v13 = vadd.f32 %v10861_v7, %v3059_v54 }
 0x22b   :  { %v7696_v49 = vld [vmem:[#allocation3 + $0x738] sm:$0xf0]  ;;  %3777 = vmatpush.bf16.msrb.mxu2 %v7987_v38 }
 0x22c   :  { %v9919_v17 = vld [vmem:[#allocation3 + $0x91c] sm:$0xf]  ;;  %v7699_v51 = vor.u32 %v9855_v9, %v7696_v49  ;;  %3750 = vmatpush.bf16.msra.mxu1 %v7443_v15 }
 0x22d   :  { %v7952_v11 = vld [vmem:[#allocation3 + $0x938] sm:$0xf0] }
 0x22e   :  { %v9983_v57 = vld [vmem:[#allocation3 + $0xb1c] sm:$0xf]  ;;  %v7955_v27 = vor.u32 %v9919_v17, %v7952_v11  ;;  %3764 = vmatpush.bf16.msrb.mxu3 %v7699_v51  ;;  %v3143_v51 = vadd.f32 %v10893_v25, %v10830_v55 }
 0x22f   :  { %v8208_v47 = vld [vmem:[#allocation3 + $0xb38] sm:$0xf0] }
 0x230   :  { %v9783_v29 = vld [vmem:[#allocation3 + $0x4dc] sm:$0xf]  ;;  %v8211_v40 = vor.u32 %v9983_v57, %v8208_v47  ;;  %3778 = vmatpush.bf16.msrb.mxu2 %v7955_v27  ;;  %v10986_v27 = vpop.f32.mrf.mxu3 }
 0x231   :  { %v7408_v52 = vld [vmem:[#allocation3 + $0x4f8] sm:$0xf0] }
 0x232   :  { %v9847_v31 = vld [vmem:[#allocation3 + $0x6dc] sm:$0xf]  ;;  %v7411_v18 = vor.u32 %v9783_v29, %v7408_v52  ;;  %3792 = vmatpush.bf16.msrb.mxu0 %v8211_v40  ;;  %v10982_v29 = vpop.f32.mrf.mxu2 }
 0x233   :  { %v7664_v33 = vld [vmem:[#allocation3 + $0x6f8] sm:$0xf0] }
 0x234   :  { %v9911_v45 = vld [vmem:[#allocation3 + $0x8dc] sm:$0xf]  ;;  %v7667_v36 = vor.u32 %v9847_v31, %v7664_v33  ;;  %3751 = vmatpush.bf16.msra.mxu1 %v7411_v18  ;;  %v3087_v18 = vadd.f32 %v10873_v28, %v3073_v13  ;;  %v3239_v28 = vadd.f32 %v10924_v56, %v10824_v35  ;;  %v10997_v13 = vpop.f32.mrf.mxu0  ;;  %v3241_v56 = vadd.f32 %v10934_v20, %v10832_v12  ;;  %v8846_v12 = vld [vmem:[#allocation8 + $0x3e0] sm:$0xf]  ;;  %v10210_v20 = vld [vmem:[#allocation8 + $0x3ec] sm:$0xf0] }
 0x235   :  { %v7920_v53 = vld [vmem:[#allocation3 + $0x8f8] sm:$0xf0] }
 0x236   :  { %v9975_v61 = vld [vmem:[#allocation3 + $0xadc] sm:$0xf]  ;;  %v7923_v38 = vor.u32 %v9911_v45, %v7920_v53  ;;  %3765 = vmatpush.bf16.msrb.mxu3 %v7667_v36  ;;  %v3101_v36 = vadd.f32 %v10886_v42, %v3087_v18  ;;  %v3339_v42 = vadd.f32 %v10958_v10, %v10834_v21  ;;  %v10114_v18 = vld [vmem:[#allocation8 + $0xec] sm:$0xf0]  ;;  %v3253_v21 = vadd.f32 %v10942_v22, %v3239_v28  ;;  %v8590_v10 = vld [vmem:[#allocation8 + $0x1e0] sm:$0xf] }
 0x237   :  { %v8176_v2 = vld [vmem:[#allocation3 + $0xaf8] sm:$0xf0]  ;;  %v10110_v28 = vld [vmem:[#allocation8 + $0xcc] sm:$0xf0] }
 0x238   :  { %v9775_v60 = vld [vmem:[#allocation3 + $0x49c] sm:$0xf]  ;;  %v8179_v15 = vor.u32 %v9975_v61, %v8176_v2  ;;  %3779 = vmatpush.bf16.msrb.mxu2 %v7923_v38  ;;  %v3157_v38 = vadd.f32 %v10897_v50, %v3143_v51 }
 0x239   :  { %v7376_v46 = vld [vmem:[#allocation3 + $0x4b8] sm:$0xf0] }
 0x23a   :  { %v9839_v9 = vld [vmem:[#allocation3 + $0x69c] sm:$0xf]  ;;  %v7379_v17 = vor.u32 %v9775_v60, %v7376_v46  ;;  %3793 = vmatpush.bf16.msrb.mxu0 %v8179_v15  ;;  %v10989_v46 = vpop.f32.mrf.mxu1  ;;  %v3171_v35 = vadd.f32 %v10920_v14, %v3157_v38 }
 0x23b   :  { %v7632_v49 = vld [vmem:[#allocation3 + $0x6b8] sm:$0xf0] }
 0x23c   :  { %v9903_v11 = vld [vmem:[#allocation3 + $0x89c] sm:$0xf]  ;;  %v7635_v7 = vor.u32 %v9839_v9, %v7632_v49  ;;  %3752 = vmatpush.bf16.msra.mxu1 %v7379_v17  ;;  %v3185_v38 = vadd.f32 %v10916_v1, %v3171_v35 }
 0x23d   :  { %v7888_v57 = vld [vmem:[#allocation3 + $0x8b8] sm:$0xf0] }
 0x23e   :  { %v9967_v47 = vld [vmem:[#allocation3 + $0xa9c] sm:$0xf]  ;;  %v7891_v31 = vor.u32 %v9903_v11, %v7888_v57  ;;  %v10993_v11 = vld [vmem:[#allocation7] sm:$0xff]  ;;  %3766 = vmatpush.bf16.msrb.mxu3 %v7635_v7  ;;  %v11004_v7 = vpop.f32.mrf.mxu2 }
 0x23f   :  { %v8144_v5 = vld [vmem:[#allocation3 + $0xab8] sm:$0xf0] }
 0x240   :  { %v9767_v52 = vld [vmem:[#allocation3 + $0x45c] sm:$0xf]  ;;  %v8147_v45 = vor.u32 %v9967_v47, %v8144_v5  ;;  %3780 = vmatpush.bf16.msrb.mxu2 %v7891_v31 }
 0x241   :  { %v7344_v63 = vld [vmem:[#allocation3 + $0x478] sm:$0xf0] }
 0x242   :  { %v9831_v33 = vld [vmem:[#allocation3 + $0x65c] sm:$0xf]  ;;  %v7347_v53 = vor.u32 %v9767_v52, %v7344_v63  ;;  %3794 = vmatpush.bf16.msrb.mxu0 %v8147_v45  ;;  %v10146_v45 = vld [vmem:[#allocation8 + $0x1ec] sm:$0xf0] }
 0x243   :  { %v7600_v40 = vld [vmem:[#allocation3 + $0x678] sm:$0xf0] }
 0x244   :  { %v9895_v61 = vld [vmem:[#allocation3 + $0x85c] sm:$0xf]  ;;  %v7603_v15 = vor.u32 %v9831_v33, %v7600_v40  ;;  %3753 = vmatpush.bf16.msra.mxu1 %v7347_v53  ;;  %v8462_v40 = vld [vmem:[#allocation8 + $0xe0] sm:$0xf] }
 0x245   :  { %v7856_v2 = vld [vmem:[#allocation3 + $0x878] sm:$0xf0]  ;;  %v8718_v53 = vld [vmem:[#allocation8 + $0x2e0] sm:$0xf] }
 0x246   :  { %v9959_v60 = vld [vmem:[#allocation3 + $0xa5c] sm:$0xf]  ;;  %v7859_v17 = vor.u32 %v9895_v61, %v7856_v2  ;;  %v3115_v61 = vadd.f32 %v10888_v62, %v3101_v36  ;;  %v3255_v2 = vadd.f32 %v10952_v0, %v3241_v56  ;;  %3767 = vmatpush.bf16.msrb.mxu3 %v7603_v15  ;;  %v3337_v62 = vadd.f32 %v10950_v23, %v10826_v41  ;;  %v3380_v0 = vpop.f32.mrf.mxu3  ;;  %v11018_v41 = vpop.f32.mrf.mxu1  ;;  %v10174_v23 = vld [vmem:[#allocation8 + $0x2cc] sm:$0xf0] }
 0x247   :  { %v8112_v55 = vld [vmem:[#allocation3 + $0xa78] sm:$0xf0]  ;;  %v8463_v36 = vor.u32 %v10114_v18, %v8462_v40  ;;  %v3267_v15 = vadd.f32 %v10926_v24, %v3253_v21  ;;  %v8558_v21 = vld [vmem:[#allocation8 + $0x1a0] sm:$0xf] }
 0x248   :  { %v9759_v25 = vld [vmem:[#allocation3 + $0x41c] sm:$0xf]  ;;  %v8115_v50 = vor.u32 %v9959_v60, %v8112_v55  ;;  %3781 = vmatpush.bf16.msrb.mxu2 %v7859_v17  ;;  %v10178_v60 = vld [vmem:[#allocation8 + $0x2ec] sm:$0xf0]  ;;  %v3819_v55 = vperm.slane %v10993_v11, 0  ;;  %v3129_v1 = vadd.f32 %v10875_v37, %v3115_v61  ;;  %v3351_v37 = vadd.f32 %v10965_v4, %v3337_v62  ;;  %v11032_v61 = vpop.f32.mrf.mxu2 }
 0x249   :  { %v7312_v54 = vld [vmem:[#allocation3 + $0x438] sm:$0xf0]  ;;  %v3281_v40 = vadd.f32 %v10928_v48, %v3267_v15  ;;  %v10170_v48 = vld [vmem:[#allocation8 + $0x2ac] sm:$0xf0]  ;;  %v8414_v62 = vld [vmem:[#allocation8 + $0x80] sm:$0xf] }
 0x24a   :  { %v10015_v9 = vld [vmem:[#allocation3 + $0xc1c] sm:$0xf]  ;;  %v7315_v5 = vor.u32 %v9759_v25, %v7312_v54  ;;  %v3353_v25 = vadd.f32 %v10979_v16, %v3339_v42  ;;  %3795 = vmatpush.bf16.msrb.mxu0 %v8115_v50  ;;  %v8719_v16 = vor.u32 %v10178_v60, %v8718_v53  ;;  %v10142_v42 = vld [vmem:[#allocation8 + $0x1cc] sm:$0xf0]  ;;  %v8702_v50 = vld [vmem:[#allocation8 + $0x2c0] sm:$0xf]  ;;  %v11022_v24 = vadd.f32 %v3819_v55, %v10879_v44 }
 0x24b   :  { %v8336_v49 = vld [vmem:[#allocation3 + $0xc38] sm:$0xf0]  ;;  %v8703_v44 = vor.u32 %v10174_v23, %v8702_v50  ;;  %v3365_v53 = vadd.f32 %v10962_v32, %v3351_v37  ;;  %v8670_v15 = vld [vmem:[#allocation8 + $0x280] sm:$0xf] }
 0x24c   :  { %v9823_v57 = vld [vmem:[#allocation3 + $0x61c] sm:$0xf]  ;;  %v8339_v33 = vor.u32 %v10015_v9, %v8336_v49  ;;  %3754 = vmatpush.bf16.msra.mxu1 %v7315_v5  ;;  %v8591_v9 = vor.u32 %v10146_v45, %v8590_v10  ;;  %v8446_v49 = vld [vmem:[#allocation8 + $0xc0] sm:$0xf]  ;;  %v3367_v17 = vadd.f32 %v10976_v39, %v3353_v25  ;;  %v3199_v5 = vadd.f32 %v10903_v6, %v3185_v38  ;;  %v3408_v6 = vpop.f32.mrf.mxu0  ;;  %v11269_v25 = vld [vmem:[#allocation33_spill] sm:$0xff] }
 0x24d   :  { %v7568_v47 = vld [vmem:[#allocation3 + $0x638] sm:$0xf0]  ;;  %v3820_v39 = vperm.slane %v10993_v11, 1  ;;  %v8686_v10 = vld [vmem:[#allocation8 + $0x2a0] sm:$0xf]  ;;  %v11028_v45 = vadd.f32 %v3819_v55, %v3129_v1  ;;  %vm3851_vm3 = vcmp.gt.f32.partialorder %v11022_v24, 0.0 }
 0x24e   :  { %v9887_v52 = vld [vmem:[#allocation3 + $0x81c] sm:$0xf]  ;;  %v7571_v14 = vor.u32 %v9823_v57, %v7568_v47  ;;  %v8847_v57 = vor.u32 %v10210_v20, %v8846_v12  ;;  %v8574_v47 = vld [vmem:[#allocation8 + $0x1c0] sm:$0xf]  ;;  %v3381_v35 = vadd.f32 %v3380_v0, %v3367_v17  ;;  %v3213_v4 = vadd.f32 %v10922_v34, %v3199_v5  ;;  %v10102_v0 = vld [vmem:[#allocation8 + $0x8c] sm:$0xf0] }
 0x24f   :  { %v7824_v63 = vld [vmem:[#allocation3 + $0x838] sm:$0xf0]  ;;  %3755 = vmatmul.bf16.vlgmr.msra.gmra.mxu1 %v10770_v58  ;;  %v8447_v58 = vor.u32 %v10110_v28, %v8446_v49  ;;  %v8575_v56 = vor.u32 %v10142_v42, %v8574_v47  ;;  %v11268_v20 = vld [vmem:[#allocation32_spill] sm:$0xff]  ;;  %v3295_v34 = vadd.f32 %v11269_v25, %v3281_v40  ;;  %v10134_v28 = vld [vmem:[#allocation8 + $0x18c] sm:$0xf0]  ;;  %vm3859_vm1 = vcmp.gt.f32.partialorder %v11028_v45, 0.0 }
 0x250   :  { %v9951_v51 = vld [vmem:[#allocation3 + $0xa1c] sm:$0xf]  ;;  %v7827_v22 = vor.u32 %v9887_v52, %v7824_v63  ;;  %3810 = vmatpush.bf16.msrb.mxu1 %v8339_v33  ;;  %3768 = vmatpush.bf16.msrb.mxu3 %v7571_v14  ;;  %v8830_v52 = vld [vmem:[#allocation8 + $0x3c0] sm:$0xf]  ;;  %v10206_v63 = vld [vmem:[#allocation8 + $0x3cc] sm:$0xf0]  ;;  %v3395_v32 = vadd.f32 %v10982_v29, %v3381_v35  ;;  %v8687_v29 = vor.u32 %v10170_v48, %v8686_v10 }
 0x251   :  { %v8080_v31 = vld [vmem:[#allocation3 + $0xa38] sm:$0xf0]  ;;  %v10106_v33 = vld [vmem:[#allocation8 + $0xac] sm:$0xf0]  ;;  %v8831_v18 = vor.u32 %v10206_v63, %v8830_v52  ;;  %v11271_v17 = vld [vmem:[#allocation31_spill] sm:$0xff]  ;;  %v3309_v1 = vadd.f32 %v10960_v59, %v3295_v34  ;;  %v8415_v35 = vor.u32 %v10102_v0, %v8414_v62  ;;  %v3821_v10 = vperm.slane %v10993_v11, 2 }
 0x252   :  { %v8083_v54 = vor.u32 %v9951_v51, %v8080_v31  ;;  %v3269_v51 = vadd.f32 %v10938_v30, %v3255_v2  ;;  %3782 = vmatpush.bf16.msrb.mxu2 %v7827_v22  ;;  %v8430_v31 = vld [vmem:[#allocation8 + $0xa0] sm:$0xf]  ;;  %v10138_v30 = vld [vmem:[#allocation8 + $0x1ac] sm:$0xf0]  ;;  %v11049_v22 = vpop.f32.mrf.mxu3  ;;  %v11056_v50 = vmul.f32 0.2, %v11028_v45  ;;  %v3409_v23 = vadd.f32 %v3408_v6, %v3395_v32 }
 0x253   :  { %3769 = vmatmul.bf16.vlgmr.msrb.gmra.mxu3 %v10774_v3  ;;  %v8814_v2 = vld [vmem:[#allocation8 + $0x3a0] sm:$0xf]  ;;  %v10202_v14 = vld [vmem:[#allocation8 + $0x3ac] sm:$0xf0]  ;;  %v11046_v3 = vmul.f32 0.2, %v11022_v24  ;;  %v8559_v38 = vor.u32 %v10138_v30, %v8558_v21 }
 0x254   :  { %3796 = vmatpush.bf16.msrb.mxu0 %v8083_v54  ;;  %5453 = vmatpush.bf16.msra.mxu3 %v8463_v36  ;;  %v11267_v60 = vld [vmem:[#allocation30_spill] sm:$0xff]  ;;  %v3283_v55 = vadd.f32 %v11268_v20, %v3269_v51  ;;  %v8431_v54 = vor.u32 %v10106_v33, %v8430_v31  ;;  %v11270_v36 = vld [vmem:[#allocation35_spill] sm:$0xff]  ;;  %v8815_v49 = vor.u32 %v10202_v14, %v8814_v2  ;;  %v8798_v47 = vld [vmem:[#allocation8 + $0x380] sm:$0xf]  ;;  %v11064_v51 = vpop.f32.mrf.mxu0  ;;  %v3822_v14 = vperm.slane %v10993_v11, 3 }
 0x255   :  { %5467 = vmatpush.bf16.msra.mxu1 %v8591_v9  ;;  %3783 = vmatmul.bf16.vlgmr.msrb.gmra.mxu2 %v10802_v43  ;;  %v11039_v12 = vadd.f32 %v3820_v39, %v11267_v60  ;;  %v3379_v43 = vadd.f32 %v10986_v27, %v3365_v53  ;;  %v11053_v27 = vpop.f32.mrf.mxu1  ;;  %v10198_v42 = vld [vmem:[#allocation8 + $0x38c] sm:$0xf0]  ;;  %v8526_v33 = vld [vmem:[#allocation8 + $0x160] sm:$0xf]  ;;  %v3423_v48 = vadd.f32 %v11018_v41, %v3409_v23  ;;  %v11077_v60 = vpop.f32.mrf.mxu2  ;;  %v11274_v62 = vld [vmem:[#allocation21_spill] sm:$0xff] }
 0x256   :  { %5481 = vmatpush.bf16.msra.mxu2 %v8719_v16  ;;  %v3297_v9 = vadd.f32 %v11270_v36, %v3283_v55  ;;  %v3227_v16 = vadd.f32 %v11271_v17, %v3213_v4  ;;  %v8799_v59 = vor.u32 %v10198_v42, %v8798_v47  ;;  %v8654_v6 = vld [vmem:[#allocation8 + $0x260] sm:$0xf]  ;;  %v11272_v21 = vld [vmem:[#allocation34_spill] sm:$0xff] }
 0x257   :  { %3797 = vmatmul.bf16.vlgmr.msrb.gmra.mxu0 %v10804_v8  ;;  %v8542_v8 = vld [vmem:[#allocation8 + $0x180] sm:$0xf]  ;;  %v11061_v52 = vmul.f32 0.2, %v11039_v12  ;;  %v3393_v63 = vadd.f32 %v10970_v19, %v3379_v43  ;;  %v10162_v19 = vld [vmem:[#allocation8 + $0x26c] sm:$0xf0]  ;;  %v3323_v30 = vadd.f32 %v11272_v21, %v3309_v1 }
 0x258   :  { %5495 = vmatpush.bf16.msra.mxu0 %v8847_v57  ;;  %5454 = vmatpush.bf16.msra.mxu3 %v8447_v58  ;;  %v10166_v57 = vld [vmem:[#allocation8 + $0x28c] sm:$0xf0]  ;;  %v3311_v5 = vadd.f32 %v10974_v26, %v3297_v9  ;;  %v8543_v37 = vor.u32 %v10134_v28, %v8542_v8  ;;  %v8398_v58 = vld [vmem:[#allocation8 + $0x60] sm:$0xf]  ;;  %v11068_v40 = vadd.f32 %v3820_v39, %v3227_v16  ;;  %vm3852_vm4 = vcmp.gt.f32.partialorder %v11039_v12, 0.0 }
 0x259   :  { %5468 = vmatpush.bf16.msra.mxu1 %v8575_v56  ;;  %v10098_v56 = vld [vmem:[#allocation8 + $0x6c] sm:$0xf0]  ;;  %v8671_v31 = vor.u32 %v10166_v57, %v8670_v15  ;;  %v11273_v4 = vld [vmem:[#allocation36_spill] sm:$0xff]  ;;  %v3407_v2 = vadd.f32 %v10997_v13, %v3393_v63  ;;  %v8655_v34 = vor.u32 %v10162_v19, %v8654_v6  ;;  %v11082_v9 = vadd.f32 %v3821_v10, %v3323_v30 }
 0x25a   :  { %5482 = vmatpush.bf16.msra.mxu2 %v8703_v44  ;;  %v10130_v26 = vld [vmem:[#allocation8 + $0x16c] sm:$0xf0]  ;;  %v8782_v44 = vld [vmem:[#allocation8 + $0x360] sm:$0xf]  ;;  %v3325_v53 = vadd.f32 %v11273_v4, %v3311_v5  ;;  %v8399_v39 = vor.u32 %v10098_v56, %v8398_v58  ;;  %vm3860_vm2 = vcmp.gt.f32.partialorder %v11068_v40, 0.0 }
 0x25b   :  { %v8527_v20 = vor.u32 %v10130_v26, %v8526_v33  ;;  %v8382_v55 = vld [vmem:[#allocation8 + $0x40] sm:$0xf]  ;;  %v10094_v25 = vld [vmem:[#allocation8 + $0x4c] sm:$0xf0]  ;;  %v3876_v8 = vmul.f32 0.2, %v11068_v40  ;;  %v3421_v28 = vadd.f32 %v10989_v46, %v3407_v2 }
 0x25c   :  { %5496 = vmatpush.bf16.msra.mxu0 %v8831_v18  ;;  %5455 = vmatpush.bf16.msra.mxu3 %v8431_v54  ;;  %v10194_v18 = vld [vmem:[#allocation8 + $0x36c] sm:$0xf0]  ;;  %v8510_v43 = vld [vmem:[#allocation8 + $0x140] sm:$0xf]  ;;  %v8383_v17 = vor.u32 %v10094_v25, %v8382_v55  ;;  %vm3853_vm5 = vcmp.gt.f32.partialorder %v11082_v9, 0.0  ;;  %v3891_v25 = vsel %vm3859_vm1, %v11028_v45, %v11056_v50 }
 0x25d   :  { %5469 = vmatpush.bf16.msra.mxu1 %v8559_v38  ;;  %v8783_v32 = vor.u32 %v10194_v18, %v8782_v44  ;;  %v10126_v41 = vld [vmem:[#allocation8 + $0x14c] sm:$0xf0]  ;;  %v8638_v54 = vld [vmem:[#allocation8 + $0x240] sm:$0xf]  ;;  %v3436_v38 = vpop.f32.mrf.mxu3  ;;  %v3450_v15 = vpop.f32.mrf.mxu1 }
 0x25e   :  { %5483 = vmatpush.bf16.msra.mxu2 %v8687_v29  ;;  %v10158_v13 = vld [vmem:[#allocation8 + $0x24c] sm:$0xf0]  ;;  %v8766_v0 = vld [vmem:[#allocation8 + $0x340] sm:$0xf]  ;;  %v11084_v29 = vadd.f32 %v3821_v10, %v3325_v53  ;;  %v8511_v16 = vor.u32 %v10126_v41, %v8510_v43  ;;  %v11099_v2 = vpop.f32.mrf.mxu2 }
 0x25f   :  { %8347 = vmatmul.msk.bf16.vlgmr.msrb.gmra.mxu1 %vm3029_vm0, %v11274_v62  ;;  %v10190_v36 = vld [vmem:[#allocation8 + $0x34c] sm:$0xf0]  ;;  %v8366_v57 = vld [vmem:[#allocation8 + $0x20] sm:$0xf]  ;;  %v8639_v42 = vor.u32 %v10158_v13, %v8638_v54  ;;  %v3869_v62 = vmul.f32 0.2, %v11082_v9 }
 0x260   :  { %5497 = vmatpush.bf16.msra.mxu0 %v8815_v49  ;;  %5456 = vmatpush.bf16.msra.mxu3 %v8415_v35  ;;  %v11086_v49 = vadd.f32 %v3822_v14, %v3423_v48  ;;  %v10090_v47 = vld [vmem:[#allocation8 + $0x2c] sm:$0xf0]  ;;  %v8767_v1 = vor.u32 %v10190_v36, %v8766_v0  ;;  %v8494_v5 = vld [vmem:[#allocation8 + $0x120] sm:$0xf]  ;;  %v11092_v35 = vpop.f32.mrf.mxu0  ;;  %vm3861_vm6 = vcmp.gt.f32.partialorder %v11084_v29, 0.0 }
 0x261   :  { %5470 = vmatpush.bf16.msra.mxu1 %v8543_v37  ;;  %v10122_v23 = vld [vmem:[#allocation8 + $0x12c] sm:$0xf0]  ;;  %v8622_v63 = vld [vmem:[#allocation8 + $0x220] sm:$0xf]  ;;  %v3877_v46 = vmul.f32 0.2, %v11084_v29  ;;  %v8367_v33 = vor.u32 %v10090_v47, %v8366_v57  ;;  %v3883_v57 = vsel %vm3851_vm3, %v11022_v24, %v11046_v3  ;;  %v3885_v24 = vsel %vm3853_vm5, %v11082_v9, %v3869_v62 }
 0x262   :  { %5484 = vmatpush.bf16.msra.mxu2 %v8671_v31  ;;  %v10154_v37 = vld [vmem:[#allocation8 + $0x22c] sm:$0xf0]  ;;  %v8750_v58 = vld [vmem:[#allocation8 + $0x320] sm:$0xf]  ;;  %v3878_v31 = vmul.f32 0.2, %v11086_v49  ;;  %v8495_v26 = vor.u32 %v10122_v23, %v8494_v5  ;;  %v11131_v23 = vpack.c.bf16 %v3891_v25, %v3883_v57 }
 0x263   :  { %v10186_v56 = vld [vmem:[#allocation8 + $0x32c] sm:$0xf0]  ;;  %v8350_v6 = vld [vmem:[#allocation8] sm:$0xf]  ;;  %v8623_v30 = vor.u32 %v10154_v37, %v8622_v63  ;;  %vm3862_vm7 = vcmp.gt.f32.partialorder %v11086_v49, 0.0 }
 0x264   :  { %5498 = vmatpush.bf16.msra.mxu0 %v8799_v59  ;;  %5457 = vmatpush.bf16.msra.mxu3 %v8399_v39  ;;  %v3838_v59 = vadd.f32 %v3822_v14, %v3421_v28  ;;  %v10086_v19 = vld [vmem:[#allocation8 + $0xc] sm:$0xf0]  ;;  %v8478_v44 = vld [vmem:[#allocation8 + $0x100] sm:$0xf]  ;;  %v8751_v10 = vor.u32 %v10186_v56, %v8750_v58  ;;  %v3894_v47 = vsel %vm3862_vm7, %v11086_v49, %v3878_v31 }
 0x265   :  { %5471 = vmatpush.bf16.msra.mxu1 %v8527_v20  ;;  %v11275_v18 = vld [vmem:[#allocation26_spill] sm:$0xff]  ;;  %v8606_v53 = vld [vmem:[#allocation8 + $0x200] sm:$0xf]  ;;  %v11101_v39 = vpop.f32.mrf.mxu3  ;;  %v11114_v13 = vpop.f32.mrf.mxu1  ;;  %v8351_v0 = vor.u32 %v10086_v19, %v8350_v6 }
 0x266   :  { %5485 = vmatpush.bf16.msra.mxu2 %v8655_v34  ;;  %v3437_v21 = vadd.f32 %v3436_v38, %v11275_v18  ;;  %v10118_v4 = vld [vmem:[#allocation8 + $0x10c] sm:$0xf0]  ;;  %v8734_v14 = vld [vmem:[#allocation8 + $0x300] sm:$0xf]  ;;  %v3892_v34 = vsel %vm3860_vm2, %v11068_v40, %v3876_v8  ;;  %v3870_v50 = vmul.f32 0.2, %v3838_v59 }
 0x267   :  { %v10150_v48 = vld [vmem:[#allocation8 + $0x20c] sm:$0xf0]  ;;  %v8974_v55 = vld [vmem:[#allocation8 + $0x4e0] sm:$0xf]  ;;  %v8479_v45 = vor.u32 %v10118_v4, %v8478_v44  ;;  %vm3854_vm8 = vcmp.gt.f32.partialorder %v3838_v59, 0.0 }
 0x268   :  { %5499 = vmatpush.bf16.msra.mxu0 %v8783_v32  ;;  %5458 = vmatpush.bf16.msra.mxu3 %v8383_v17  ;;  %v10182_v20 = vld [vmem:[#allocation8 + $0x30c] sm:$0xf0]  ;;  %v9102_v54 = vld [vmem:[#allocation8 + $0x5e0] sm:$0xf]  ;;  %v3451_v36 = vadd.f32 %v3450_v15, %v3437_v21  ;;  %v8607_v40 = vor.u32 %v10150_v48, %v8606_v53  ;;  %v3884_v15 = vsel %vm3852_vm4, %v11039_v12, %v11061_v52  ;;  %v3532_v3 = vpop.f32.mrf.mxu0 }
 0x269   :  { %5472 = vmatpush.bf16.msra.mxu1 %v8511_v16  ;;  %v11276_v32 = vld [vmem:[#allocation22_spill] sm:$0xff]  ;;  %v8735_v8 = vor.u32 %v10182_v20, %v8734_v14  ;;  %v8958_v16 = vld [vmem:[#allocation8 + $0x4c0] sm:$0xf]  ;;  %v11133_v63 = vpack.c.bf16 %v3892_v34, %v3884_v15  ;;  %v3886_v52 = vsel %vm3854_vm8, %v3838_v59, %v3870_v50 }
 0x26a   :  { %5486 = vmatpush.bf16.msra.mxu2 %v8639_v42  ;;  %v3435_v43 = vadd.f32 %v11049_v22, %v11276_v32  ;;  %v10242_v41 = vld [vmem:[#allocation8 + $0x4ec] sm:$0xf0]  ;;  %v3893_v22 = vsel %vm3861_vm6, %v11084_v29, %v3877_v46  ;;  %v11142_v49 = vpack.c.bf16 %v3894_v47, %v3886_v52  ;;  %v8942_v56 = vld [vmem:[#allocation8 + $0x4a0] sm:$0xf]  ;;  %v3823_v52 = vperm.slane %v10993_v11, 4 }
 0x26b   :  { %v10274_v38 = vld [vmem:[#allocation8 + $0x5ec] sm:$0xf0]  ;;  %v8975_v28 = vor.u32 %v10242_v41, %v8974_v55  ;;  %v11138_v12 = vpack.c.bf16 %v3893_v22, %v3885_v24  ;;  %v9070_v31 = vld [vmem:[#allocation8 + $0x5a0] sm:$0xf] }
 0x26c   :  { %5500 = vmatpush.bf16.msra.mxu0 %v8767_v1  ;;  %5459 = vmatpush.bf16.msra.mxu3 %v8367_v33  ;;  %v9103_v17 = vor.u32 %v10274_v38, %v9102_v54  ;;  %v3449_v29 = vadd.f32 %v11053_v27, %v3435_v43  ;;  %v10238_v42 = vld [vmem:[#allocation8 + $0x4cc] sm:$0xf0]  ;;  %v9086_v1 = vld [vmem:[#allocation8 + $0x5c0] sm:$0xf]  ;;  %v3465_v27 = vadd.f32 %v11032_v61, %v3451_v36  ;;  %v3546_v33 = vpop.f32.mrf.mxu2  ;;  %v11277_v36 = vld [vmem:[#allocation23_spill] sm:$0xff] }
 0x26d   :  { %5473 = vmatpush.bf16.msra.mxu1 %v8495_v26  ;;  %v10270_v5 = vld [vmem:[#allocation8 + $0x5cc] sm:$0xf0]  ;;  %v8959_v37 = vor.u32 %v10238_v42, %v8958_v16  ;;  %v3492_v61 = vpop.f32.mrf.mxu3  ;;  %v9230_v26 = vld [vmem:[#allocation8 + $0x6e0] sm:$0xf]  ;;  %v3506_v18 = vpop.f32.mrf.mxu1 }
 0x26e   :  { %5487 = vmatpush.bf16.msra.mxu2 %v8623_v30  ;;  %v9087_v58 = vor.u32 %v10270_v5, %v9086_v1  ;;  %v3463_v9 = vadd.f32 %v11004_v7, %v3449_v29  ;;  %v10234_v46 = vld [vmem:[#allocation8 + $0x4ac] sm:$0xf0]  ;;  %v3479_v19 = vadd.f32 %v11092_v35, %v3465_v27  ;;  %v8926_v30 = vld [vmem:[#allocation8 + $0x480] sm:$0xf] }
 0x26f   :  { %v10266_v59 = vld [vmem:[#allocation8 + $0x5ac] sm:$0xf0]  ;;  %v8943_v7 = vor.u32 %v10234_v46, %v8942_v56  ;;  %v9054_v48 = vld [vmem:[#allocation8 + $0x580] sm:$0xf] }
 0x270   :  { %5501 = vmatpush.bf16.msra.mxu0 %v8751_v10  ;;  %5460 = vmatpush.bf16.msra.mxu3 %v8351_v0  ;;  %v10306_v6 = vld [vmem:[#allocation8 + $0x6ec] sm:$0xf0]  ;;  %v9071_v21 = vor.u32 %v10266_v59, %v9070_v31  ;;  %v3477_v10 = vadd.f32 %v11064_v51, %v3463_v9  ;;  %v3493_v4 = vadd.f32 %v3492_v61, %v3479_v19  ;;  %v9214_v20 = vld [vmem:[#allocation8 + $0x6c0] sm:$0xf]  ;;  %v3534_v35 = vpop.f32.mrf.mxu0  ;;  %v11278_v59 = vld [vmem:[#allocation27_spill] sm:$0xff] }
 0x271   :  { %5474 = vmatpush.bf16.msra.mxu1 %v8479_v45  ;;  %v9231_v44 = vor.u32 %v10306_v6, %v9230_v26  ;;  %v10230_v53 = vld [vmem:[#allocation8 + $0x48c] sm:$0xf0]  ;;  %v8910_v41 = vld [vmem:[#allocation8 + $0x460] sm:$0xf] }
 0x272   :  { %5488 = vmatpush.bf16.msra.mxu2 %v8607_v40  ;;  %v10262_v14 = vld [vmem:[#allocation8 + $0x58c] sm:$0xf0]  ;;  %v3491_v25 = vadd.f32 %v11101_v39, %v3477_v10  ;;  %v8927_v32 = vor.u32 %v10230_v53, %v8926_v30  ;;  %v3507_v54 = vadd.f32 %v3506_v18, %v3493_v4  ;;  %v9038_v62 = vld [vmem:[#allocation8 + $0x560] sm:$0xf]  ;;  %v3533_v40 = vadd.f32 %v3532_v3, %v11277_v36 }
 0x273   :  { %5461 = vmatmul.bf16.vlgmr.msra.gmra.mxu3 %v11131_v23  ;;  %v10302_v55 = vld [vmem:[#allocation8 + $0x6cc] sm:$0xf0]  ;;  %v9055_v43 = vor.u32 %v10262_v14, %v9054_v48  ;;  %v9198_v45 = vld [vmem:[#allocation8 + $0x6a0] sm:$0xf] }
 0x274   :  { %5502 = vmatpush.bf16.msra.mxu0 %v8735_v8  ;;  %5509 = vmatpush.bf16.msrb.mxu3 %v8975_v28  ;;  %v9215_v34 = vor.u32 %v10302_v55, %v9214_v20  ;;  %v10226_v38 = vld [vmem:[#allocation8 + $0x46c] sm:$0xf0]  ;;  %v3505_v8 = vadd.f32 %v11114_v13, %v3491_v25  ;;  %v3548_v22 = vpop.f32.mrf.mxu2  ;;  %v8894_v57 = vld [vmem:[#allocation8 + $0x440] sm:$0xf]  ;;  %v3547_v29 = vadd.f32 %v3546_v33, %v3533_v40  ;;  %v10112_v20 = vld [vmem:[#allocation8 + $0xe4] sm:$0xf] }
 0x275   :  { %5523 = vmatpush.bf16.msrb.mxu1 %v9103_v17  ;;  %5489 = vmatmul.bf16.vlgmr.msra.gmra.mxu2 %v11138_v12  ;;  %v10258_v51 = vld [vmem:[#allocation8 + $0x56c] sm:$0xf0]  ;;  %v3560_v0 = vpop.f32.mrf.mxu3  ;;  %v3574_v28 = vpop.f32.mrf.mxu1  ;;  %v8911_v17 = vor.u32 %v10226_v38, %v8910_v41  ;;  %v9022_v47 = vld [vmem:[#allocation8 + $0x540] sm:$0xf]  ;;  %v3521_v42 = vadd.f32 %v11099_v2, %v3507_v54  ;;  %v3535_v2 = vadd.f32 %v3534_v35, %v11278_v59  ;;  %v8464_v55 = vld [vmem:[#allocation8 + $0xf0] sm:$0xf0] }
 0x276   :  { %5475 = vmatmul.bf16.vlgmr.msra.gmra.mxu1 %v11133_v63  ;;  %5537 = vmatpush.bf16.msrb.mxu2 %v9231_v44  ;;  %v10298_v50 = vld [vmem:[#allocation8 + $0x6ac] sm:$0xf0]  ;;  %v9039_v16 = vor.u32 %v10258_v51, %v9038_v62  ;;  %v9182_v5 = vld [vmem:[#allocation8 + $0x680] sm:$0xf]  ;;  %v3519_v13 = vadd.f32 %v11077_v60, %v3505_v8  ;;  %v3561_v27 = vadd.f32 %v3560_v0, %v3547_v29  ;;  %v10144_v41 = vld [vmem:[#allocation8 + $0x1e4] sm:$0xf] }
 0x277   :  { %5503 = vmatmul.bf16.vlgmr.msra.gmra.mxu0 %v11142_v49  ;;  %v9199_v39 = vor.u32 %v10298_v50, %v9198_v45  ;;  %v10222_v15 = vld [vmem:[#allocation8 + $0x44c] sm:$0xf0]  ;;  %v8878_v9 = vld [vmem:[#allocation8 + $0x420] sm:$0xf]  ;;  %v3847_v33 = vadd.f32 %v3823_v52, %v3521_v42  ;;  %v3549_v18 = vadd.f32 %v3548_v22, %v3535_v2  ;;  %v8592_v54 = vld [vmem:[#allocation8 + $0x1f0] sm:$0xf0]  ;;  %v8467_v40 = vor.u32 %v10112_v20, %v8464_v55 }
 0x278   :  { %5510 = vmatpush.bf16.msrb.mxu3 %v8959_v37  ;;  %v10254_v1 = vld [vmem:[#allocation8 + $0x54c] sm:$0xf0]  ;;  %v3588_v37 = vpop.f32.mrf.mxu0  ;;  %v9006_v31 = vld [vmem:[#allocation8 + $0x520] sm:$0xf]  ;;  %v3839_v44 = vadd.f32 %v3823_v52, %v3519_v13  ;;  %v8595_v8 = vor.u32 %v10144_v41, %v8592_v54  ;;  %v8448_v22 = vld [vmem:[#allocation8 + $0xd0] sm:$0xf0] }
 0x279   :  { %5524 = vmatpush.bf16.msrb.mxu1 %v9087_v58  ;;  %v10294_v24 = vld [vmem:[#allocation8 + $0x68c] sm:$0xf0]  ;;  %v8895_v58 = vor.u32 %v10222_v15, %v8894_v57  ;;  %v9023_v56 = vor.u32 %v10254_v1, %v9022_v47  ;;  %v9166_v26 = vld [vmem:[#allocation8 + $0x660] sm:$0xf]  ;;  %v3879_v25 = vmul.f32 0.2, %v3847_v33 }
 0x27a   :  { %5538 = vmatpush.bf16.msrb.mxu2 %v9215_v34  ;;  %v9183_v3 = vor.u32 %v10294_v24, %v9182_v5  ;;  %v10218_v46 = vld [vmem:[#allocation8 + $0x42c] sm:$0xf0]  ;;  %v8990_v10 = vld [vmem:[#allocation8 + $0x500] sm:$0xf]  ;;  %vm3863_vm9 = vcmp.gt.f32.partialorder %v3847_v33, 0.0  ;;  %vm3855_vm10 = vcmp.gt.f32.partialorder %v3839_v44, 0.0 }
 0x27b   :  { %v10250_v61 = vld [vmem:[#allocation8 + $0x52c] sm:$0xf0]  ;;  %v8879_v53 = vor.u32 %v10218_v46, %v8878_v9  ;;  %v9150_v35 = vld [vmem:[#allocation8 + $0x640] sm:$0xf]  ;;  %v3871_v62 = vmul.f32 0.2, %v3839_v44  ;;  %v3895_v50 = vsel %vm3863_vm9, %v3847_v33, %v3879_v25 }
 0x27c   :  { %5511 = vmatpush.bf16.msrb.mxu3 %v8943_v7  ;;  %v10290_v6 = vld [vmem:[#allocation8 + $0x66c] sm:$0xf0]  ;;  %v3575_v7 = vadd.f32 %v3574_v28, %v3561_v27  ;;  %v3602_v4 = vpop.f32.mrf.mxu2  ;;  %v9007_v48 = vor.u32 %v10250_v61, %v9006_v31  ;;  %v10140_v28 = vld [vmem:[#allocation8 + $0x1c4] sm:$0xf]  ;;  %v8576_v57 = vld [vmem:[#allocation8 + $0x1d0] sm:$0xf0] }
 0x27d   :  { %5525 = vmatpush.bf16.msrb.mxu1 %v9071_v21  ;;  %v3562_v19 = vpop.f32.mrf.mxu3  ;;  %v9167_v60 = vor.u32 %v10290_v6, %v9166_v26  ;;  %v8862_v21 = vld [vmem:[#allocation8 + $0x400] sm:$0xf]  ;;  %v10214_v30 = vld [vmem:[#allocation8 + $0x40c] sm:$0xf0]  ;;  %v3887_v29 = vsel %vm3855_vm10, %v3839_v44, %v3871_v62  ;;  %v3824_v24 = vperm.slane %v10993_v11, 5 }
 0x27e   :  { %5539 = vmatpush.bf16.msrb.mxu2 %v9199_v39  ;;  %v10246_v14 = vld [vmem:[#allocation8 + $0x50c] sm:$0xf0]  ;;  %v3563_v34 = vadd.f32 %v3562_v19, %v3549_v18  ;;  %v3589_v51 = vadd.f32 %v3588_v37, %v3575_v7  ;;  %v8863_v0 = vor.u32 %v10214_v30, %v8862_v21  ;;  %v10108_v39 = vld [vmem:[#allocation8 + $0xc4] sm:$0xf]  ;;  %v9134_v15 = vld [vmem:[#allocation8 + $0x620] sm:$0xf]  ;;  %v11159_v5 = vpack.c.bf16 %v3895_v50, %v3887_v29 }
 0x27f   :  { %v8991_v45 = vor.u32 %v10246_v14, %v8990_v10  ;;  %v10282_v47 = vld [vmem:[#allocation8 + $0x62c] sm:$0xf0]  ;;  %v10104_v13 = vld [vmem:[#allocation8 + $0xa4] sm:$0xf]  ;;  %v8579_v37 = vor.u32 %v10140_v28, %v8576_v57  ;;  %v8560_v9 = vld [vmem:[#allocation8 + $0x1b0] sm:$0xf0] }
 0x280   :  { %5512 = vmatpush.bf16.msrb.mxu3 %v8927_v32  ;;  %v10286_v32 = vld [vmem:[#allocation8 + $0x64c] sm:$0xf0]  ;;  %v3603_v42 = vadd.f32 %v3602_v4, %v3589_v51  ;;  %v9135_v1 = vor.u32 %v10282_v47, %v9134_v15  ;;  %v9118_v31 = vld [vmem:[#allocation8 + $0x600] sm:$0xf]  ;;  %v10176_v33 = vld [vmem:[#allocation8 + $0x2e4] sm:$0xf] }
 0x281   :  { %5526 = vmatpush.bf16.msrb.mxu1 %v9055_v43  ;;  %v3576_v43 = vpop.f32.mrf.mxu1  ;;  %v9151_v38 = vor.u32 %v10286_v32, %v9150_v35  ;;  %v10278_v59 = vld [vmem:[#allocation8 + $0x60c] sm:$0xf0]  ;;  %v8720_v26 = vld [vmem:[#allocation8 + $0x2f0] sm:$0xf0]  ;;  %v10132_v18 = vld [vmem:[#allocation8 + $0x184] sm:$0xf] }
 0x282   :  { %5540 = vmatpush.bf16.msrb.mxu2 %v9183_v3  ;;  %v3577_v36 = vadd.f32 %v3576_v43, %v3563_v34  ;;  %v8451_v3 = vor.u32 %v10108_v39, %v8448_v22  ;;  %v9119_v2 = vor.u32 %v10278_v59, %v9118_v31  ;;  %v8416_v44 = vld [vmem:[#allocation8 + $0x90] sm:$0xf0]  ;;  %v8723_v7 = vor.u32 %v10176_v33, %v8720_v26  ;;  %v10172_v10 = vld [vmem:[#allocation8 + $0x2c4] sm:$0xf]  ;;  %v9358_v25 = vld [vmem:[#allocation8 + $0x7e0] sm:$0xf] }
 0x283   :  { %v8544_v30 = vld [vmem:[#allocation8 + $0x190] sm:$0xf0]  ;;  %v10338_v34 = vld [vmem:[#allocation8 + $0x7ec] sm:$0xf0]  ;;  %v10128_v41 = vld [vmem:[#allocation8 + $0x164] sm:$0xf] }
 0x284   :  { %5513 = vmatpush.bf16.msrb.mxu3 %v8911_v17  ;;  %v3590_v17 = vpop.f32.mrf.mxu0  ;;  %v3604_v46 = vpop.f32.mrf.mxu2  ;;  %v8704_v4 = vld [vmem:[#allocation8 + $0x2d0] sm:$0xf0]  ;;  %v8547_v43 = vor.u32 %v10132_v18, %v8544_v30  ;;  %v10168_v51 = vld [vmem:[#allocation8 + $0x2a4] sm:$0xf]  ;;  %v9342_v28 = vld [vmem:[#allocation8 + $0x7c0] sm:$0xf] }
 0x285   :  { %5527 = vmatpush.bf16.msrb.mxu1 %v9039_v16  ;;  %v3616_v16 = vpop.f32.mrf.mxu3  ;;  %v3591_v52 = vadd.f32 %v3590_v17, %v3577_v36  ;;  %v8707_v14 = vor.u32 %v10172_v10, %v8704_v4  ;;  %v8400_v55 = vld [vmem:[#allocation8 + $0x70] sm:$0xf0]  ;;  %v10334_v15 = vld [vmem:[#allocation8 + $0x7cc] sm:$0xf0]  ;;  %v10164_v29 = vld [vmem:[#allocation8 + $0x284] sm:$0xf] }
 0x286   :  { %5541 = vmatpush.bf16.msrb.mxu2 %v9167_v60  ;;  %v3617_v27 = vadd.f32 %v3616_v16, %v3603_v42  ;;  %v10100_v60 = vld [vmem:[#allocation8 + $0x84] sm:$0xf]  ;;  %v8528_v54 = vld [vmem:[#allocation8 + $0x170] sm:$0xf0]  ;;  %v9343_v47 = vor.u32 %v10334_v15, %v9342_v28  ;;  %v10326_v18 = vld [vmem:[#allocation8 + $0x78c] sm:$0xf0] }
 0x287   :  { %v3605_v6 = vadd.f32 %v3604_v46, %v3591_v52  ;;  %v8419_v20 = vor.u32 %v10100_v60, %v8416_v44  ;;  %v8688_v50 = vld [vmem:[#allocation8 + $0x2b0] sm:$0xf0]  ;;  %v10124_v16 = vld [vmem:[#allocation8 + $0x144] sm:$0xf]  ;;  %v9326_v52 = vld [vmem:[#allocation8 + $0x7a0] sm:$0xf] }
 0x288   :  { %5514 = vmatpush.bf16.msrb.mxu3 %v8895_v58  ;;  %v8432_v58 = vld [vmem:[#allocation8 + $0xb0] sm:$0xf0]  ;;  %v3840_v19 = vadd.f32 %v3824_v24, %v3617_v27  ;;  %v8691_v22 = vor.u32 %v10168_v51, %v8688_v50  ;;  %v10330_v27 = vld [vmem:[#allocation8 + $0x7ac] sm:$0xf0]  ;;  %v10160_v46 = vld [vmem:[#allocation8 + $0x264] sm:$0xf] }
 0x289   :  { %5528 = vmatpush.bf16.msrb.mxu1 %v9023_v56  ;;  %v10136_v56 = vld [vmem:[#allocation8 + $0x1a4] sm:$0xf]  ;;  %v8435_v61 = vor.u32 %v10104_v13, %v8432_v58  ;;  %v8384_v39 = vld [vmem:[#allocation8 + $0x50] sm:$0xf0]  ;;  %v9310_v44 = vld [vmem:[#allocation8 + $0x780] sm:$0xf] }
 0x28a   :  { %5542 = vmatpush.bf16.msrb.mxu2 %v9151_v38  ;;  %v8563_v11 = vor.u32 %v10136_v56, %v8560_v9  ;;  %v3872_v35 = vmul.f32 0.2, %v3840_v19  ;;  %v9359_v38 = vor.u32 %v10338_v34, %v9358_v25  ;;  %vm3856_vm11 = vcmp.gt.f32.partialorder %v3840_v19, 0.0  ;;  %v8512_v57 = vld [vmem:[#allocation8 + $0x150] sm:$0xf0] }
 0x28b   :  { %v8672_v42 = vld [vmem:[#allocation8 + $0x290] sm:$0xf0]  ;;  %v10088_v13 = vld [vmem:[#allocation8 + $0x24] sm:$0xf]  ;;  %v9327_v9 = vor.u32 %v10330_v27, %v9326_v52  ;;  %v9311_v10 = vor.u32 %v10326_v18, %v9310_v44  ;;  %v9294_v25 = vld [vmem:[#allocation8 + $0x760] sm:$0xf] }
 0x28c   :  { %5515 = vmatpush.bf16.msrb.mxu3 %v8879_v53  ;;  %5551 = vmatpush.bf16.msrb.mxu0 %v9359_v38  ;;  %v3888_v36 = vsel %vm3856_vm11, %v3840_v19, %v3872_v35  ;;  %v10120_v58 = vld [vmem:[#allocation8 + $0x124] sm:$0xf]  ;;  %v8496_v56 = vld [vmem:[#allocation8 + $0x130] sm:$0xf0]  ;;  %v11166_v26 = vpop.f32.mrf.mxu0  ;;  %v10322_v34 = vld [vmem:[#allocation8 + $0x76c] sm:$0xf0] }
 0x28d   :  { %5529 = vmatpush.bf16.msrb.mxu1 %v9007_v48  ;;  %v3618_v21 = vpop.f32.mrf.mxu3  ;;  %v10096_v48 = vld [vmem:[#allocation8 + $0x64] sm:$0xf]  ;;  %v8656_v31 = vld [vmem:[#allocation8 + $0x270] sm:$0xf0]  ;;  %v8499_v19 = vor.u32 %v10120_v58, %v8496_v56  ;;  %v9295_v51 = vor.u32 %v10322_v34, %v9294_v25  ;;  %v9262_v52 = vld [vmem:[#allocation8 + $0x720] sm:$0xf] }
 0x28e   :  { %5543 = vmatpush.bf16.msrb.mxu2 %v9135_v1  ;;  %v3619_v53 = vadd.f32 %v3618_v21, %v3605_v6  ;;  %v8675_v1 = vor.u32 %v10164_v29, %v8672_v42  ;;  %v10084_v59 = vld [vmem:[#allocation8 + $0x4] sm:$0xf]  ;;  %v8480_v60 = vld [vmem:[#allocation8 + $0x110] sm:$0xf0]  ;;  %v10314_v27 = vld [vmem:[#allocation8 + $0x72c] sm:$0xf0] }
 0x28f   :  { %v10116_v33 = vld [vmem:[#allocation8 + $0x104] sm:$0xf]  ;;  %v8976_v21 = vld [vmem:[#allocation8 + $0x4f0] sm:$0xf0] }
 0x290   :  { %5516 = vmatpush.bf16.msrb.mxu3 %v8863_v0  ;;  %v3848_v32 = vadd.f32 %v3824_v24, %v3619_v53  ;;  %v8403_v0 = vor.u32 %v10096_v48, %v8400_v55  ;;  %5552 = vmatpush.bf16.msrb.mxu0 %v9343_v47  ;;  %v10272_v30 = vld [vmem:[#allocation8 + $0x5e4] sm:$0xf]  ;;  %v9104_v4 = vld [vmem:[#allocation8 + $0x5f0] sm:$0xf0]  ;;  %v8483_v55 = vor.u32 %v10116_v33, %v8480_v60  ;;  %v9246_v33 = vld [vmem:[#allocation8 + $0x700] sm:$0xf] }
 0x291   :  { %5530 = vmatpush.bf16.msrb.mxu1 %v8991_v45  ;;  %v8531_v45 = vor.u32 %v10128_v41, %v8528_v54  ;;  %v10156_v53 = vld [vmem:[#allocation8 + $0x244] sm:$0xf]  ;;  %v8640_v48 = vld [vmem:[#allocation8 + $0x250] sm:$0xf0] }
 0x292   :  { %5544 = vmatpush.bf16.msrb.mxu2 %v9119_v2  ;;  %vm3864_vm12 = vcmp.gt.f32.partialorder %v3848_v32, 0.0  ;;  %v3880_v62 = vmul.f32 0.2, %v3848_v32  ;;  %v8352_v2 = vld [vmem:[#allocation8 + $0x10] sm:$0xf0] }
 0x293   :  { %5517 = vmatmul.bf16.vlgmr.msrb.gmra.mxu3 %v11159_v5  ;;  %v8960_v41 = vld [vmem:[#allocation8 + $0x4d0] sm:$0xf0]  ;;  %v10268_v54 = vld [vmem:[#allocation8 + $0x5c4] sm:$0xf] }
 0x294   :  { %5565 = vmatpush.bf16.msra.mxu3 %v8467_v40  ;;  %v3896_v40 = vsel %vm3864_vm12, %v3848_v32, %v3880_v62  ;;  %5553 = vmatpush.bf16.msrb.mxu0 %v9327_v9  ;;  %v9107_v32 = vor.u32 %v10272_v30, %v9104_v4  ;;  %v9088_v62 = vld [vmem:[#allocation8 + $0x5d0] sm:$0xf0]  ;;  %v11168_v15 = vpop.f32.mrf.mxu0  ;;  %v10148_v42 = vld [vmem:[#allocation8 + $0x204] sm:$0xf] }
 0x295   :  { %5579 = vmatpush.bf16.msra.mxu1 %v8595_v8  ;;  %v10092_v8 = vld [vmem:[#allocation8 + $0x44] sm:$0xf]  ;;  %v11163_v17 = vpack.c.bf16 %v3896_v40, %v3888_v36  ;;  %v3644_v38 = vpop.f32.mrf.mxu3  ;;  %v9278_v36 = vld [vmem:[#allocation8 + $0x740] sm:$0xf]  ;;  %v10318_v40 = vld [vmem:[#allocation8 + $0x74c] sm:$0xf0] }
 0x296   :  { %5593 = vmatpush.bf16.msra.mxu2 %v8723_v7  ;;  %v8387_v24 = vor.u32 %v10092_v8, %v8384_v39  ;;  %v10240_v7 = vld [vmem:[#allocation8 + $0x4e4] sm:$0xf]  ;;  %v9091_v39 = vor.u32 %v10268_v54, %v9088_v62  ;;  %v8944_v28 = vld [vmem:[#allocation8 + $0x4b0] sm:$0xf0]  ;;  %v9279_v29 = vor.u32 %v10318_v40, %v9278_v36 }
 0x297   :  { %5531 = vmatmul.bf16.vlgmr.msrb.gmra.mxu1 %v11163_v17  ;;  %v8979_v35 = vor.u32 %v10240_v7, %v8976_v21  ;;  %v9072_v47 = vld [vmem:[#allocation8 + $0x5b0] sm:$0xf0]  ;;  %v10228_v9 = vld [vmem:[#allocation8 + $0x484] sm:$0xf] }
 0x298   :  { %5566 = vmatpush.bf16.msra.mxu3 %v8451_v3  ;;  %v8515_v3 = vor.u32 %v10124_v16, %v8512_v57  ;;  %5554 = vmatpush.bf16.msrb.mxu0 %v9311_v10  ;;  %v10264_v16 = vld [vmem:[#allocation8 + $0x5a4] sm:$0xf]  ;;  %v8912_v21 = vld [vmem:[#allocation8 + $0x470] sm:$0xf0] }
 0x299   :  { %5580 = vmatpush.bf16.msra.mxu1 %v8579_v37  ;;  %v8368_v37 = vld [vmem:[#allocation8 + $0x30] sm:$0xf0]  ;;  %v9075_v56 = vor.u32 %v10264_v16, %v9072_v47  ;;  %v10224_v7 = vld [vmem:[#allocation8 + $0x464] sm:$0xf] }
 0x29a   :  { %5594 = vmatpush.bf16.msra.mxu2 %v8707_v14  ;;  %v8371_v6 = vor.u32 %v10088_v13, %v8368_v37  ;;  %v8643_v14 = vor.u32 %v10156_v53, %v8640_v48  ;;  %v8848_v30 = vld [vmem:[#allocation8 + $0x3f0] sm:$0xf0]  ;;  %v10256_v53 = vld [vmem:[#allocation8 + $0x564] sm:$0xf]  ;;  %v8915_v34 = vor.u32 %v10224_v7, %v8912_v21 }
 0x29b   :  { %v9040_v48 = vld [vmem:[#allocation8 + $0x570] sm:$0xf0]  ;;  %v10204_v54 = vld [vmem:[#allocation8 + $0x3c4] sm:$0xf] }
 0x29c   :  { %5567 = vmatpush.bf16.msra.mxu3 %v8435_v61  ;;  %v8659_v61 = vor.u32 %v10160_v46, %v8656_v31  ;;  %5555 = vmatpush.bf16.msrb.mxu0 %v9295_v51  ;;  %v8928_v46 = vld [vmem:[#allocation8 + $0x490] sm:$0xf0]  ;;  %v10260_v31 = vld [vmem:[#allocation8 + $0x584] sm:$0xf]  ;;  %v3714_v10 = vpop.f32.mrf.mxu0 }
 0x29d   :  { %5581 = vmatpush.bf16.msra.mxu1 %v8563_v11  ;;  %v3630_v11 = vpop.f32.mrf.mxu1  ;;  %v8931_v44 = vor.u32 %v10228_v9, %v8928_v46  ;;  %v10252_v62 = vld [vmem:[#allocation8 + $0x544] sm:$0xf]  ;;  %v9024_v51 = vld [vmem:[#allocation8 + $0x550] sm:$0xf0] }
 0x29e   :  { %5595 = vmatpush.bf16.msra.mxu2 %v8691_v22  ;;  %v10232_v22 = vld [vmem:[#allocation8 + $0x4a4] sm:$0xf]  ;;  %v8864_v9 = vld [vmem:[#allocation8 + $0x410] sm:$0xf0] }
 0x29f   :  { %v8947_v58 = vor.u32 %v10232_v22, %v8944_v28  ;;  %v10216_v40 = vld [vmem:[#allocation8 + $0x424] sm:$0xf]  ;;  %v9027_v22 = vor.u32 %v10252_v62, %v9024_v51  ;;  %v8880_v28 = vld [vmem:[#allocation8 + $0x430] sm:$0xf0]  ;;  %v8438_v51 = vld [vmem:[#allocation8 + $0xa8] sm:$0xf] }
 0x2a0   :  { %5568 = vmatpush.bf16.msra.mxu3 %v8419_v20  ;;  %v8355_v20 = vor.u32 %v10084_v59, %v8352_v2  ;;  %v9056_v59 = vld [vmem:[#allocation8 + $0x590] sm:$0xf0]  ;;  %5556 = vmatpush.bf16.msrb.mxu0 %v9279_v29  ;;  %v9263_v2 = vor.u32 %v10314_v27, %v9262_v52  ;;  %v10200_v16 = vld [vmem:[#allocation8 + $0x3a4] sm:$0xf]  ;;  %v8883_v27 = vor.u32 %v10216_v40, %v8880_v28  ;;  %v8566_v40 = vld [vmem:[#allocation8 + $0x1a8] sm:$0xf] }
 0x2a1   :  { %5582 = vmatpush.bf16.msra.mxu1 %v8547_v43  ;;  %v10236_v43 = vld [vmem:[#allocation8 + $0x4c4] sm:$0xf]  ;;  %v9059_v18 = vor.u32 %v10260_v31, %v9056_v59  ;;  %v8800_v31 = vld [vmem:[#allocation8 + $0x390] sm:$0xf0] }
 0x2a2   :  { %5596 = vmatpush.bf16.msra.mxu2 %v8675_v1  ;;  %v8963_v8 = vor.u32 %v10236_v43, %v8960_v41  ;;  %v8608_v1 = vld [vmem:[#allocation8 + $0x210] sm:$0xf0]  ;;  %v9043_v43 = vor.u32 %v10256_v53, %v9040_v48  ;;  %v10248_v29 = vld [vmem:[#allocation8 + $0x524] sm:$0xf]  ;;  %v8454_v48 = vld [vmem:[#allocation8 + $0xc8] sm:$0xf] }
 0x2a3   :  { %v8611_v13 = vor.u32 %v10148_v42, %v8608_v1  ;;  %v8896_v41 = vld [vmem:[#allocation8 + $0x450] sm:$0xf0]  ;;  %v10196_v46 = vld [vmem:[#allocation8 + $0x384] sm:$0xf] }
 0x2a4   :  { %5569 = vmatpush.bf16.msra.mxu3 %v8403_v0  ;;  %v10152_v0 = vld [vmem:[#allocation8 + $0x224] sm:$0xf]  ;;  %5557 = vmatpush.bf16.msrb.mxu0 %v9263_v2  ;;  %v9008_v42 = vld [vmem:[#allocation8 + $0x530] sm:$0xf0] }
 0x2a5   :  { %5583 = vmatpush.bf16.msra.mxu1 %v8531_v45  ;;  %v8624_v45 = vld [vmem:[#allocation8 + $0x230] sm:$0xf0]  ;;  %v3632_v57 = vpop.f32.mrf.mxu1  ;;  %v10244_v59 = vld [vmem:[#allocation8 + $0x504] sm:$0xf] }
 0x2a6   :  { %5597 = vmatpush.bf16.msra.mxu2 %v8659_v61  ;;  %v8627_v50 = vor.u32 %v10152_v0, %v8624_v45  ;;  %v10310_v61 = vld [vmem:[#allocation8 + $0x70c] sm:$0xf0]  ;;  %v8992_v2 = vld [vmem:[#allocation8 + $0x510] sm:$0xf0]  ;;  %v10184_v28 = vld [vmem:[#allocation8 + $0x324] sm:$0xf] }
 0x2a7   :  { %v9232_v62 = vld [vmem:[#allocation8 + $0x6f0] sm:$0xf0] }
 0x2a8   :  { %5570 = vmatpush.bf16.msra.mxu3 %v8387_v24  ;;  %v11279_v24 = vld [vmem:[#allocation24_spill] sm:$0xff] }
 0x2a9   :  { %5584 = vmatpush.bf16.msra.mxu1 %v8515_v3  ;;  %v3631_v3 = vadd.f32 %v3630_v11, %v11279_v24  ;;  %v3672_v11 = vpop.f32.mrf.mxu2  ;;  %v3716_v24 = vpop.f32.mrf.mxu0 }
 0x2aa   :  { %5598 = vmatpush.bf16.msra.mxu2 %v8643_v14  ;;  %v9247_v14 = vor.u32 %v10310_v61, %v9246_v33  ;;  %v8470_v33 = vld [vmem:[#allocation8 + $0xe8] sm:$0xf] }
 0x2ab   :  { %v3645_v37 = vadd.f32 %v3644_v38, %v3631_v3  ;;  %v8832_v38 = vld [vmem:[#allocation8 + $0x3d0] sm:$0xf0] }
 0x2ac   :  { %5571 = vmatpush.bf16.msra.mxu3 %v8371_v6  ;;  %v3646_v6 = vpop.f32.mrf.mxu3  ;;  %5558 = vmatpush.bf16.msrb.mxu0 %v9247_v14  ;;  %v8835_v45 = vor.u32 %v10204_v54, %v8832_v38  ;;  %v8784_v14 = vld [vmem:[#allocation8 + $0x370] sm:$0xf0] }
 0x2ad   :  { %5585 = vmatpush.bf16.msra.mxu1 %v8499_v19  ;;  %v10208_v19 = vld [vmem:[#allocation8 + $0x3e4] sm:$0xf]  ;;  %v3659_v60 = vadd.f32 %v11166_v26, %v3645_v37  ;;  %v3686_v4 = vpop.f32.mrf.mxu1 }
 0x2ae   :  { %5599 = vmatpush.bf16.msra.mxu2 %v8627_v50  ;;  %v8851_v25 = vor.u32 %v10208_v19, %v8848_v30  ;;  %v10147_v19 = vld [vmem:[#allocation8 + $0x1f4] sm:$0xf0]  ;;  %v8995_v30 = vor.u32 %v10244_v59, %v8992_v2  ;;  %v8736_v59 = vld [vmem:[#allocation8 + $0x310] sm:$0xf0] }
 0x2b0   :  { %5572 = vmatpush.bf16.msra.mxu3 %v8355_v20  ;;  %v11280_v20 = vld [vmem:[#allocation28_spill] sm:$0xff]  ;;  %5607 = vmatpush.bf16.msra.mxu0 %v8851_v25  ;;  %v8582_v25 = vld [vmem:[#allocation8 + $0x1c8] sm:$0xf] }
 0x2b1   :  { %5586 = vmatpush.bf16.msra.mxu1 %v8483_v55  ;;  %v3633_v55 = vadd.f32 %v3632_v57, %v11280_v20  ;;  %v8816_v57 = vld [vmem:[#allocation8 + $0x3b0] sm:$0xf0]  ;;  %v3674_v47 = vpop.f32.mrf.mxu2 }
 0x2b2   :  { %5600 = vmatpush.bf16.msra.mxu2 %v8611_v13  ;;  %v8819_v1 = vor.u32 %v10200_v16, %v8816_v57  ;;  %v11176_v13 = vld [vmem:[#allocation7] sm:$0xff]  ;;  %v8752_v16 = vld [vmem:[#allocation8 + $0x330] sm:$0xf0] }
 0x2b3   :  { %5573 = vmatmul.bf16.vlgmr.msra.gmra.mxu3 %v11131_v23  ;;  %v3647_v26 = vadd.f32 %v3646_v6, %v3633_v55  ;;  %v3825_v52 = vperm.slane %v11176_v13, 6  ;;  %v8598_v6 = vld [vmem:[#allocation8 + $0x1e8] sm:$0xf]  ;;  %v10111_v55 = vld [vmem:[#allocation8 + $0xd4] sm:$0xf0] }
 0x2b4   :  { %5621 = vmatpush.bf16.msrb.mxu3 %v8979_v35  ;;  %5587 = vmatmul.bf16.vlgmr.msra.gmra.mxu1 %v11133_v63  ;;  %v10220_v35 = vld [vmem:[#allocation8 + $0x444] sm:$0xf]  ;;  %v3700_v50 = vpop.f32.mrf.mxu3  ;;  %v8599_v53 = vor.u32 %v10147_v19, %v8598_v6  ;;  %v9200_v6 = vld [vmem:[#allocation8 + $0x6b0] sm:$0xf0]  ;;  %v8406_v19 = vld [vmem:[#allocation8 + $0x68] sm:$0xf] }
 0x2b5   :  { %5635 = vmatpush.bf16.msrb.mxu1 %v9107_v32  ;;  %v3673_v32 = vadd.f32 %v3672_v11, %v3659_v60  ;;  %v8899_v36 = vor.u32 %v10220_v35, %v8896_v41  ;;  %5608 = vmatpush.bf16.msra.mxu0 %v8835_v45  ;;  %v3688_v3 = vpop.f32.mrf.mxu1  ;;  %v10115_v11 = vld [vmem:[#allocation8 + $0xf4] sm:$0xf0]  ;;  %v8803_v60 = vor.u32 %v10196_v46, %v8800_v31  ;;  %v8768_v41 = vld [vmem:[#allocation8 + $0x350] sm:$0xf0]  ;;  %v10180_v31 = vld [vmem:[#allocation8 + $0x304] sm:$0xf] }
 0x2b6   :  { %v8455_v45 = vor.u32 %v10111_v55, %v8454_v48  ;;  %v8390_v55 = vld [vmem:[#allocation8 + $0x48] sm:$0xf] }
 0x2b7   :  { %v3687_v0 = vadd.f32 %v3686_v4, %v3673_v32  ;;  %v8471_v4 = vor.u32 %v10115_v11, %v8470_v33  ;;  %v10296_v11 = vld [vmem:[#allocation8 + $0x6a4] sm:$0xf] }
 0x2b8   :  { %5622 = vmatpush.bf16.msrb.mxu3 %v8963_v8  ;;  %v3661_v8 = vadd.f32 %v11168_v15, %v3647_v26  ;;  %v10212_v15 = vld [vmem:[#allocation8 + $0x404] sm:$0xf] }
 0x2b9   :  { %5636 = vmatpush.bf16.msrb.mxu1 %v9091_v39  ;;  %v3701_v39 = vadd.f32 %v3700_v50, %v3687_v0  ;;  %5609 = vmatpush.bf16.msra.mxu0 %v8819_v1  ;;  %v3728_v32 = vpop.f32.mrf.mxu2  ;;  %v10304_v26 = vld [vmem:[#allocation8 + $0x6e4] sm:$0xf]  ;;  %v3742_v0 = vpop.f32.mrf.mxu0 }
 0x2ba   :  { %v3675_v37 = vadd.f32 %v3674_v47, %v3661_v8 }
 0x2bc   :  { %5623 = vmatpush.bf16.msrb.mxu3 %v8947_v58  ;;  %v3715_v58 = vadd.f32 %v3714_v10, %v3701_v39  ;;  %v3689_v61 = vadd.f32 %v3688_v3, %v3675_v37  ;;  %v10192_v10 = vld [vmem:[#allocation8 + $0x364] sm:$0xf]  ;;  %v10139_v39 = vld [vmem:[#allocation8 + $0x1b4] sm:$0xf0]  ;;  %v8550_v37 = vld [vmem:[#allocation8 + $0x188] sm:$0xf] }
 0x2bd   :  { %5637 = vmatpush.bf16.msrb.mxu1 %v9075_v56  ;;  %v9011_v56 = vor.u32 %v10248_v29, %v9008_v42  ;;  %5610 = vmatpush.bf16.msra.mxu0 %v8803_v60  ;;  %v8787_v35 = vor.u32 %v10192_v10, %v8784_v14  ;;  %v9235_v29 = vor.u32 %v10304_v26, %v9232_v62  ;;  %v10300_v3 = vld [vmem:[#allocation8 + $0x6c4] sm:$0xf]  ;;  %v11281_v60 = vld [vmem:[#allocation25_spill] sm:$0xff]  ;;  %v10127_v26 = vld [vmem:[#allocation8 + $0x154] sm:$0xf0] }
 0x2be   :  { %v3841_v7 = vadd.f32 %v3825_v52, %v3715_v58  ;;  %v10135_v58 = vld [vmem:[#allocation8 + $0x194] sm:$0xf0]  ;;  %v10292_v14 = vld [vmem:[#allocation8 + $0x684] sm:$0xf] }
 0x2c0   :  { %5624 = vmatpush.bf16.msrb.mxu3 %v8931_v44  ;;  %v3702_v44 = vpop.f32.mrf.mxu3  ;;  %v3873_v54 = vmul.f32 0.2, %v3841_v7  ;;  %vm3857_vm13 = vcmp.gt.f32.partialorder %v3841_v7, 0.0 }
 0x2c1   :  { %5638 = vmatpush.bf16.msrb.mxu1 %v9059_v18  ;;  %v8867_v18 = vor.u32 %v10212_v15, %v8864_v9  ;;  %v3703_v21 = vadd.f32 %v3702_v44, %v3689_v61  ;;  %5611 = vmatpush.bf16.msra.mxu0 %v8787_v35  ;;  %v10103_v15 = vld [vmem:[#allocation8 + $0x94] sm:$0xf0]  ;;  %v3730_v2 = vpop.f32.mrf.mxu2  ;;  %v8551_v61 = vor.u32 %v10135_v58, %v8550_v37  ;;  %v3744_v10 = vpop.f32.mrf.mxu0  ;;  %v8518_v35 = vld [vmem:[#allocation8 + $0x148] sm:$0xf] }
 0x2c2   :  { %v3889_v57 = vsel %vm3857_vm13, %v3841_v7, %v3873_v54  ;;  %v3729_v44 = vadd.f32 %v3728_v32, %v11281_v60  ;;  %v8534_v7 = vld [vmem:[#allocation8 + $0x168] sm:$0xf]  ;;  %vm6505_vm13 = vcmask 122880  }
 0x2c3   :  { %v3717_v20 = vadd.f32 %v3716_v24, %v3703_v21  ;;  %v8567_v24 = vor.u32 %v10139_v39, %v8566_v40  ;;  %v10131_v21 = vld [vmem:[#allocation8 + $0x174] sm:$0xf0]  ;;  %v11282_v40 = vld [vmem:[#allocation29_spill] sm:$0xff] }
 0x2c4   :  { %5625 = vmatpush.bf16.msrb.mxu3 %v8915_v34  ;;  %v10143_v34 = vld [vmem:[#allocation8 + $0x1d4] sm:$0xf0]  ;;  %v8535_v48 = vor.u32 %v10131_v21, %v8534_v7  ;;  %v8486_v58 = vld [vmem:[#allocation8 + $0x108] sm:$0xf] }
 0x2c5   :  { %5639 = vmatpush.bf16.msrb.mxu1 %v9043_v43  ;;  %v10188_v43 = vld [vmem:[#allocation8 + $0x344] sm:$0xf]  ;;  %v3849_v38 = vadd.f32 %v3825_v52, %v3717_v20  ;;  %v8583_v50 = vor.u32 %v10143_v34, %v8582_v25  ;;  %v9216_v52 = vld [vmem:[#allocation8 + $0x6d0] sm:$0xf0]  ;;  %v3743_v25 = vadd.f32 %v3742_v0, %v3729_v44  ;;  %v10095_v34 = vld [vmem:[#allocation8 + $0x54] sm:$0xf0] }
 0x2c6   :  { %v9219_v46 = vor.u32 %v10300_v3, %v9216_v52  ;;  %v9184_v20 = vld [vmem:[#allocation8 + $0x690] sm:$0xf0]  ;;  %v8391_v62 = vor.u32 %v10095_v34, %v8390_v55  ;;  %v10091_v39 = vld [vmem:[#allocation8 + $0x34] sm:$0xf0]  ;;  %v8358_v52 = vld [vmem:[#allocation8 + $0x8] sm:$0xf] }
 0x2c7   :  { %vm3865_vm14 = vcmp.gt.f32.partialorder %v3849_v38, 0.0  ;;  %v3881_v8 = vmul.f32 0.2, %v3849_v38  ;;  %v9152_v3 = vld [vmem:[#allocation8 + $0x650] sm:$0xf0] }
 0x2c8   :  { %5626 = vmatpush.bf16.msrb.mxu3 %v8899_v36  ;;  %v10107_v36 = vld [vmem:[#allocation8 + $0xb4] sm:$0xf0]  ;;  %v10280_v44 = vld [vmem:[#allocation8 + $0x624] sm:$0xf] }
 0x2c9   :  { %5640 = vmatpush.bf16.msrb.mxu1 %v9027_v22  ;;  %v8771_v22 = vor.u32 %v10188_v43, %v8768_v41  ;;  %v3897_v47 = vsel %vm3865_vm14, %v3849_v38, %v3881_v8  ;;  %v8439_v1 = vor.u32 %v10107_v36, %v8438_v51  ;;  %v9187_v41 = vor.u32 %v10292_v14, %v9184_v20  ;;  %v8374_v36 = vld [vmem:[#allocation8 + $0x28] sm:$0xf]  ;;  %v10271_v20 = vld [vmem:[#allocation8 + $0x5d4] sm:$0xf0] }
 0x2ca   :  { %v11182_v42 = vpack.c.bf16 %v3897_v47, %v3889_v57  ;;  %v8519_v51 = vor.u32 %v10127_v26, %v8518_v35  ;;  %v3731_v8 = vadd.f32 %v3730_v2, %v11282_v40  ;;  %v10275_v2 = vld [vmem:[#allocation8 + $0x5f4] sm:$0xf0]  ;;  %v9094_v14 = vld [vmem:[#allocation8 + $0x5c8] sm:$0xf] }
 0x2cb   :  { %5612 = vmatpush.bf16.msra.mxu0 %v8771_v22  ;;  %v8502_v22 = vld [vmem:[#allocation8 + $0x128] sm:$0xf]  ;;  %v10267_v40 = vld [vmem:[#allocation8 + $0x5b4] sm:$0xf0] }
 0x2cc   :  { %5627 = vmatpush.bf16.msrb.mxu3 %v8883_v27  ;;  %v8422_v27 = vld [vmem:[#allocation8 + $0x88] sm:$0xf]  ;;  %v3756_v9 = vpop.f32.mrf.mxu1  ;;  %5545 = vmatmul.bf16.vlgmr.msrb.gmra.mxu2 %v11182_v42 }
 0x2cd   :  { %5641 = vmatpush.bf16.msrb.mxu1 %v9011_v56  ;;  %v8755_v56 = vor.u32 %v10184_v28, %v8752_v16  ;;  %5649 = vmatpush.bf16.msrb.mxu2 %v9235_v29  ;;  %v8423_v33 = vor.u32 %v10103_v15, %v8422_v27  ;;  %v3757_v43 = vadd.f32 %v3756_v9, %v3743_v25  ;;  %v10123_v28 = vld [vmem:[#allocation8 + $0x134] sm:$0xf0]  ;;  %v10284_v29 = vld [vmem:[#allocation8 + $0x644] sm:$0xf]  ;;  %v8982_v9 = vld [vmem:[#allocation8 + $0x4e8] sm:$0xf] }
 0x2ce   :  { %v10087_v27 = vld [vmem:[#allocation8 + $0x14] sm:$0xf0]  ;;  %v3745_v15 = vadd.f32 %v3744_v10, %v3731_v8  ;;  %v9136_v10 = vld [vmem:[#allocation8 + $0x630] sm:$0xf0] }
 0x2cf   :  { %5613 = vmatpush.bf16.msra.mxu0 %v8755_v56  ;;  %v10119_v56 = vld [vmem:[#allocation8 + $0x114] sm:$0xf0] }
 0x2d0   :  { %5628 = vmatpush.bf16.msrb.mxu3 %v8867_v18  ;;  %v10099_v18 = vld [vmem:[#allocation8 + $0x74] sm:$0xf0]  ;;  %v8487_v60 = vor.u32 %v10119_v56, %v8486_v58 }
 0x2d1   :  { %5642 = vmatpush.bf16.msrb.mxu1 %v8995_v30  ;;  %v8739_v30 = vor.u32 %v10180_v31, %v8736_v59  ;;  %5650 = vmatpush.bf16.msrb.mxu2 %v9219_v46  ;;  %v10243_v31 = vld [vmem:[#allocation8 + $0x4f4] sm:$0xf0]  ;;  %v9110_v59 = vld [vmem:[#allocation8 + $0x5e8] sm:$0xf] }
 0x2d2   :  { %v8983_v21 = vor.u32 %v10243_v31, %v8982_v9  ;;  %v10171_v31 = vld [vmem:[#allocation8 + $0x2b4] sm:$0xf0] }
 0x2d3   :  { %5629 = vmatmul.bf16.vlgmr.msrb.gmra.mxu3 %v11159_v5  ;;  %5614 = vmatpush.bf16.msra.mxu0 %v8739_v30  ;;  %v9111_v30 = vor.u32 %v10275_v2, %v9110_v59 }
 0x2d4   :  { %5677 = vmatpush.bf16.msra.mxu3 %v8471_v4  ;;  %5643 = vmatmul.bf16.vlgmr.msrb.gmra.mxu1 %v11163_v17  ;;  %v9203_v4 = vor.u32 %v10296_v11, %v9200_v6  ;;  %v3758_v32 = vpop.f32.mrf.mxu1  ;;  %v3798_v16 = vpop.f32.mrf.mxu0  ;;  %v3826_v11 = vperm.slane %v11176_v13, 7  ;;  %v9139_v13 = vor.u32 %v10280_v44, %v9136_v10  ;;  %v9344_v44 = vld [vmem:[#allocation8 + $0x7d0] sm:$0xf0] }
 0x2d5   :  { %5691 = vmatpush.bf16.msra.mxu1 %v8599_v53  ;;  %v8407_v53 = vor.u32 %v10099_v18, %v8406_v19  ;;  %v8359_v19 = vor.u32 %v10087_v27, %v8358_v52  ;;  %v10336_v52 = vld [vmem:[#allocation8 + $0x7e4] sm:$0xf] }
 0x2d6   :  { %5651 = vmatpush.bf16.msrb.mxu2 %v9203_v4  ;;  %v3770_v54 = vpop.f32.mrf.mxu3  ;;  %v8966_v4 = vld [vmem:[#allocation8 + $0x4c8] sm:$0xf] }
 0x2d7   :  { %v3771_v0 = vadd.f32 %v3770_v54, %v3757_v43  ;;  %v10276_v43 = vld [vmem:[#allocation8 + $0x604] sm:$0xf]  ;;  %v8726_v54 = vld [vmem:[#allocation8 + $0x2e8] sm:$0xf] }
 0x2d8   :  { %5678 = vmatpush.bf16.msra.mxu3 %v8455_v45  ;;  %v3784_v38 = vpop.f32.mrf.mxu2  ;;  %v10288_v45 = vld [vmem:[#allocation8 + $0x664] sm:$0xf] }
 0x2d9   :  { %5692 = vmatpush.bf16.msra.mxu1 %v8583_v50  ;;  %v9168_v50 = vld [vmem:[#allocation8 + $0x670] sm:$0xf0]  ;;  %v3785_v57 = vadd.f32 %v3784_v38, %v3771_v0  ;;  %v8710_v0 = vld [vmem:[#allocation8 + $0x2c8] sm:$0xf] }
 0x2da   :  { %5652 = vmatpush.bf16.msrb.mxu2 %v9187_v41  ;;  %v9171_v47 = vor.u32 %v10288_v45, %v9168_v50  ;;  %v9120_v41 = vld [vmem:[#allocation8 + $0x610] sm:$0xf0]  ;;  %v10235_v45 = vld [vmem:[#allocation8 + $0x4b4] sm:$0xf0] }
 0x2db   :  { %v3799_v37 = vadd.f32 %v3798_v16, %v3785_v57  ;;  %v9123_v8 = vor.u32 %v10276_v43, %v9120_v41  ;;  %v8886_v41 = vld [vmem:[#allocation8 + $0x428] sm:$0xf] }
 0x2dc   :  { %5679 = vmatpush.bf16.msra.mxu3 %v8439_v1  ;;  %v8375_v1 = vor.u32 %v10091_v39, %v8374_v36  ;;  %v3812_v46 = vpop.f32.mrf.mxu1  ;;  %5601 = vmatmul.bf16.vlgmr.msra.gmra.mxu2 %v11138_v12  ;;  %v3800_v25 = vpop.f32.mrf.mxu0  ;;  %v9078_v36 = vld [vmem:[#allocation8 + $0x5a8] sm:$0xf]  ;;  %v10175_v39 = vld [vmem:[#allocation8 + $0x2d4] sm:$0xf0] }
 0x2dd   :  { %5693 = vmatpush.bf16.msra.mxu1 %v8567_v24  ;;  %v8503_v24 = vor.u32 %v10123_v28, %v8502_v22  ;;  %v3813_v18 = vadd.f32 %v3812_v46, %v3799_v37  ;;  %v8934_v22 = vld [vmem:[#allocation8 + $0x488] sm:$0xf]  ;;  %v8711_v37 = vor.u32 %v10175_v39, %v8710_v0 }
 0x2de   :  { %5653 = vmatpush.bf16.msrb.mxu2 %v9171_v47  ;;  %v3772_v6 = vpop.f32.mrf.mxu3  ;;  %v8694_v46 = vld [vmem:[#allocation8 + $0x2a8] sm:$0xf] }
 0x2df   :  { %v3842_v35 = vadd.f32 %v3826_v11, %v3813_v18  ;;  %v8695_v18 = vor.u32 %v10171_v31, %v8694_v46  ;;  %v8870_v0 = vld [vmem:[#allocation8 + $0x408] sm:$0xf] }
 0x2e0   :  { %5680 = vmatpush.bf16.msra.mxu3 %v8423_v33  ;;  %v3759_v33 = vadd.f32 %v3758_v32, %v3745_v15  ;;  %v9095_v32 = vor.u32 %v10271_v20, %v9094_v14  ;;  %v9360_v15 = vld [vmem:[#allocation8 + $0x7f0] sm:$0xf0]  ;;  %v9030_v14 = vld [vmem:[#allocation8 + $0x548] sm:$0xf]  ;;  %v10255_v20 = vld [vmem:[#allocation8 + $0x554] sm:$0xf0] }
 0x2e1   :  { %5694 = vmatpush.bf16.msra.mxu1 %v8551_v61  ;;  %v9155_v61 = vor.u32 %v10284_v29, %v9152_v3  ;;  %v3874_v28 = vmul.f32 0.2, %v3842_v35  ;;  %v10231_v29 = vld [vmem:[#allocation8 + $0x494] sm:$0xf0]  ;;  %vm3858_vm15 = vcmp.gt.f32.partialorder %v3842_v35, 0.0 }
 0x2e2   :  { %v3773_v7 = vadd.f32 %v3772_v6, %v3759_v33  ;;  %v10263_v3 = vld [vmem:[#allocation8 + $0x594] sm:$0xf0]  ;;  %v8935_v9 = vor.u32 %v10231_v29, %v8934_v22  ;;  %v9363_v33 = vor.u32 %v10336_v52, %v9360_v15  ;;  %v9046_v6 = vld [vmem:[#allocation8 + $0x568] sm:$0xf]  ;;  %v9296_v29 = vld [vmem:[#allocation8 + $0x770] sm:$0xf0] }
 0x2e3   :  { %5654 = vmatpush.bf16.msrb.mxu2 %v9155_v61  ;;  %v3890_v58 = vsel %vm3858_vm15, %v3842_v35, %v3874_v28  ;;  %v8918_v61 = vld [vmem:[#allocation8 + $0x468] sm:$0xf]  ;;  %v10215_v28 = vld [vmem:[#allocation8 + $0x414] sm:$0xf0]  ;;  %v8600_v52 = vld [vmem:[#allocation8 + $0x1f8] sm:$0xf0] }
 0x2e4   :  { %5681 = vmatpush.bf16.msra.mxu3 %v8407_v53  ;;  %v10239_v53 = vld [vmem:[#allocation8 + $0x4d4] sm:$0xf0]  ;;  %v3814_v38 = vpop.f32.mrf.mxu1  ;;  %v8662_v35 = vld [vmem:[#allocation8 + $0x268] sm:$0xf]  ;;  %v8871_v15 = vor.u32 %v10215_v28, %v8870_v0 }
 0x2e5   :  { %5695 = vmatpush.bf16.msra.mxu1 %v8535_v48  ;;  %v3786_v48 = vpop.f32.mrf.mxu2  ;;  %v8967_v34 = vor.u32 %v10239_v53, %v8966_v4  ;;  %v8902_v53 = vld [vmem:[#allocation8 + $0x448] sm:$0xf] }
 0x2e6   :  { %v3787_v55 = vadd.f32 %v3786_v48, %v3773_v7  ;;  %v10223_v48 = vld [vmem:[#allocation8 + $0x454] sm:$0xf0]  ;;  %v9206_v28 = vld [vmem:[#allocation8 + $0x6a8] sm:$0xf] }
 0x2e7   :  { %5655 = vmatpush.bf16.msrb.mxu2 %v9139_v13 }
 0x2e8   :  { %5682 = vmatpush.bf16.msra.mxu3 %v8391_v62  ;;  %v3801_v26 = vadd.f32 %v3800_v25, %v3787_v55  ;;  %v10179_v62 = vld [vmem:[#allocation8 + $0x2f4] sm:$0xf0]  ;;  %v10328_v55 = vld [vmem:[#allocation8 + $0x7a4] sm:$0xf]  ;;  %v9328_v25 = vld [vmem:[#allocation8 + $0x7b0] sm:$0xf0] }
 0x2e9   :  { %5696 = vmatpush.bf16.msra.mxu1 %v8519_v51  ;;  %v8950_v51 = vld [vmem:[#allocation8 + $0x4a8] sm:$0xf]  ;;  %v8727_v57 = vor.u32 %v10179_v62, %v8726_v54  ;;  %v9331_v43 = vor.u32 %v10328_v55, %v9328_v25  ;;  %v10219_v54 = vld [vmem:[#allocation8 + $0x434] sm:$0xf0]  ;;  %v10137_v55 = vld [vmem:[#allocation8 + $0x1ac] sm:$0xf] }
 0x2ea   :  { %v3815_v50 = vadd.f32 %v3814_v38, %v3801_v26  ;;  %v8951_v47 = vor.u32 %v10235_v45, %v8950_v51  ;;  %v10163_v26 = vld [vmem:[#allocation8 + $0x274] sm:$0xf0]  ;;  %v9014_v38 = vld [vmem:[#allocation8 + $0x528] sm:$0xf]  ;;  %v10324_v51 = vld [vmem:[#allocation8 + $0x784] sm:$0xf] }
 0x2eb   :  { %5656 = vmatpush.bf16.msrb.mxu2 %v9123_v8  ;;  %v10251_v62 = vld [vmem:[#allocation8 + $0x534] sm:$0xf0]  ;;  %v9312_v45 = vld [vmem:[#allocation8 + $0x790] sm:$0xf0]  ;;  %v8568_v25 = vld [vmem:[#allocation8 + $0x1b8] sm:$0xf0] }
 0x2ec   :  { %5683 = vmatpush.bf16.msra.mxu3 %v8375_v1  ;;  %v3850_v16 = vadd.f32 %v3826_v11, %v3815_v50  ;;  %v9062_v1 = vld [vmem:[#allocation8 + $0x588] sm:$0xf]  ;;  %v10227_v11 = vld [vmem:[#allocation8 + $0x474] sm:$0xf0]  ;;  %v8663_v50 = vor.u32 %v10163_v26, %v8662_v35  ;;  %v9015_v39 = vor.u32 %v10251_v62, %v9014_v38  ;;  %v9315_v22 = vor.u32 %v10324_v51, %v9312_v45  ;;  %v10308_v26 = vld [vmem:[#allocation8 + $0x704] sm:$0xf] }
 0x2ed   :  { %5697 = vmatpush.bf16.msra.mxu1 %v8503_v24  ;;  %v9079_v24 = vor.u32 %v10267_v40, %v9078_v36  ;;  %v9063_v2 = vor.u32 %v10263_v3, %v9062_v1  ;;  %v8919_v7 = vor.u32 %v10227_v11, %v8918_v61  ;;  %v8887_v36 = vor.u32 %v10219_v54, %v8886_v41  ;;  %v8646_v40 = vld [vmem:[#allocation8 + $0x248] sm:$0xf]  ;;  %v10159_v8 = vld [vmem:[#allocation8 + $0x254] sm:$0xf0]  ;;  %v10113_v1 = vld [vmem:[#allocation8 + $0xec] sm:$0xf] }
 0x2ee   :  { %vm3866_vm0 = vcmp.gt.f32.partialorder %v3850_v16, 0.0  ;;  %v3882_v27 = vmul.f32 0.2, %v3850_v16  ;;  %5657 = vmatmul.bf16.vlgmr.msrb.gmra.mxu2 %v11182_v42  ;;  %v10145_v3 = vld [vmem:[#allocation8 + $0x1ec] sm:$0xf]  ;;  %v8571_v41 = vor.u32 %v10137_v55, %v8568_v25 }
 0x2ef   :  { %5705 = vmatpush.bf16.msra.mxu2 %v8727_v57  ;;  %v10247_v57 = vld [vmem:[#allocation8 + $0x514] sm:$0xf0]  ;;  %v8603_v31 = vor.u32 %v10145_v3, %v8600_v52  ;;  %v10109_v61 = vld [vmem:[#allocation8 + $0xcc] sm:$0xf]  ;;  %v8456_v11 = vld [vmem:[#allocation8 + $0xd8] sm:$0xf0] }
 0x2f0   :  { %5684 = vmatpush.bf16.msra.mxu3 %v8359_v19  ;;  %v3898_v56 = vsel %vm3866_vm0, %v3850_v16, %v3882_v27  ;;  %v10259_v19 = vld [vmem:[#allocation8 + $0x574] sm:$0xf0]  ;;  %v8998_v16 = vld [vmem:[#allocation8 + $0x508] sm:$0xf]  ;;  %v8647_v27 = vor.u32 %v10159_v8, %v8646_v40  ;;  %v10101_v62 = vld [vmem:[#allocation8 + $0x8c] sm:$0xf] }
 0x2f1   :  { %5698 = vmatpush.bf16.msra.mxu1 %v8487_v60  ;;  %v11191_v59 = vpack.c.bf16 %v3898_v56, %v3890_v58  ;;  %v10332_v60 = vld [vmem:[#allocation8 + $0x7c4] sm:$0xf]  ;;  %v9047_v10 = vor.u32 %v10259_v19, %v9046_v6  ;;  %v8630_v56 = vld [vmem:[#allocation8 + $0x228] sm:$0xf]  ;;  %v10141_v6 = vld [vmem:[#allocation8 + $0x1cc] sm:$0xf] }
 0x2f2   :  { %v9347_v4 = vor.u32 %v10332_v60, %v9344_v44  ;;  %v8584_v19 = vld [vmem:[#allocation8 + $0x1d8] sm:$0xf0]  ;;  %v8614_v44 = vld [vmem:[#allocation8 + $0x208] sm:$0xf]  ;;  %v10303_v38 = vld [vmem:[#allocation8 + $0x6d4] sm:$0xf0] }
 0x2f3   :  { %5685 = vmatmul.bf16.vlgmr.msra.gmra.mxu3 %v11131_v23  ;;  %5559 = vmatmul.bf16.vlgmr.msrb.gmra.mxu0 %v11191_v59  ;;  %v9222_v54 = vld [vmem:[#allocation8 + $0x6c8] sm:$0xf]  ;;  %v8424_v51 = vld [vmem:[#allocation8 + $0x98] sm:$0xf0]  ;;  %v10133_v45 = vld [vmem:[#allocation8 + $0x18c] sm:$0xf] }
 0x2f4   :  { %5733 = vmatpush.bf16.msrb.mxu3 %v8983_v21  ;;  %5699 = vmatmul.bf16.vlgmr.msra.gmra.mxu1 %v11133_v63  ;;  %v8678_v21 = vld [vmem:[#allocation8 + $0x288] sm:$0xf]  ;;  %v10211_v40 = vld [vmem:[#allocation8 + $0x3f4] sm:$0xf0]  ;;  %v9223_v0 = vor.u32 %v10303_v38, %v9222_v54  ;;  %v10241_v38 = vld [vmem:[#allocation8 + $0x4ec] sm:$0xf] }
 0x2f5   :  { %5747 = vmatpush.bf16.msrb.mxu1 %v9111_v30  ;;  %5706 = vmatpush.bf16.msra.mxu2 %v8711_v37  ;;  %v10167_v30 = vld [vmem:[#allocation8 + $0x294] sm:$0xf0]  ;;  %v8999_v37 = vor.u32 %v10247_v57, %v8998_v16  ;;  %v10097_v57 = vld [vmem:[#allocation8 + $0x6c] sm:$0xf]  ;;  %v8838_v3 = vld [vmem:[#allocation8 + $0x3c8] sm:$0xf] }
 0x2f6   :  { %5663 = vmatpush.bf16.msrb.mxu0 %v9363_v33  ;;  %v8679_v13 = vor.u32 %v10167_v30, %v8678_v21  ;;  %v9280_v33 = vld [vmem:[#allocation8 + $0x750] sm:$0xf0]  ;;  %v10312_v21 = vld [vmem:[#allocation8 + $0x724] sm:$0xf]  ;;  %v10299_v16 = vld [vmem:[#allocation8 + $0x6b4] sm:$0xf0] }
 0x2f7   :  { %v9264_v30 = vld [vmem:[#allocation8 + $0x730] sm:$0xf0]  ;;  %v10207_v52 = vld [vmem:[#allocation8 + $0x3d4] sm:$0xf0] }
 0x2f8   :  { %5734 = vmatpush.bf16.msrb.mxu3 %v8967_v34  ;;  %v8903_v34 = vor.u32 %v10223_v48, %v8902_v53  ;;  %v9238_v53 = vld [vmem:[#allocation8 + $0x6e8] sm:$0xf]  ;;  %v10307_v48 = vld [vmem:[#allocation8 + $0x6f4] sm:$0xf0] }
 0x2f9   :  { %5748 = vmatpush.bf16.msrb.mxu1 %v9095_v32  ;;  %5707 = vmatpush.bf16.msra.mxu2 %v8695_v18  ;;  %v9031_v32 = vor.u32 %v10255_v20, %v9030_v14  ;;  %v10105_v14 = vld [vmem:[#allocation8 + $0xac] sm:$0xf]  ;;  %v8440_v20 = vld [vmem:[#allocation8 + $0xb8] sm:$0xf0]  ;;  %v9239_v35 = vor.u32 %v10307_v48, %v9238_v53  ;;  %v8806_v53 = vld [vmem:[#allocation8 + $0x388] sm:$0xf] }
 0x2fa   :  { %5664 = vmatpush.bf16.msrb.mxu0 %v9347_v4  ;;  %v8587_v4 = vor.u32 %v10141_v6, %v8584_v19  ;;  %v10199_v48 = vld [vmem:[#allocation8 + $0x394] sm:$0xf0] }
 0x2fb   :  { %v10195_v54 = vld [vmem:[#allocation8 + $0x374] sm:$0xf0] }
 0x2fc   :  { %5735 = vmatpush.bf16.msrb.mxu3 %v8951_v47  ;;  %v10320_v47 = vld [vmem:[#allocation8 + $0x764] sm:$0xf] }
 0x2fd   :  { %5749 = vmatpush.bf16.msrb.mxu1 %v9079_v24  ;;  %5708 = vmatpush.bf16.msra.mxu2 %v8679_v13  ;;  %v8472_v24 = vld [vmem:[#allocation8 + $0xf8] sm:$0xf0]  ;;  %v9299_v58 = vor.u32 %v10320_v47, %v9296_v29 }
 0x2fe   :  { %5665 = vmatpush.bf16.msrb.mxu0 %v9331_v43  ;;  %v8475_v46 = vor.u32 %v10113_v1, %v8472_v24  ;;  %v8443_v43 = vor.u32 %v10105_v14, %v8440_v20  ;;  %v8408_v29 = vld [vmem:[#allocation8 + $0x78] sm:$0xf0]  ;;  %v10129_v1 = vld [vmem:[#allocation8 + $0x16c] sm:$0xf]  ;;  %v9158_v20 = vld [vmem:[#allocation8 + $0x648] sm:$0xf] }
 0x2ff   :  { %v8536_v24 = vld [vmem:[#allocation8 + $0x178] sm:$0xf0] }
 0x300   :  { %5736 = vmatpush.bf16.msrb.mxu3 %v8935_v9  ;;  %v10155_v9 = vld [vmem:[#allocation8 + $0x234] sm:$0xf0] }
 0x301   :  { %5750 = vmatpush.bf16.msrb.mxu1 %v9063_v2  ;;  %5709 = vmatpush.bf16.msra.mxu2 %v8663_v50  ;;  %v10316_v2 = vld [vmem:[#allocation8 + $0x744] sm:$0xf]  ;;  %v8631_v60 = vor.u32 %v10155_v9, %v8630_v56  ;;  %v8552_v50 = vld [vmem:[#allocation8 + $0x198] sm:$0xf0]  ;;  %v10295_v56 = vld [vmem:[#allocation8 + $0x694] sm:$0xf0] }
 0x302   :  { %5666 = vmatpush.bf16.msrb.mxu0 %v9315_v22  ;;  %v9283_v18 = vor.u32 %v10316_v2, %v9280_v33  ;;  %v8555_v22 = vor.u32 %v10133_v45, %v8552_v50  ;;  %v10093_v9 = vld [vmem:[#allocation8 + $0x4c] sm:$0xf]  ;;  %v8520_v33 = vld [vmem:[#allocation8 + $0x158] sm:$0xf0] }
 0x303   :  { %5615 = vmatmul.bf16.vlgmr.msra.gmra.mxu0 %v11142_v49  ;;  %v10125_v2 = vld [vmem:[#allocation8 + $0x14c] sm:$0xf]  ;;  %v9112_v50 = vld [vmem:[#allocation8 + $0x5f8] sm:$0xf0] }
 0x304   :  { %5737 = vmatpush.bf16.msrb.mxu3 %v8919_v7  ;;  %v10151_v7 = vld [vmem:[#allocation8 + $0x214] sm:$0xf0]  ;;  %v10273_v45 = vld [vmem:[#allocation8 + $0x5ec] sm:$0xf] }
 0x305   :  { %5751 = vmatpush.bf16.msrb.mxu1 %v9047_v10  ;;  %5710 = vmatpush.bf16.msra.mxu2 %v8647_v27  ;;  %v8459_v10 = vor.u32 %v10109_v61, %v8456_v11  ;;  %v8615_v13 = vor.u32 %v10151_v7, %v8614_v44  ;;  %v9207_v27 = vor.u32 %v10299_v16, %v9206_v28  ;;  %v8822_v61 = vld [vmem:[#allocation8 + $0x3a8] sm:$0xf]  ;;  %v10203_v11 = vld [vmem:[#allocation8 + $0x3b4] sm:$0xf0]  ;;  %v10089_v7 = vld [vmem:[#allocation8 + $0x2c] sm:$0xf] }
 0x306   :  { %5667 = vmatpush.bf16.msrb.mxu0 %v9299_v58  ;;  %v9190_v58 = vld [vmem:[#allocation8 + $0x688] sm:$0xf]  ;;  %v9115_v16 = vor.u32 %v10273_v45, %v9112_v50 }
 0x307   :  { %v9191_v6 = vor.u32 %v10295_v56, %v9190_v58  ;;  %v9174_v44 = vld [vmem:[#allocation8 + $0x668] sm:$0xf]  ;;  %v10187_v56 = vld [vmem:[#allocation8 + $0x334] sm:$0xf0] }
 0x308   :  { %5738 = vmatpush.bf16.msrb.mxu3 %v8903_v34  ;;  %v9267_v34 = vor.u32 %v10312_v21, %v9264_v30  ;;  %v8823_v21 = vor.u32 %v10203_v11, %v8822_v61  ;;  %v8376_v30 = vld [vmem:[#allocation8 + $0x38] sm:$0xf0]  ;;  %v8774_v28 = vld [vmem:[#allocation8 + $0x348] sm:$0xf]  ;;  %v10265_v61 = vld [vmem:[#allocation8 + $0x5ac] sm:$0xf] }
 0x309   :  { %5752 = vmatpush.bf16.msrb.mxu1 %v9031_v32  ;;  %5711 = vmatpush.bf16.msra.mxu2 %v8631_v60  ;;  %v9248_v32 = vld [vmem:[#allocation8 + $0x710] sm:$0xf0]  ;;  %v8523_v60 = vor.u32 %v10125_v2, %v8520_v33  ;;  %v8379_v55 = vor.u32 %v10089_v7, %v8376_v30  ;;  %v8758_v58 = vld [vmem:[#allocation8 + $0x328] sm:$0xf]  ;;  %v10233_v2 = vld [vmem:[#allocation8 + $0x4ac] sm:$0xf] }
 0x30a   :  { %5668 = vmatpush.bf16.msrb.mxu0 %v9283_v18  ;;  %v9251_v8 = vor.u32 %v10308_v26, %v9248_v32  ;;  %v10291_v18 = vld [vmem:[#allocation8 + $0x674] sm:$0xf0]  ;;  %v8807_v26 = vor.u32 %v10199_v48, %v8806_v53  ;;  %v10117_v32 = vld [vmem:[#allocation8 + $0x10c] sm:$0xf]  ;;  %v8952_v33 = vld [vmem:[#allocation8 + $0x4b8] sm:$0xf0] }
 0x30b   :  { %v9175_v14 = vor.u32 %v10291_v18, %v9174_v44  ;;  %v9080_v11 = vld [vmem:[#allocation8 + $0x5b8] sm:$0xf0]  ;;  %v8742_v44 = vld [vmem:[#allocation8 + $0x308] sm:$0xf]  ;;  %v10183_v18 = vld [vmem:[#allocation8 + $0x314] sm:$0xf0]  ;;  %v8955_v7 = vor.u32 %v10233_v2, %v8952_v33 }
 0x30c   :  { %5739 = vmatpush.bf16.msrb.mxu3 %v8887_v36  ;;  %v8854_v36 = vld [vmem:[#allocation8 + $0x3e8] sm:$0xf]  ;;  %v10173_v30 = vld [vmem:[#allocation8 + $0x2cc] sm:$0xf] }
 0x30d   :  { %5753 = vmatpush.bf16.msrb.mxu1 %v9015_v39  ;;  %5712 = vmatpush.bf16.msra.mxu2 %v8615_v13  ;;  %v8427_v39 = vor.u32 %v10101_v62, %v8424_v51  ;;  %v8855_v47 = vor.u32 %v10211_v40, %v8854_v36  ;;  %v10287_v13 = vld [vmem:[#allocation8 + $0x654] sm:$0xf0]  ;;  %v8984_v62 = vld [vmem:[#allocation8 + $0x4f8] sm:$0xf0]  ;;  %v10261_v53 = vld [vmem:[#allocation8 + $0x58c] sm:$0xf] }
 0x30e   :  { %5669 = vmatpush.bf16.msrb.mxu0 %v9267_v34  ;;  %v10085_v34 = vld [vmem:[#allocation8 + $0xc] sm:$0xf]  ;;  %v9159_v51 = vor.u32 %v10287_v13, %v9158_v20  ;;  %v9366_v48 = vld [vmem:[#allocation8 + $0x7e8] sm:$0xf]  ;;  %v8743_v20 = vor.u32 %v10183_v18, %v8742_v44  ;;  %v9000_v44 = vld [vmem:[#allocation8 + $0x518] sm:$0xf0] }
 0x30f   :  { %v9302_v18 = vld [vmem:[#allocation8 + $0x768] sm:$0xf] }
 0x310   :  { %5740 = vmatpush.bf16.msrb.mxu3 %v8871_v15  ;;  %5713 = vmatmul.bf16.vlgmr.msra.gmra.mxu2 %v11138_v12  ;;  %v8411_v15 = vor.u32 %v10097_v57, %v8408_v29  ;;  %v10191_v57 = vld [vmem:[#allocation8 + $0x354] sm:$0xf0]  ;;  %v8968_v29 = vld [vmem:[#allocation8 + $0x4d8] sm:$0xf0] }
 0x311   :  { %5754 = vmatpush.bf16.msrb.mxu1 %v8999_v37  ;;  %5761 = vmatpush.bf16.msrb.mxu2 %v9239_v35  ;;  %v8539_v37 = vor.u32 %v10129_v1, %v8536_v24  ;;  %v8360_v35 = vld [vmem:[#allocation8 + $0x18] sm:$0xf0]  ;;  %v10269_v1 = vld [vmem:[#allocation8 + $0x5cc] sm:$0xf] }
 0x312   :  { %5670 = vmatpush.bf16.msrb.mxu0 %v9251_v8  ;;  %v8363_v36 = vor.u32 %v10085_v34, %v8360_v35  ;;  %v9096_v24 = vld [vmem:[#allocation8 + $0x5d8] sm:$0xf0]  ;;  %v10169_v34 = vld [vmem:[#allocation8 + $0x2ac] sm:$0xf] }
 0x313   :  { %5741 = vmatmul.bf16.vlgmr.msrb.gmra.mxu3 %v11159_v5  ;;  %v8696_v35 = vld [vmem:[#allocation8 + $0x2b8] sm:$0xf0] }
 0x314   :  { %5789 = vmatpush.bf16.msra.mxu3 %v8475_v46  ;;  %5755 = vmatmul.bf16.vlgmr.msrb.gmra.mxu1 %v11163_v17  ;;  %v8839_v46 = vor.u32 %v10207_v52, %v8838_v3  ;;  %v9126_v52 = vld [vmem:[#allocation8 + $0x608] sm:$0xf] }
 0x315   :  { %5803 = vmatpush.bf16.msra.mxu1 %v8603_v31  ;;  %5762 = vmatpush.bf16.msrb.mxu2 %v9223_v0  ;;  %v8392_v31 = vld [vmem:[#allocation8 + $0x58] sm:$0xf0]  ;;  %v8987_v0 = vor.u32 %v10241_v38, %v8984_v62  ;;  %v9350_v38 = vld [vmem:[#allocation8 + $0x7c8] sm:$0xf]  ;;  %v10335_v62 = vld [vmem:[#allocation8 + $0x7d4] sm:$0xf0] }
 0x316   :  { %5719 = vmatpush.bf16.msra.mxu0 %v8855_v47  ;;  %v8395_v19 = vor.u32 %v10093_v9, %v8392_v31  ;;  %v10237_v47 = vld [vmem:[#allocation8 + $0x4cc] sm:$0xf]  ;;  %v9099_v9 = vor.u32 %v10269_v1, %v9096_v24  ;;  %v8728_v31 = vld [vmem:[#allocation8 + $0x2f8] sm:$0xf0] }
 0x317   :  { %5671 = vmatmul.bf16.vlgmr.msrb.gmra.mxu0 %v11191_v59  ;;  %v10161_v24 = vld [vmem:[#allocation8 + $0x26c] sm:$0xf] }
 0x318   :  { %5790 = vmatpush.bf16.msra.mxu3 %v8459_v10  ;;  %v10121_v10 = vld [vmem:[#allocation8 + $0x12c] sm:$0xf] }
 0x319   :  { %5804 = vmatpush.bf16.msra.mxu1 %v8587_v4  ;;  %5763 = vmatpush.bf16.msrb.mxu2 %v9207_v27  ;;  %v8504_v4 = vld [vmem:[#allocation8 + $0x138] sm:$0xf0]  ;;  %v8775_v27 = vor.u32 %v10191_v57, %v8774_v28  ;;  %v10331_v57 = vld [vmem:[#allocation8 + $0x7b4] sm:$0xf0] }
 0x31a   :  { %5720 = vmatpush.bf16.msra.mxu0 %v8839_v46  ;;  %v8507_v25 = vor.u32 %v10121_v10, %v8504_v4  ;;  %v10177_v46 = vld [vmem:[#allocation8 + $0x2ec] sm:$0xf]  ;;  %v8712_v10 = vld [vmem:[#allocation8 + $0x2d8] sm:$0xf0] }
 0x31b   :  { %v10229_v4 = vld [vmem:[#allocation8 + $0x48c] sm:$0xf]  ;;  %v9032_v28 = vld [vmem:[#allocation8 + $0x558] sm:$0xf0] }
 0x31c   :  { %5791 = vmatpush.bf16.msra.mxu3 %v8443_v43  ;;  %v8488_v43 = vld [vmem:[#allocation8 + $0x118] sm:$0xf0] }
 0x31d   :  { %5805 = vmatpush.bf16.msra.mxu1 %v8571_v41  ;;  %5764 = vmatpush.bf16.msrb.mxu2 %v9191_v6  ;;  %v8790_v41 = vld [vmem:[#allocation8 + $0x368] sm:$0xf]  ;;  %v8491_v40 = vor.u32 %v10117_v32, %v8488_v43  ;;  %v8920_v43 = vld [vmem:[#allocation8 + $0x478] sm:$0xf0] }
 0x31e   :  { %5721 = vmatpush.bf16.msra.mxu0 %v8823_v21  ;;  %v8791_v8 = vor.u32 %v10195_v54, %v8790_v41  ;;  %v9083_v21 = vor.u32 %v10265_v61, %v9080_v11  ;;  %v10257_v41 = vld [vmem:[#allocation8 + $0x56c] sm:$0xf]  ;;  %v9048_v54 = vld [vmem:[#allocation8 + $0x578] sm:$0xf0] }
 0x31f   :  { %v9051_v50 = vor.u32 %v10257_v41, %v9048_v54  ;;  %v8648_v61 = vld [vmem:[#allocation8 + $0x258] sm:$0xf0]  ;;  %v10213_v11 = vld [vmem:[#allocation8 + $0x40c] sm:$0xf]  ;;  %v10315_v54 = vld [vmem:[#allocation8 + $0x734] sm:$0xf0] }
 0x320   :  { %5792 = vmatpush.bf16.msra.mxu3 %v8427_v39  ;;  %v9142_v39 = vld [vmem:[#allocation8 + $0x628] sm:$0xf] }
 0x321   :  { %5806 = vmatpush.bf16.msra.mxu1 %v8555_v22  ;;  %5765 = vmatpush.bf16.msrb.mxu2 %v9175_v14  ;;  %v10283_v22 = vld [vmem:[#allocation8 + $0x634] sm:$0xf0] }
 0x322   :  { %5722 = vmatpush.bf16.msra.mxu0 %v8807_v26  ;;  %v9143_v3 = vor.u32 %v10283_v22, %v9142_v39  ;;  %v10339_v14 = vld [vmem:[#allocation8 + $0x7f4] sm:$0xf0]  ;;  %v10225_v26 = vld [vmem:[#allocation8 + $0x46c] sm:$0xf]  ;;  %v8904_v39 = vld [vmem:[#allocation8 + $0x458] sm:$0xf0] }
 0x323   :  { %v9367_v32 = vor.u32 %v10339_v14, %v9366_v48  ;;  %v8923_v45 = vor.u32 %v10225_v26, %v8920_v43  ;;  %v10253_v22 = vld [vmem:[#allocation8 + $0x54c] sm:$0xf]  ;;  %v8632_v48 = vld [vmem:[#allocation8 + $0x238] sm:$0xf0]  ;;  %v9286_v14 = vld [vmem:[#allocation8 + $0x748] sm:$0xf] }
 0x324   :  { %5793 = vmatpush.bf16.msra.mxu3 %v8411_v15  ;;  %v8971_v15 = vor.u32 %v10237_v47, %v8968_v29  ;;  %v9035_v1 = vor.u32 %v10253_v22, %v9032_v28  ;;  %v10149_v26 = vld [vmem:[#allocation8 + $0x20c] sm:$0xf]  ;;  %v9270_v43 = vld [vmem:[#allocation8 + $0x728] sm:$0xf]  ;;  %v9224_v22 = vld [vmem:[#allocation8 + $0x6d8] sm:$0xf0] }
 0x325   :  { %5807 = vmatpush.bf16.msra.mxu1 %v8539_v37  ;;  %5766 = vmatpush.bf16.msrb.mxu2 %v9159_v51  ;;  %v10279_v37 = vld [vmem:[#allocation8 + $0x614] sm:$0xf0]  ;;  %v8699_v51 = vor.u32 %v10169_v34, %v8696_v35  ;;  %v10209_v28 = vld [vmem:[#allocation8 + $0x3ec] sm:$0xf] }
 0x326   :  { %5723 = vmatpush.bf16.msra.mxu0 %v8791_v8  ;;  %v9127_v6 = vor.u32 %v10279_v37, %v9126_v52  ;;  %v10221_v8 = vld [vmem:[#allocation8 + $0x44c] sm:$0xf] }
 0x327   :  { %v8907_v29 = vor.u32 %v10221_v8, %v8904_v39  ;;  %v10217_v52 = vld [vmem:[#allocation8 + $0x42c] sm:$0xf]  ;;  %v9254_v8 = vld [vmem:[#allocation8 + $0x708] sm:$0xf] }
 0x328   :  { %5794 = vmatpush.bf16.msra.mxu3 %v8395_v19  ;;  %v8759_v19 = vor.u32 %v10187_v56, %v8758_v58  ;;  %v10249_v37 = vld [vmem:[#allocation8 + $0x52c] sm:$0xf]  ;;  %v9016_v58 = vld [vmem:[#allocation8 + $0x538] sm:$0xf0]  ;;  %v9318_v56 = vld [vmem:[#allocation8 + $0x788] sm:$0xf] }
 0x329   :  { %5808 = vmatpush.bf16.msra.mxu1 %v8523_v60  ;;  %5767 = vmatpush.bf16.msrb.mxu2 %v9143_v3  ;;  %v8731_v60 = vor.u32 %v10177_v46, %v8728_v31  ;;  %v8664_v3 = vld [vmem:[#allocation8 + $0x278] sm:$0xf0]  ;;  %v10157_v31 = vld [vmem:[#allocation8 + $0x24c] sm:$0xf]  ;;  %v9019_v33 = vor.u32 %v10249_v37, %v9016_v58  ;;  %v9398_v37 = vld [vmem:[#allocation11 + $0x30] sm:$0xf] }
 0x32a   :  { %5724 = vmatpush.bf16.msra.mxu0 %v8775_v27  ;;  %v8667_v46 = vor.u32 %v10161_v24, %v8664_v3  ;;  %v10301_v39 = vld [vmem:[#allocation8 + $0x6cc] sm:$0xf]  ;;  %v9208_v3 = vld [vmem:[#allocation8 + $0x6b8] sm:$0xf0] }
 0x32b   :  { %v10297_v24 = vld [vmem:[#allocation8 + $0x6ac] sm:$0xf]  ;;  %v10347_v58 = vld [vmem:[#allocation11 + $0x34] sm:$0xf0] }
 0x32c   :  { %5795 = vmatpush.bf16.msra.mxu3 %v8379_v55  ;;  %v8715_v55 = vor.u32 %v10173_v30, %v8712_v10  ;;  %v10355_v30 = vld [vmem:[#allocation11 + $0x74] sm:$0xf0]  ;;  %v8651_v10 = vor.u32 %v10157_v31, %v8648_v61  ;;  %v11207_v61 = vpop.f32.mrf.mxu3 }
 0x32d   :  { %5809 = vmatpush.bf16.msra.mxu1 %v8507_v25  ;;  %5768 = vmatpush.bf16.msrb.mxu2 %v9127_v6  ;;  %v8872_v6 = vld [vmem:[#allocation8 + $0x418] sm:$0xf0] }
 0x32e   :  { %5725 = vmatpush.bf16.msra.mxu0 %v8759_v19  ;;  %v9192_v31 = vld [vmem:[#allocation8 + $0x698] sm:$0xf0] }
 0x330   :  { %5796 = vmatpush.bf16.msra.mxu3 %v8363_v36  ;;  %5769 = vmatmul.bf16.vlgmr.msrb.gmra.mxu2 %v11182_v42  ;;  %v10165_v36 = vld [vmem:[#allocation8 + $0x28c] sm:$0xf] }
 0x331   :  { %5810 = vmatpush.bf16.msra.mxu1 %v8491_v40  ;;  %5817 = vmatpush.bf16.msra.mxu2 %v8731_v60  ;;  %v8680_v40 = vld [vmem:[#allocation8 + $0x298] sm:$0xf0]  ;;  %v10245_v60 = vld [vmem:[#allocation8 + $0x50c] sm:$0xf] }
 0x332   :  { %5726 = vmatpush.bf16.msra.mxu0 %v8743_v20  ;;  %v8683_v47 = vor.u32 %v10165_v36, %v8680_v40  ;;  %v9271_v36 = vor.u32 %v10315_v54, %v9270_v43  ;;  %v10341_v43 = vld [vmem:[#allocation11 + $0x4] sm:$0xf0]  ;;  %v9432_v54 = vld [vmem:[#allocation11 + $0x78] sm:$0xf0] }
 0x333   :  { %5797 = vmatmul.bf16.vlgmr.msra.gmra.mxu3 %v11131_v23  ;;  %v8936_v23 = vld [vmem:[#allocation8 + $0x498] sm:$0xf0] }
 0x334   :  { %5845 = vmatpush.bf16.msrb.mxu3 %v8987_v0  ;;  %5811 = vmatmul.bf16.vlgmr.msra.gmra.mxu1 %v11133_v63  ;;  %v9064_v63 = vld [vmem:[#allocation8 + $0x598] sm:$0xf0]  ;;  %v8939_v25 = vor.u32 %v10229_v4, %v8936_v23  ;;  %v9351_v0 = vor.u32 %v10335_v62, %v9350_v38  ;;  %v8875_v4 = vor.u32 %v10213_v11, %v8872_v6  ;;  %v10305_v38 = vld [vmem:[#allocation8 + $0x6ec] sm:$0xf]  ;;  %v9390_v6 = vld [vmem:[#allocation11 + $0x20] sm:$0xf] }
 0x335   :  { %5859 = vmatpush.bf16.msrb.mxu1 %v9115_v16  ;;  %v9067_v13 = vor.u32 %v10261_v53, %v9064_v63  ;;  %5818 = vmatpush.bf16.msra.mxu2 %v8715_v55  ;;  %v9334_v16 = vld [vmem:[#allocation8 + $0x7a8] sm:$0xf]  ;;  %v9003_v23 = vor.u32 %v10245_v60, %v9000_v44  ;;  %v10153_v63 = vld [vmem:[#allocation8 + $0x22c] sm:$0xf]  ;;  %v10319_v55 = vld [vmem:[#allocation8 + $0x754] sm:$0xf0] }
 0x336   :  { %5775 = vmatpush.bf16.msrb.mxu0 %v9367_v32  ;;  %v9335_v27 = vor.u32 %v10331_v57, %v9334_v16  ;;  %v8635_v34 = vor.u32 %v10153_v63, %v8632_v48  ;;  %v9287_v35 = vor.u32 %v10319_v55, %v9286_v14  ;;  %v8616_v32 = vld [vmem:[#allocation8 + $0x218] sm:$0xf0]  ;;  %v9494_v48 = vld [vmem:[#allocation11 + $0xf0] sm:$0xf]  ;;  %v10285_v55 = vld [vmem:[#allocation8 + $0x64c] sm:$0xf] }
 0x337   :  { %5727 = vmatmul.bf16.vlgmr.msra.gmra.mxu0 %v11142_v49  ;;  %v9240_v62 = vld [vmem:[#allocation8 + $0x6f8] sm:$0xf0] }
 0x338   :  { %5846 = vmatpush.bf16.msrb.mxu3 %v8971_v15  ;;  %v8888_v15 = vld [vmem:[#allocation8 + $0x438] sm:$0xf0]  ;;  %v9243_v40 = vor.u32 %v10305_v38, %v9240_v62  ;;  %v11214_v38 = vld [vmem:[#allocation10] sm:$0xf]  ;;  %v5464_v62 = vpop.f32.mrf.mxu3 }
 0x339   :  { %5860 = vmatpush.bf16.msrb.mxu1 %v9099_v9  ;;  %5819 = vmatpush.bf16.msra.mxu2 %v8699_v51  ;;  %v10327_v9 = vld [vmem:[#allocation8 + $0x794] sm:$0xf0]  ;;  %v8891_v2 = vor.u32 %v10217_v52, %v8888_v15  ;;  %v9414_v51 = vld [vmem:[#allocation11 + $0x50] sm:$0xf]  ;;  %v8856_v57 = vld [vmem:[#allocation8 + $0x3f8] sm:$0xf0] }
 0x33a   :  { %5776 = vmatpush.bf16.msrb.mxu0 %v9351_v0  ;;  %v9319_v19 = vor.u32 %v10327_v9, %v9318_v56  ;;  %v10311_v0 = vld [vmem:[#allocation8 + $0x714] sm:$0xf0]  ;;  %v10205_v52 = vld [vmem:[#allocation8 + $0x3cc] sm:$0xf]  ;;  %v8840_v15 = vld [vmem:[#allocation8 + $0x3d8] sm:$0xf0]  ;;  %v9211_v56 = vor.u32 %v10297_v24, %v9208_v3 }
 0x33b   :  { %v8843_v9 = vor.u32 %v10205_v52, %v8840_v15  ;;  %v8824_v11 = vld [vmem:[#allocation8 + $0x3b8] sm:$0xf0]  ;;  %v9478_v24 = vld [vmem:[#allocation11 + $0xd0] sm:$0xf]  ;;  %v11219_v52 = vpop.f32.mrf.mxu0  ;;  %v10277_v15 = vld [vmem:[#allocation8 + $0x60c] sm:$0xf] }
 0x33c   :  { %5847 = vmatpush.bf16.msrb.mxu3 %v8955_v7  ;;  %v10323_v7 = vld [vmem:[#allocation8 + $0x774] sm:$0xf0]  ;;  %v10371_v14 = vld [vmem:[#allocation11 + $0xf4] sm:$0xf0] }
 0x33d   :  { %5861 = vmatpush.bf16.msrb.mxu1 %v9083_v21  ;;  %5820 = vmatpush.bf16.msra.mxu2 %v8683_v47  ;;  %v9430_v21 = vld [vmem:[#allocation11 + $0x70] sm:$0xf]  ;;  %v9303_v53 = vor.u32 %v10323_v7, %v9302_v18  ;;  %v9406_v47 = vld [vmem:[#allocation11 + $0x40] sm:$0xf]  ;;  %v10289_v18 = vld [vmem:[#allocation8 + $0x66c] sm:$0xf] }
 0x33e   :  { %5777 = vmatpush.bf16.msrb.mxu0 %v9335_v27  ;;  %v9431_v20 = vor.u32 %v10355_v30, %v9430_v21  ;;  %v9176_v7 = vld [vmem:[#allocation8 + $0x678] sm:$0xf0]  ;;  %v10197_v21 = vld [vmem:[#allocation8 + $0x38c] sm:$0xf] }
 0x33f   :  { %v9179_v63 = vor.u32 %v10289_v18, %v9176_v7  ;;  %v10367_v3 = vld [vmem:[#allocation11 + $0xd4] sm:$0xf0] }
 0x340   :  { %5848 = vmatpush.bf16.msrb.mxu3 %v8939_v25  ;;  %v9422_v25 = vld [vmem:[#allocation11 + $0x60] sm:$0xf] }
 0x341   :  { %5862 = vmatpush.bf16.msrb.mxu1 %v9067_v13  ;;  %5821 = vmatpush.bf16.msra.mxu2 %v8667_v46  ;;  %v10353_v13 = vld [vmem:[#allocation11 + $0x64] sm:$0xf0] }
 0x342   :  { %5778 = vmatpush.bf16.msrb.mxu0 %v9319_v19  ;;  %v9423_v41 = vor.u32 %v10353_v13, %v9422_v25  ;;  %v10293_v46 = vld [vmem:[#allocation8 + $0x68c] sm:$0xf]  ;;  %v9160_v25 = vld [vmem:[#allocation8 + $0x658] sm:$0xf0] }
 0x343   :  { %v10345_v19 = vld [vmem:[#allocation11 + $0x24] sm:$0xf0]  ;;  %v9195_v60 = vor.u32 %v10293_v46, %v9192_v31 }
 0x344   :  { %5849 = vmatpush.bf16.msrb.mxu3 %v8923_v45  ;;  %v10351_v45 = vld [vmem:[#allocation11 + $0x54] sm:$0xf0]  ;;  %v9391_v30 = vor.u32 %v10345_v19, %v9390_v6  ;;  %v10193_v13 = vld [vmem:[#allocation8 + $0x36c] sm:$0xf]  ;;  %v9470_v19 = vld [vmem:[#allocation11 + $0xc0] sm:$0xf] }
 0x345   :  { %5863 = vmatpush.bf16.msrb.mxu1 %v9051_v50  ;;  %5822 = vmatpush.bf16.msra.mxu2 %v8651_v10  ;;  %v8619_v50 = vor.u32 %v10149_v26, %v8616_v32  ;;  %v9415_v16 = vor.u32 %v10351_v45, %v9414_v51  ;;  %v11212_v10 = vpop.f32.mrf.mxu2  ;;  %v8792_v26 = vld [vmem:[#allocation8 + $0x378] sm:$0xf0]  ;;  %v9374_v32 = vld [vmem:[#allocation11] sm:$0xf]  ;;  %v9163_v51 = vor.u32 %v10285_v55, %v9160_v25  ;;  %v9462_v55 = vld [vmem:[#allocation11 + $0xb0] sm:$0xf] }
 0x346   :  { %5779 = vmatpush.bf16.msrb.mxu0 %v9303_v53  ;;  %v10343_v53 = vld [vmem:[#allocation11 + $0x14] sm:$0xf0]  ;;  %v9486_v45 = vld [vmem:[#allocation11 + $0xe0] sm:$0xf] }
 0x347   :  { %v10363_v25 = vld [vmem:[#allocation11 + $0xb4] sm:$0xf0] }
 0x348   :  { %5850 = vmatpush.bf16.msrb.mxu3 %v8907_v29  ;;  %v10349_v29 = vld [vmem:[#allocation11 + $0x44] sm:$0xf0] }
 0x349   :  { %5864 = vmatpush.bf16.msrb.mxu1 %v9035_v1  ;;  %5823 = vmatpush.bf16.msra.mxu2 %v8635_v34  ;;  %v8859_v1 = vor.u32 %v10209_v28, %v8856_v57  ;;  %v9407_v27 = vor.u32 %v10349_v29, %v9406_v47  ;;  %v10189_v28 = vld [vmem:[#allocation8 + $0x34c] sm:$0xf]  ;;  %v4165_v47 = vperm.slane %v11214_v38, 0  ;;  %v10352_v29 = vld [vmem:[#allocation11 + $0x64] sm:$0xf] }
 0x34a   :  { %5780 = vmatpush.bf16.msrb.mxu0 %v9287_v35  ;;  %v9495_v35 = vor.u32 %v10371_v14, %v9494_v48  ;;  %v10348_v48 = vld [vmem:[#allocation11 + $0x44] sm:$0xf]  ;;  %v9408_v14 = vld [vmem:[#allocation11 + $0x48] sm:$0xf0] }
 0x34b   :  { %v5463_v31 = vadd.f32 %v11207_v61, %v4165_v47  ;;  %v5465_v61 = vadd.f32 %v5464_v62, %v4165_v47  ;;  %v10346_v62 = vld [vmem:[#allocation11 + $0x34] sm:$0xf]  ;;  %v9446_v47 = vld [vmem:[#allocation11 + $0x90] sm:$0xf] }
 0x34c   :  { %5851 = vmatpush.bf16.msrb.mxu3 %v8891_v2  ;;  %v10201_v2 = vld [vmem:[#allocation8 + $0x3ac] sm:$0xf] }
 0x34d   :  { %5865 = vmatpush.bf16.msrb.mxu1 %v9019_v33  ;;  %5824 = vmatpush.bf16.msra.mxu2 %v8619_v50  ;;  %v9399_v33 = vor.u32 %v10347_v58, %v9398_v37  ;;  %v8827_v44 = vor.u32 %v10201_v2, %v8824_v11  ;;  %v10369_v50 = vld [vmem:[#allocation11 + $0xe4] sm:$0xf0]  ;;  %v9128_v37 = vld [vmem:[#allocation8 + $0x618] sm:$0xf0]  ;;  %v9479_v58 = vor.u32 %v10367_v3, %v9478_v24  ;;  %v10350_v2 = vld [vmem:[#allocation11 + $0x54] sm:$0xf]  ;;  %v5518_v11 = vpop.f32.mrf.mxu3 }
 0x34e   :  { %5781 = vmatpush.bf16.msrb.mxu0 %v9271_v36  ;;  %v8795_v36 = vor.u32 %v10193_v13, %v8792_v26  ;;  %v9131_v6 = vor.u32 %v10277_v15, %v9128_v37  ;;  %v10333_v26 = vld [vmem:[#allocation8 + $0x7cc] sm:$0xf] }
 0x350   :  { %5852 = vmatpush.bf16.msrb.mxu3 %v8875_v4  ;;  %5825 = vmatmul.bf16.vlgmr.msra.gmra.mxu2 %v11138_v12  ;;  %v11210_v12 = vpop.f32.mrf.mxu1  ;;  %v8808_v4 = vld [vmem:[#allocation8 + $0x398] sm:$0xf0] }
 0x351   :  { %5866 = vmatpush.bf16.msrb.mxu1 %v9003_v23  ;;  %5873 = vmatpush.bf16.msrb.mxu2 %v9243_v40  ;;  %v9382_v23 = vld [vmem:[#allocation11 + $0x10] sm:$0xf]  ;;  %v10281_v40 = vld [vmem:[#allocation8 + $0x62c] sm:$0xf] }
 0x352   :  { %v9383_v34 = vor.u32 %v10343_v53, %v9382_v23  ;;  %v5477_v53 = vadd.f32 %v11210_v12, %v5463_v31  ;;  %v10357_v31 = vld [vmem:[#allocation11 + $0x84] sm:$0xf0] }
 0x353   :  { %5853 = vmatmul.bf16.vlgmr.msrb.gmra.mxu3 %v11159_v5  ;;  %v9255_v5 = vor.u32 %v10311_v0, %v9254_v8  ;;  %v9144_v8 = vld [vmem:[#allocation8 + $0x638] sm:$0xf0]  ;;  %v9375_v0 = vor.u32 %v10341_v43, %v9374_v32  ;;  %v9411_v32 = vor.u32 %v10348_v48, %v9408_v14  ;;  %v9488_v48 = vld [vmem:[#allocation11 + $0xe8] sm:$0xf0] }
 0x354   :  { %6319 = vmatpush.bf16.msra.mxu3 %v9431_v20  ;;  %5867 = vmatmul.bf16.vlgmr.msrb.gmra.mxu1 %v11163_v17  ;;  %v9227_v17 = vor.u32 %v10301_v39, %v9224_v22  ;;  %v8811_v20 = vor.u32 %v10197_v21, %v8808_v4  ;;  %v9487_v39 = vor.u32 %v10369_v50, %v9486_v45  ;;  %v10181_v21 = vld [vmem:[#allocation8 + $0x30c] sm:$0xf]  ;;  %v9454_v45 = vld [vmem:[#allocation11 + $0xa0] sm:$0xf] }
 0x355   :  { %5782 = vmatpush.bf16.msrb.mxu0 %v9255_v5  ;;  %6333 = vmatpush.bf16.msra.mxu1 %v9495_v35  ;;  %v9424_v5 = vld [vmem:[#allocation11 + $0x68] sm:$0xf0]  ;;  %v10337_v4 = vld [vmem:[#allocation8 + $0x7ec] sm:$0xf]  ;;  %v5491_v43 = vadd.f32 %v11212_v10, %v5477_v53 }
 0x356   :  { %5874 = vmatpush.bf16.msrb.mxu2 %v9227_v17  ;;  %v11217_v17 = vpop.f32.mrf.mxu2  ;;  %v9427_v46 = vor.u32 %v10352_v29, %v9424_v5  ;;  %v10361_v50 = vld [vmem:[#allocation11 + $0xa4] sm:$0xf0]  ;;  %v10359_v29 = vld [vmem:[#allocation11 + $0x94] sm:$0xf0] }
 0x358   :  { %6320 = vmatpush.bf16.msra.mxu3 %v9423_v41  ;;  %5783 = vmatmul.bf16.vlgmr.msrb.gmra.mxu0 %v11191_v59  ;;  %v10354_v41 = vld [vmem:[#allocation11 + $0x74] sm:$0xf]  ;;  %v5478_v22 = vpop.f32.mrf.mxu1 }
 0x359   :  { %5831 = vmatpush.bf16.msra.mxu0 %v8859_v1  ;;  %v9435_v57 = vor.u32 %v10354_v41, %v9432_v54  ;;  %6334 = vmatpush.bf16.msra.mxu1 %v9487_v39  ;;  %v9147_v1 = vor.u32 %v10281_v40, %v9144_v8  ;;  %v5506_v41 = vpop.f32.mrf.mxu0  ;;  %v5479_v12 = vadd.f32 %v5478_v22, %v5465_v61  ;;  %v9352_v54 = vld [vmem:[#allocation8 + $0x7d8] sm:$0xf0]  ;;  %v5520_v40 = vpop.f32.mrf.mxu3 }
 0x35a   :  { %5875 = vmatpush.bf16.msrb.mxu2 %v9211_v56  ;;  %v10185_v56 = vld [vmem:[#allocation8 + $0x32c] sm:$0xf]  ;;  %v9355_v8 = vor.u32 %v10333_v26, %v9352_v54  ;;  %v5505_v22 = vadd.f32 %v11219_v52, %v5491_v43 }
 0x35b   :  { %v5493_v10 = vadd.f32 %v11217_v17, %v5479_v12  ;;  %v9480_v12 = vld [vmem:[#allocation11 + $0xd8] sm:$0xf0] }
 0x35c   :  { %6321 = vmatpush.bf16.msra.mxu3 %v9415_v16  ;;  %v8776_v16 = vld [vmem:[#allocation8 + $0x358] sm:$0xf0]  ;;  %v5519_v5 = vadd.f32 %v5518_v11, %v5505_v22  ;;  %v10370_v11 = vld [vmem:[#allocation11 + $0xf4] sm:$0xf]  ;;  %v9472_v22 = vld [vmem:[#allocation11 + $0xc8] sm:$0xf0] }
 0x35d   :  { %5832 = vmatpush.bf16.msra.mxu0 %v8843_v9  ;;  %v8760_v9 = vld [vmem:[#allocation8 + $0x338] sm:$0xf0]  ;;  %6335 = vmatpush.bf16.msra.mxu1 %v9479_v58  ;;  %v5507_v17 = vadd.f32 %v5506_v41, %v5493_v10  ;;  %v10366_v41 = vld [vmem:[#allocation11 + $0xd4] sm:$0xf]  ;;  %v10364_v10 = vld [vmem:[#allocation11 + $0xc4] sm:$0xf] }
 0x35e   :  { %5876 = vmatpush.bf16.msrb.mxu2 %v9195_v60  ;;  %v10365_v60 = vld [vmem:[#allocation11 + $0xc4] sm:$0xf0]  ;;  %v9320_v58 = vld [vmem:[#allocation8 + $0x798] sm:$0xf0] }
 0x35f   :  { %v9471_v18 = vor.u32 %v10365_v60, %v9470_v19 }
 0x360   :  { %6322 = vmatpush.bf16.msra.mxu3 %v9407_v27  ;;  %v8779_v27 = vor.u32 %v10189_v28, %v8776_v16  ;;  %v5532_v7 = vpop.f32.mrf.mxu1  ;;  %v9336_v28 = vld [vmem:[#allocation8 + $0x7b8] sm:$0xf0]  ;;  %v9392_v16 = vld [vmem:[#allocation11 + $0x28] sm:$0xf0] }
 0x361   :  { %5833 = vmatpush.bf16.msra.mxu0 %v8827_v44  ;;  %v8763_v44 = vor.u32 %v10185_v56, %v8760_v9  ;;  %6336 = vmatpush.bf16.msra.mxu1 %v9471_v18  ;;  %v5533_v37 = vadd.f32 %v5532_v7, %v5519_v5  ;;  %v10342_v56 = vld [vmem:[#allocation11 + $0x14] sm:$0xf]  ;;  %v9384_v9 = vld [vmem:[#allocation11 + $0x18] sm:$0xf0]  ;;  %v5574_v19 = vpop.f32.mrf.mxu3  ;;  %v9304_v18 = vld [vmem:[#allocation8 + $0x778] sm:$0xf0] }
 0x362   :  { %5877 = vmatpush.bf16.msrb.mxu2 %v9179_v63  ;;  %v9368_v63 = vld [vmem:[#allocation8 + $0x7f8] sm:$0xf0] }
 0x363   :  { %v9371_v35 = vor.u32 %v10337_v4, %v9368_v63  ;;  %v9376_v4 = vld [vmem:[#allocation11 + $0x8] sm:$0xf0]  ;;  %v10368_v63 = vld [vmem:[#allocation11 + $0xe4] sm:$0xf] }
 0x364   :  { %6323 = vmatpush.bf16.msra.mxu3 %v9399_v33  ;;  %v9416_v33 = vld [vmem:[#allocation11 + $0x58] sm:$0xf0] }
 0x365   :  { %5834 = vmatpush.bf16.msra.mxu0 %v8811_v20  ;;  %v9419_v23 = vor.u32 %v10350_v2, %v9416_v33  ;;  %v5546_v20 = vpop.f32.mrf.mxu2 }
 0x366   :  { %5878 = vmatpush.bf16.msrb.mxu2 %v9163_v51  ;;  %v9400_v51 = vld [vmem:[#allocation11 + $0x38] sm:$0xf0]  ;;  %v5547_v2 = vadd.f32 %v5546_v20, %v5533_v37 }
 0x367   :  { %v9403_v39 = vor.u32 %v10346_v62, %v9400_v51  ;;  %v9483_v51 = vor.u32 %v10366_v41, %v9480_v12 }
 0x368   :  { %6324 = vmatpush.bf16.msra.mxu3 %v9391_v30  ;;  %v8744_v30 = vld [vmem:[#allocation8 + $0x318] sm:$0xf0] }
 0x369   :  { %5835 = vmatpush.bf16.msra.mxu0 %v8795_v36  ;;  %v8747_v13 = vor.u32 %v10181_v21, %v8744_v30  ;;  %v9455_v36 = vor.u32 %v10361_v50, %v9454_v45  ;;  %v9387_v21 = vor.u32 %v10342_v56, %v9384_v9  ;;  %v10340_v30 = vld [vmem:[#allocation11 + $0x4] sm:$0xf]  ;;  %v4166_v45 = vperm.slane %v11214_v38, 1  ;;  %v10313_v50 = vld [vmem:[#allocation8 + $0x72c] sm:$0xf] }
 0x36a   :  { %5879 = vmatpush.bf16.msrb.mxu2 %v9147_v1  ;;  %v9447_v1 = vor.u32 %v10359_v29, %v9446_v47  ;;  %v10309_v47 = vld [vmem:[#allocation8 + $0x70c] sm:$0xf]  ;;  %v9256_v29 = vld [vmem:[#allocation8 + $0x718] sm:$0xf0]  ;;  %v10360_v56 = vld [vmem:[#allocation11 + $0xa4] sm:$0xf] }
 0x36b   :  { %v9456_v9 = vld [vmem:[#allocation11 + $0xa8] sm:$0xf0] }
 0x36c   :  { %6325 = vmatpush.bf16.msra.mxu3 %v9383_v34  ;;  %v9463_v34 = vor.u32 %v10363_v25, %v9462_v55  ;;  %v9379_v55 = vor.u32 %v10340_v30, %v9376_v4  ;;  %v9491_v25 = vor.u32 %v10368_v63, %v9488_v48  ;;  %v10387_v30 = vld [vmem:[#allocation11 + $0x174] sm:$0xf0]  ;;  %v10356_v4 = vld [vmem:[#allocation11 + $0x84] sm:$0xf] }
 0x36d   :  { %5836 = vmatpush.bf16.msra.mxu0 %v8779_v27  ;;  %v5548_v24 = vpop.f32.mrf.mxu2  ;;  %v10325_v27 = vld [vmem:[#allocation8 + $0x78c] sm:$0xf] }
 0x36e   :  { %5880 = vmatpush.bf16.msrb.mxu2 %v9131_v6  ;;  %6337 = vmatpush.bf16.msra.mxu1 %v9463_v34  ;;  %v9496_v6 = vld [vmem:[#allocation11 + $0xf8] sm:$0xf0]  ;;  %v9323_v60 = vor.u32 %v10325_v27, %v9320_v58  ;;  %v10317_v34 = vld [vmem:[#allocation8 + $0x74c] sm:$0xf]  ;;  %v9259_v27 = vor.u32 %v10309_v47, %v9256_v29  ;;  %v9510_v29 = vld [vmem:[#allocation11 + $0x110] sm:$0xf] }
 0x36f   :  { %v9499_v7 = vor.u32 %v10370_v11, %v9496_v6  ;;  %v10358_v6 = vld [vmem:[#allocation11 + $0x94] sm:$0xf] }
 0x370   :  { %6326 = vmatpush.bf16.msra.mxu3 %v9375_v0  ;;  %v10329_v0 = vld [vmem:[#allocation8 + $0x7ac] sm:$0xf]  ;;  %v5560_v52 = vpop.f32.mrf.mxu0 }
 0x371   :  { %5837 = vmatpush.bf16.msra.mxu0 %v8763_v44  ;;  %5881 = vmatmul.bf16.vlgmr.msrb.gmra.mxu2 %v11182_v42  ;;  %v10344_v42 = vld [vmem:[#allocation11 + $0x24] sm:$0xf]  ;;  %v9339_v3 = vor.u32 %v10329_v0, %v9336_v28  ;;  %v10321_v44 = vld [vmem:[#allocation8 + $0x76c] sm:$0xf]  ;;  %v5561_v53 = vadd.f32 %v5560_v52, %v5547_v2 }
 0x372   :  { %6338 = vmatpush.bf16.msra.mxu1 %v9455_v36  ;;  %v9395_v15 = vor.u32 %v10344_v42, %v9392_v16  ;;  %v9307_v61 = vor.u32 %v10321_v44, %v9304_v18  ;;  %v9272_v36 = vld [vmem:[#allocation8 + $0x738] sm:$0xf0]  ;;  %v9475_v42 = vor.u32 %v10364_v10, %v9472_v22  ;;  %v5575_v16 = vadd.f32 %v5574_v19, %v4166_v45  ;;  %v9448_v19 = vld [vmem:[#allocation11 + $0x98] sm:$0xf0]  ;;  %v9526_v10 = vld [vmem:[#allocation11 + $0x130] sm:$0xf] }
 0x373   :  { %vm5901_vm1 = vcmp.gt.f32.partialorder %v5561_v53, 0.0  ;;  %v9275_v28 = vor.u32 %v10313_v50, %v9272_v36  ;;  %v9534_v50 = vld [vmem:[#allocation11 + $0x140] sm:$0xf]  ;;  %v10381_v36 = vld [vmem:[#allocation11 + $0x144] sm:$0xf0] }
 0x374   :  { %6375 = vmatpush.bf16.msrb.mxu3 %v9435_v57  ;;  %v5534_v57 = vpop.f32.mrf.mxu1  ;;  %v10379_v22 = vld [vmem:[#allocation11 + $0x134] sm:$0xf0] }
 0x375   :  { %5838 = vmatpush.bf16.msra.mxu0 %v8747_v13  ;;  %v5602_v26 = vpop.f32.mrf.mxu2 }
 0x376   :  { %6339 = vmatpush.bf16.msra.mxu1 %v9447_v1  ;;  %v10362_v1 = vld [vmem:[#allocation11 + $0xb4] sm:$0xf] }
 0x378   :  { %6376 = vmatpush.bf16.msrb.mxu3 %v9427_v46  ;;  %5839 = vmatmul.bf16.vlgmr.msra.gmra.mxu0 %v11142_v49  ;;  %v9438_v46 = vld [vmem:[#allocation11 + $0x80] sm:$0xf]  ;;  %v5521_v49 = vadd.f32 %v5520_v40, %v5507_v17  ;;  %v5562_v13 = vpop.f32.mrf.mxu0  ;;  %v5576_v40 = vpop.f32.mrf.mxu3 }
 0x379   :  { %5887 = vmatpush.bf16.msrb.mxu0 %v9371_v35  ;;  %v9439_v33 = vor.u32 %v10357_v31, %v9438_v46  ;;  %v9288_v35 = vld [vmem:[#allocation8 + $0x758] sm:$0xf0]  ;;  %v5577_v17 = vadd.f32 %v5576_v40, %v4166_v45  ;;  %v9459_v46 = vor.u32 %v10360_v56, %v9456_v9  ;;  %v9535_v40 = vor.u32 %v10381_v36, %v9534_v50  ;;  %v9552_v56 = vld [vmem:[#allocation11 + $0x168] sm:$0xf0]  ;;  %v9622_v50 = vld [vmem:[#allocation11 + $0x1f0] sm:$0xf] }
 0x37a   :  { %v9291_v62 = vor.u32 %v10317_v34, %v9288_v35  ;;  %v10403_v36 = vld [vmem:[#allocation11 + $0x1f4] sm:$0xf0] }
 0x37b   :  { %6340 = vmatpush.bf16.msra.mxu1 %v9439_v33 }
 0x37c   :  { %6377 = vmatpush.bf16.msrb.mxu3 %v9419_v23  ;;  %v5535_v23 = vadd.f32 %v5534_v57, %v5521_v49  ;;  %v5588_v14 = vpop.f32.mrf.mxu1 }
 0x37d   :  { %5888 = vmatpush.bf16.msrb.mxu0 %v9355_v8  ;;  %v5589_v37 = vadd.f32 %v5588_v14, %v5575_v16  ;;  %v9518_v16 = vld [vmem:[#allocation11 + $0x120] sm:$0xf] }
 0x37e   :  { %v5549_v20 = vadd.f32 %v5548_v24, %v5535_v23  ;;  %v9464_v24 = vld [vmem:[#allocation11 + $0xb8] sm:$0xf0] }
 0x37f   :  { %6389 = vmatpush.bf16.msrb.mxu1 %v9499_v7  ;;  %v5603_v58 = vadd.f32 %v5602_v26, %v5589_v37  ;;  %v9558_v7 = vld [vmem:[#allocation11 + $0x170] sm:$0xf] }
 0x380   :  { %6378 = vmatpush.bf16.msrb.mxu3 %v9411_v32  ;;  %v5909_v32 = vmul.f32 0.2, %v5561_v53  ;;  %v5563_v43 = vadd.f32 %v5562_v13, %v5549_v20  ;;  %v5616_v57 = vpop.f32.mrf.mxu0  ;;  %v5630_v52 = vpop.f32.mrf.mxu3 }
 0x381   :  { %5889 = vmatpush.bf16.msrb.mxu0 %v9339_v3  ;;  %v5604_v3 = vpop.f32.mrf.mxu2  ;;  %v5617_v49 = vadd.f32 %v5616_v57, %v5603_v58  ;;  %v10377_v57 = vld [vmem:[#allocation11 + $0x124] sm:$0xf0]  ;;  %v10384_v58 = vld [vmem:[#allocation11 + $0x164] sm:$0xf] }
 0x382   :  { %vm5905_vm2 = vcmp.gt.f32.partialorder %v5563_v43, 0.0  ;;  %v5913_v54 = vmul.f32 0.2, %v5563_v43  ;;  %v5917_v8 = vsel %vm5901_vm1, %v5561_v53, %v5909_v32  ;;  %v9559_v53 = vor.u32 %v10387_v30, %v9558_v7  ;;  %v9542_v32 = vld [vmem:[#allocation11 + $0x150] sm:$0xf] }
 0x383   :  { %6390 = vmatpush.bf16.msrb.mxu1 %v9491_v25  ;;  %v5631_v44 = vadd.f32 %v5630_v52, %v5617_v49  ;;  %v9519_v47 = vor.u32 %v10377_v57, %v9518_v16  ;;  %v9555_v9 = vor.u32 %v10384_v58, %v9552_v56  ;;  %v9544_v49 = vld [vmem:[#allocation11 + $0x158] sm:$0xf0] }
 0x384   :  { %6379 = vmatpush.bf16.msrb.mxu3 %v9403_v39  ;;  %v5921_v0 = vsel %vm5905_vm2, %v5563_v43, %v5913_v54  ;;  %v5590_v5 = vpop.f32.mrf.mxu1  ;;  %6347 = vmatpush.bf16.msra.mxu2 %v9559_v53  ;;  %v10383_v43 = vld [vmem:[#allocation11 + $0x154] sm:$0xf0]  ;;  %v9528_v7 = vld [vmem:[#allocation11 + $0x138] sm:$0xf0]  ;;  %v10376_v53 = vld [vmem:[#allocation11 + $0x124] sm:$0xf] }
 0x385   :  { %5890 = vmatpush.bf16.msrb.mxu0 %v9323_v60  ;;  %v5925_v39 = vpack.c.bf16 %v5921_v0, %v5917_v8  ;;  %v5591_v31 = vadd.f32 %v5590_v5, %v5577_v17  ;;  %v9451_v60 = vor.u32 %v10358_v6, %v9448_v19  ;;  %v9543_v12 = vor.u32 %v10383_v43, %v9542_v32  ;;  %v10375_v5 = vld [vmem:[#allocation11 + $0x114] sm:$0xf0]  ;;  %v9560_v17 = vld [vmem:[#allocation11 + $0x178] sm:$0xf0]  ;;  %v9536_v6 = vld [vmem:[#allocation11 + $0x148] sm:$0xf0] }
 0x386   :  { %v4167_v19 = vperm.slane %v11214_v38, 2 }
 0x387   :  { %6391 = vmatpush.bf16.msrb.mxu1 %v9483_v51  ;;  %6327 = vmatmul.bf16.vlgmr.msra.gmra.mxu3 %v5925_v39  ;;  %v5605_v11 = vadd.f32 %v5604_v3, %v5591_v31  ;;  %v10373_v3 = vld [vmem:[#allocation11 + $0x104] sm:$0xf0]  ;;  %v10382_v31 = vld [vmem:[#allocation11 + $0x154] sm:$0xf] }
 0x388   :  { %6380 = vmatpush.bf16.msrb.mxu3 %v9395_v15  ;;  %v9467_v15 = vor.u32 %v10362_v1, %v9464_v24  ;;  %v5618_v2 = vpop.f32.mrf.mxu0  ;;  %v5632_v23 = vpop.f32.mrf.mxu3  ;;  %v9511_v1 = vor.u32 %v10375_v5, %v9510_v29  ;;  %v9502_v24 = vld [vmem:[#allocation11 + $0x100] sm:$0xf]  ;;  %v9606_v5 = vld [vmem:[#allocation11 + $0x1d0] sm:$0xf] }
 0x389   :  { %5891 = vmatpush.bf16.msrb.mxu0 %v9307_v61  ;;  %v5619_v18 = vadd.f32 %v5618_v2, %v5605_v11  ;;  %v9440_v61 = vld [vmem:[#allocation11 + $0x88] sm:$0xf0]  ;;  %v9547_v2 = vor.u32 %v10382_v31, %v9544_v49  ;;  %v10380_v11 = vld [vmem:[#allocation11 + $0x144] sm:$0xf]  ;;  %v9590_v31 = vld [vmem:[#allocation11 + $0x1b0] sm:$0xf] }
 0x38a   :  { %v9443_v14 = vor.u32 %v10356_v4, %v9440_v61  ;;  %v9520_v61 = vld [vmem:[#allocation11 + $0x128] sm:$0xf0]  ;;  %v10395_v49 = vld [vmem:[#allocation11 + $0x1b4] sm:$0xf0] }
 0x38b   :  { %6392 = vmatpush.bf16.msrb.mxu1 %v9475_v42  ;;  %v5633_v63 = vadd.f32 %v5632_v23, %v5619_v18  ;;  %v9527_v42 = vor.u32 %v10379_v22, %v9526_v10  ;;  %v9614_v22 = vld [vmem:[#allocation11 + $0x1e0] sm:$0xf] }
 0x38c   :  { %6381 = vmatpush.bf16.msrb.mxu3 %v9387_v21  ;;  %v5644_v33 = vpop.f32.mrf.mxu1  ;;  %v5658_v21 = vpop.f32.mrf.mxu2 }
 0x38d   :  { %5892 = vmatpush.bf16.msrb.mxu0 %v9291_v62  ;;  %v5645_v48 = vadd.f32 %v5644_v33, %v5631_v44 }
 0x38f   :  { %6393 = vmatpush.bf16.msrb.mxu1 %v9467_v15  ;;  %v5659_v34 = vadd.f32 %v5658_v21, %v5645_v48  ;;  %v10386_v15 = vld [vmem:[#allocation11 + $0x174] sm:$0xf] }
 0x390   :  { %6382 = vmatpush.bf16.msrb.mxu3 %v9379_v55  ;;  %v10385_v55 = vld [vmem:[#allocation11 + $0x164] sm:$0xf0]  ;;  %v9563_v37 = vor.u32 %v10386_v15, %v9560_v17  ;;  %v5686_v52 = vpop.f32.mrf.mxu3  ;;  %v10378_v21 = vld [vmem:[#allocation11 + $0x134] sm:$0xf]  ;;  %v9598_v17 = vld [vmem:[#allocation11 + $0x1c0] sm:$0xf] }
 0x391   :  { %5893 = vmatpush.bf16.msrb.mxu0 %v9275_v28  ;;  %v5687_v30 = vadd.f32 %v5686_v52, %v4167_v19  ;;  %v9531_v4 = vor.u32 %v10378_v21, %v9528_v7  ;;  %v10374_v48 = vld [vmem:[#allocation11 + $0x114] sm:$0xf]  ;;  %v10391_v21 = vld [vmem:[#allocation11 + $0x194] sm:$0xf0] }
 0x393   :  { %6394 = vmatpush.bf16.msrb.mxu1 %v9459_v46 }
 0x394   :  { %v5672_v20 = vpop.f32.mrf.mxu0  ;;  %v5646_v25 = vpop.f32.mrf.mxu1 }
 0x395   :  { %5894 = vmatpush.bf16.msrb.mxu0 %v9259_v27  ;;  %v5647_v35 = vadd.f32 %v5646_v25, %v5633_v63  ;;  %v5673_v26 = vadd.f32 %v5672_v20, %v5659_v34  ;;  %v5660_v41 = vpop.f32.mrf.mxu2  ;;  %v9503_v27 = vor.u32 %v10373_v3, %v9502_v24  ;;  %v9523_v63 = vor.u32 %v10376_v53, %v9520_v61  ;;  %v10402_v53 = vld [vmem:[#allocation11 + $0x1f4] sm:$0xf]  ;;  %v9624_v61 = vld [vmem:[#allocation11 + $0x1f8] sm:$0xf0] }
 0x397   :  { %6395 = vmatpush.bf16.msrb.mxu1 %v9451_v60  ;;  %6383 = vmatmul.bf16.vlgmr.msrb.gmra.mxu3 %v5925_v39  ;;  %v5661_v54 = vadd.f32 %v5660_v41, %v5647_v35  ;;  %v5910_v51 = vmul.f32 0.2, %v5673_v26  ;;  %vm5902_vm3 = vcmp.gt.f32.partialorder %v5673_v26, 0.0  ;;  %v9539_v60 = vor.u32 %v10380_v11, %v9536_v6 }
 0x398   :  { %5895 = vmatmul.bf16.vlgmr.msrb.gmra.mxu0 %v11191_v59  ;;  %v9550_v59 = vld [vmem:[#allocation11 + $0x160] sm:$0xf]  ;;  %v5688_v44 = vpop.f32.mrf.mxu3 }
 0x399   :  { %v9551_v13 = vor.u32 %v10385_v55, %v9550_v59  ;;  %v5918_v0 = vsel %vm5902_vm3, %v5673_v26, %v5910_v51  ;;  %v5689_v20 = vadd.f32 %v5688_v44, %v4167_v19  ;;  %v9591_v19 = vor.u32 %v10395_v49, %v9590_v31 }
 0x39b   :  { %6396 = vmatpush.bf16.msrb.mxu1 %v9443_v14  ;;  %6348 = vmatpush.bf16.msra.mxu2 %v9551_v13  ;;  %v9512_v14 = vld [vmem:[#allocation11 + $0x118] sm:$0xf0] }
 0x39c   :  { %v5674_v62 = vpop.f32.mrf.mxu0  ;;  %v5700_v46 = vpop.f32.mrf.mxu1  ;;  %v9515_v34 = vor.u32 %v10374_v48, %v9512_v14  ;;  %v10400_v14 = vld [vmem:[#allocation11 + $0x1e4] sm:$0xf] }
 0x39d   :  { %v5675_v45 = vadd.f32 %v5674_v62, %v5661_v54  ;;  %v5714_v33 = vpop.f32.mrf.mxu2  ;;  %v5701_v59 = vadd.f32 %v5700_v46, %v5687_v30  ;;  %v9504_v54 = vld [vmem:[#allocation11 + $0x108] sm:$0xf0]  ;;  %v9566_v30 = vld [vmem:[#allocation11 + $0x180] sm:$0xf] }
 0x39f   :  { %6349 = vmatpush.bf16.msra.mxu2 %v9543_v12  ;;  %vm5906_vm4 = vcmp.gt.f32.partialorder %v5675_v45, 0.0  ;;  %v5914_v8 = vmul.f32 0.2, %v5675_v45  ;;  %v5715_v13 = vadd.f32 %v5714_v33, %v5701_v59  ;;  %v10372_v12 = vld [vmem:[#allocation11 + $0x104] sm:$0xf] }
 0x3a0   :  { %v5742_v55 = vpop.f32.mrf.mxu3  ;;  %v10393_v33 = vld [vmem:[#allocation11 + $0x1a4] sm:$0xf0] }
 0x3a1   :  { %v5922_v39 = vsel %vm5906_vm4, %v5675_v45, %v5914_v8  ;;  %v9507_v45 = vor.u32 %v10372_v12, %v9504_v54  ;;  %v9623_v8 = vor.u32 %v10403_v36, %v9622_v50 }
 0x3a2   :  { %v5926_v28 = vpack.c.bf16 %v5922_v39, %v5918_v0 }
 0x3a3   :  { %6350 = vmatpush.bf16.msra.mxu2 %v9535_v40  ;;  %6361 = vmatpush.bf16.msra.mxu0 %v9623_v8  ;;  %v9584_v8 = vld [vmem:[#allocation11 + $0x1a8] sm:$0xf0] }
 0x3a4   :  { %6341 = vmatmul.bf16.vlgmr.msra.gmra.mxu1 %v5926_v28  ;;  %v5702_v23 = vpop.f32.mrf.mxu1 }
 0x3a5   :  { %v5716_v25 = vpop.f32.mrf.mxu2  ;;  %v5703_v35 = vadd.f32 %v5702_v23, %v5689_v20  ;;  %v9616_v20 = vld [vmem:[#allocation11 + $0x1e8] sm:$0xf0] }
 0x3a6   :  { %v9619_v59 = vor.u32 %v10400_v14, %v9616_v20 }
 0x3a7   :  { %6351 = vmatpush.bf16.msra.mxu2 %v9527_v42  ;;  %v5717_v41 = vadd.f32 %v5716_v25, %v5703_v35  ;;  %v10398_v25 = vld [vmem:[#allocation11 + $0x1d4] sm:$0xf] }
 0x3a8   :  { %v5744_v0 = vpop.f32.mrf.mxu3 }
 0x3ab   :  { %6352 = vmatpush.bf16.msra.mxu2 %v9519_v47 }
 0x3ac   :  { %v5756_v32 = vpop.f32.mrf.mxu1 }
 0x3af   :  { %6353 = vmatpush.bf16.msra.mxu2 %v9511_v1  ;;  %v10399_v1 = vld [vmem:[#allocation11 + $0x1d4] sm:$0xf0] }
 0x3b0   :  { %v9607_v3 = vor.u32 %v10399_v1, %v9606_v5 }
 0x3b3   :  { %6354 = vmatpush.bf16.msra.mxu2 %v9503_v27  ;;  %v5770_v40 = vpop.f32.mrf.mxu2 }
 0x3b4   :  { %6397 = vmatmul.bf16.vlgmr.msrb.gmra.mxu1 %v5926_v28  ;;  %v5728_v18 = vpop.f32.mrf.mxu0  ;;  %v10401_v28 = vld [vmem:[#allocation11 + $0x1e4] sm:$0xf0]  ;;  %v5758_v57 = vpop.f32.mrf.mxu1 }
 0x3b5   :  { %v5729_v26 = vadd.f32 %v5728_v18, %v5715_v13  ;;  %v9615_v16 = vor.u32 %v10401_v28, %v9614_v22  ;;  %v9574_v18 = vld [vmem:[#allocation11 + $0x190] sm:$0xf]  ;;  %v9608_v13 = vld [vmem:[#allocation11 + $0x1d8] sm:$0xf0] }
 0x3b6   :  { %v9575_v7 = vor.u32 %v10391_v21, %v9574_v18  ;;  %v5798_v48 = vpop.f32.mrf.mxu3 }
 0x3b7   :  { %6403 = vmatpush.bf16.msrb.mxu2 %v9563_v37  ;;  %v5743_v62 = vadd.f32 %v5742_v55, %v5729_v26  ;;  %6362 = vmatpush.bf16.msra.mxu0 %v9615_v16  ;;  %v10397_v37 = vld [vmem:[#allocation11 + $0x1c4] sm:$0xf0]  ;;  %v10396_v26 = vld [vmem:[#allocation11 + $0x1c4] sm:$0xf]  ;;  %v10390_v16 = vld [vmem:[#allocation11 + $0x194] sm:$0xf] }
 0x3b8   :  { %v9599_v58 = vor.u32 %v10397_v37, %v9598_v17 }
 0x3b9   :  { %v5757_v39 = vadd.f32 %v5756_v32, %v5743_v62  ;;  %v9600_v32 = vld [vmem:[#allocation11 + $0x1c8] sm:$0xf0]  ;;  %v10394_v62 = vld [vmem:[#allocation11 + $0x1b4] sm:$0xf] }
 0x3bb   :  { %6404 = vmatpush.bf16.msrb.mxu2 %v9555_v9  ;;  %v5771_v47 = vadd.f32 %v5770_v40, %v5757_v39  ;;  %v5772_v27 = vpop.f32.mrf.mxu2  ;;  %6363 = vmatpush.bf16.msra.mxu0 %v9607_v3  ;;  %v10392_v40 = vld [vmem:[#allocation11 + $0x1a4] sm:$0xf]  ;;  %v9568_v3 = vld [vmem:[#allocation11 + $0x188] sm:$0xf0] }
 0x3bc   :  { %v5730_v43 = vpop.f32.mrf.mxu0  ;;  %v5812_v55 = vpop.f32.mrf.mxu1 }
 0x3bd   :  { %v5731_v51 = vadd.f32 %v5730_v43, %v5717_v41  ;;  %v4168_v43 = vperm.slane %v11214_v38, 3  ;;  %v9603_v41 = vor.u32 %v10396_v26, %v9600_v32  ;;  %v9576_v38 = vld [vmem:[#allocation11 + $0x198] sm:$0xf0] }
 0x3be   :  { %v5800_v12 = vpop.f32.mrf.mxu3 }
 0x3bf   :  { %6405 = vmatpush.bf16.msrb.mxu2 %v9547_v2  ;;  %v5745_v10 = vadd.f32 %v5744_v0, %v5731_v51  ;;  %6364 = vmatpush.bf16.msra.mxu0 %v9599_v58  ;;  %v9582_v2 = vld [vmem:[#allocation11 + $0x1a0] sm:$0xf]  ;;  %v9592_v51 = vld [vmem:[#allocation11 + $0x1b8] sm:$0xf0]  ;;  %v9587_v0 = vor.u32 %v10392_v40, %v9584_v8  ;;  %v5801_v39 = vadd.f32 %v5800_v12, %v4168_v43 }
 0x3c0   :  { %v9583_v44 = vor.u32 %v10393_v33, %v9582_v2  ;;  %v9595_v50 = vor.u32 %v10394_v62, %v9592_v51  ;;  %v6443_v40 = vld [vmem:[#allocation14] sm:$0x3] }
 0x3c1   :  { %v5759_v29 = vadd.f32 %v5758_v57, %v5745_v10  ;;  %v9579_v57 = vor.u32 %v10390_v16, %v9576_v38 }
 0x3c3   :  { %6406 = vmatpush.bf16.msrb.mxu2 %v9539_v60  ;;  %v5773_v15 = vadd.f32 %v5772_v27, %v5759_v29  ;;  %6365 = vmatpush.bf16.msra.mxu0 %v9591_v19 }
 0x3c4   :  { %v5814_v36 = vpop.f32.mrf.mxu1 }
 0x3c7   :  { %6407 = vmatpush.bf16.msrb.mxu2 %v9531_v4  ;;  %6366 = vmatpush.bf16.msra.mxu0 %v9583_v44  ;;  %v10389_v4 = vld [vmem:[#allocation11 + $0x184] sm:$0xf0] }
 0x3c8   :  { %v9567_v23 = vor.u32 %v10389_v4, %v9566_v30 }
 0x3cb   :  { %6408 = vmatpush.bf16.msrb.mxu2 %v9523_v63  ;;  %6367 = vmatpush.bf16.msra.mxu0 %v9575_v7  ;;  %v9627_v63 = vor.u32 %v10402_v53, %v9624_v61 }
 0x3cf   :  { %6409 = vmatpush.bf16.msrb.mxu2 %v9515_v34  ;;  %6368 = vmatpush.bf16.msra.mxu0 %v9567_v23  ;;  %v9611_v34 = vor.u32 %v10398_v25, %v9608_v13 }
 0x3d1   :  { %v5868_v5 = vpop.f32.mrf.mxu1 }
 0x3d3   :  { %6410 = vmatpush.bf16.msrb.mxu2 %v9507_v45  ;;  %6417 = vmatpush.bf16.msrb.mxu0 %v9627_v63  ;;  %v5826_v35 = vpop.f32.mrf.mxu2  ;;  %v5799_v45 = vadd.f32 %v5798_v48, %v4168_v43  ;;  %v5993_v63 = vld [vmem:[#allocation13] sm:$0x3] }
 0x3d4   :  { %v5996_v13 = vperm.slane %v5993_v63, 1 }
 0x3d5   :  { %v5784_v42 = vpop.f32.mrf.mxu0  ;;  %v5813_v10 = vadd.f32 %v5812_v55, %v5799_v45 }
 0x3d6   :  { %v5785_v24 = vadd.f32 %v5784_v42, %v5771_v47  ;;  %v5854_v22 = vpop.f32.mrf.mxu3  ;;  %v5815_v47 = vadd.f32 %v5814_v36, %v5801_v39 }
 0x3d7   :  { %6418 = vmatpush.bf16.msrb.mxu0 %v9619_v59  ;;  %v5827_v42 = vadd.f32 %v5826_v35, %v5813_v10  ;;  %v5995_v59 = vperm.slane %v5993_v63, 0 }
 0x3d8   :  { %v5911_v56 = vmul.f32 0.2, %v5785_v24  ;;  %vm5903_vm5 = vcmp.gt.f32.partialorder %v5785_v24, 0.0 }
 0x3d9   :  { %v5870_v31 = vpop.f32.mrf.mxu1 }
 0x3da   :  { %v5919_v11 = vsel %vm5903_vm5, %v5785_v24, %v5911_v56  ;;  %v10388_v24 = vld [vmem:[#allocation11 + $0x184] sm:$0xf] }
 0x3db   :  { %6419 = vmatpush.bf16.msrb.mxu0 %v9611_v34  ;;  %v5828_v28 = vpop.f32.mrf.mxu2 }
 0x3dc   :  { %v5829_v27 = vadd.f32 %v5828_v28, %v5815_v47  ;;  %v6445_v28 = vperm.slane %v6443_v40, 0 }
 0x3dd   :  { %v5786_v52 = vpop.f32.mrf.mxu0 }
 0x3de   :  { %v5787_v9 = vadd.f32 %v5786_v52, %v5773_v15  ;;  %v9571_v15 = vor.u32 %v10388_v24, %v9568_v3  ;;  %v5856_v58 = vpop.f32.mrf.mxu3 }
 0x3df   :  { %6420 = vmatpush.bf16.msrb.mxu0 %v9603_v41 }
 0x3e0   :  { %vm5907_vm6 = vcmp.gt.f32.partialorder %v5787_v9, 0.0  ;;  %v5915_v46 = vmul.f32 0.2, %v5787_v9 }
 0x3e2   :  { %v5923_v6 = vsel %vm5907_vm6, %v5787_v9, %v5915_v46 }
 0x3e3   :  { %v5927_v60 = vpack.c.bf16 %v5923_v6, %v5919_v11  ;;  %6421 = vmatpush.bf16.msrb.mxu0 %v9595_v50 }
 0x3e5   :  { %6355 = vmatmul.bf16.vlgmr.msra.gmra.mxu2 %v5927_v60 }
 0x3e7   :  { %6422 = vmatpush.bf16.msrb.mxu0 %v9587_v0 }
 0x3eb   :  { %6423 = vmatpush.bf16.msrb.mxu0 %v9579_v57 }
 0x3ef   :  { %6424 = vmatpush.bf16.msrb.mxu0 %v9571_v15 }
 0x3f4   :  { %v5882_v52 = vpop.f32.mrf.mxu2 }
 0x3f5   :  { %6411 = vmatmul.bf16.vlgmr.msrb.gmra.mxu2 %v5927_v60  ;;  %v5840_v54 = vpop.f32.mrf.mxu0 }
 0x3f6   :  { %v5841_v29 = vadd.f32 %v5840_v54, %v5827_v42  ;;  %v6446_v42 = vperm.slane %v6443_v40, 1 }
 0x3f8   :  { %v5855_v17 = vadd.f32 %v5854_v22, %v5841_v29 }
 0x3fa   :  { %v5869_v56 = vadd.f32 %v5868_v5, %v5855_v17 }
 0x3fc   :  { %v5883_v49 = vadd.f32 %v5882_v52, %v5869_v56  ;;  %v5884_v11 = vpop.f32.mrf.mxu2 }
 0x3fd   :  { %v5842_v1 = vpop.f32.mrf.mxu0 }
 0x3fe   :  { %v5843_v37 = vadd.f32 %v5842_v1, %v5829_v27 }
 0x400   :  { %v5857_v9 = vadd.f32 %v5856_v58, %v5843_v37 }
 0x402   :  { %v5871_v2 = vadd.f32 %v5870_v31, %v5857_v9 }
 0x404   :  { %v5885_v6 = vadd.f32 %v5884_v11, %v5871_v2 }
 0x40a   :  { %v6328_v4 = vpop.f32.mrf.mxu3 }
 0x40b   :  { %v6329_v55 = vadd.f32 %v6328_v4, %v5995_v59 }
 0x412   :  { %v6330_v61 = vpop.f32.mrf.mxu3 }
 0x413   :  { %v6331_v54 = vadd.f32 %v6330_v61, %v5995_v59 }
 0x415   :  { %v5896_v46 = vpop.f32.mrf.mxu0 }
 0x416   :  { %v5897_v33 = vadd.f32 %v5896_v46, %v5883_v49  ;;  %v6460_v49 = vstv %s11248_s10 }
 0x418   :  { %v5912_v60 = vmul.f32 0.2, %v5897_v33  ;;  %vm5904_vm7 = vcmp.gt.f32.partialorder %v5897_v33, 0.0 }
 0x41a   :  { %v5920_v21 = vsel %vm5904_vm7, %v5897_v33, %v5912_v60  ;;  %v6384_v25 = vpop.f32.mrf.mxu3 }
 0x41b   :  { %v6385_v41 = vadd.f32 %v6384_v25, %v5996_v13 }
 0x41d   :  { %v5898_v19 = vpop.f32.mrf.mxu0 }
 0x41e   :  { %v5899_v44 = vadd.f32 %v5898_v19, %v5885_v6 }
 0x420   :  { %vm5908_vm8 = vcmp.gt.f32.partialorder %v5899_v44, 0.0  ;;  %v5916_v18 = vmul.f32 0.2, %v5899_v44 }
 0x421   :  { %v6342_v23 = vpop.f32.mrf.mxu1 }
 0x422   :  { %v5924_v7 = vsel %vm5908_vm8, %v5899_v44, %v5916_v18  ;;  %v6343_v34 = vadd.f32 %v6342_v23, %v6329_v55  ;;  %v6386_v51 = vpop.f32.mrf.mxu3 }
 0x423   :  { %v5928_v30 = vpack.c.bf16 %v5924_v7, %v5920_v21  ;;  %v6387_v10 = vadd.f32 %v6386_v51, %v5996_v13 }
 0x425   :  { %6369 = vmatmul.bf16.vlgmr.msra.gmra.mxu0 %v5928_v30 }
 0x429   :  { %v6344_v48 = vpop.f32.mrf.mxu1 }
 0x42a   :  { %v6345_v45 = vadd.f32 %v6344_v48, %v6331_v54 }
 0x431   :  { %v6398_v35 = vpop.f32.mrf.mxu1 }
 0x432   :  { %v6399_v62 = vadd.f32 %v6398_v35, %v6385_v41 }
 0x435   :  { %6425 = vmatmul.bf16.vlgmr.msrb.gmra.mxu0 %v5928_v30 }
 0x439   :  { %v6400_v22 = vpop.f32.mrf.mxu1 }
 0x43a   :  { %v6401_v29 = vadd.f32 %v6400_v22, %v6387_v10 }
 0x468   :  { %v6356_v53 = vpop.f32.mrf.mxu2 }
 0x469   :  { %v6357_v32 = vadd.f32 %v6356_v53, %v6343_v34 }
 0x470   :  { %v6358_v14 = vpop.f32.mrf.mxu2 }
 0x471   :  { %v6359_v0 = vadd.f32 %v6358_v14, %v6345_v45 }
 0x478   :  { %v6412_v43 = vpop.f32.mrf.mxu2 }
 0x479   :  { %v6413_v50 = vadd.f32 %v6412_v43, %v6399_v62 }
 0x480   :  { %v6414_v47 = vpop.f32.mrf.mxu2 }
 0x481   :  { %v6415_v3 = vadd.f32 %v6414_v47, %v6401_v29 }
 0x4a2   :  { %v6370_v20 = vpop.f32.mrf.mxu0 }
 0x4a3   :  { %v6371_v12 = vadd.f32 %v6370_v20, %v6357_v32 }
 0x4a5   :  { %v6435_v36 = vmul.f32 0.2, %v6371_v12  ;;  %vm6431_vm9 = vcmp.gt.f32.partialorder %v6371_v12, 0.0 }
 0x4a7   :  { %v6439_v57 = vsel %vm6431_vm9, %v6371_v12, %v6435_v36 }
 0x4a8   :  { %v6449_v1 = vmul.f32 %v6445_v28, %v6439_v57 }
 0x4aa   :  { %v6372_v26 = vpop.f32.mrf.mxu0 }
 0x4ab   :  { %v6373_v16 = vadd.f32 %v6372_v26, %v6359_v0 }
 0x4ad   :  { %v6437_v27 = vmul.f32 0.2, %v6373_v16  ;;  %vm6433_vm11 = vcmp.gt.f32.partialorder %v6373_v16, 0.0 }
 0x4af   :  { %v6441_v58 = vsel %vm6433_vm11, %v6373_v16, %v6437_v27 }
 0x4b0   :  { %v6451_v9 = vmul.f32 %v6445_v28, %v6441_v58 }
 0x4b2   :  { %v6426_v8 = vpop.f32.mrf.mxu0 }
 0x4b3   :  { %v6427_v39 = vadd.f32 %v6426_v8, %v6413_v50 }
 0x4b5   :  { %vm6432_vm10 = vcmp.gt.f32.partialorder %v6427_v39, 0.0  ;;  %v6436_v38 = vmul.f32 0.2, %v6427_v39 }
 0x4b7   :  { %v6440_v5 = vsel %vm6432_vm10, %v6427_v39, %v6436_v38 }
 0x4b8   :  { %v6450_v24 = vmul.f32 %v6446_v42, %v6440_v5 }
 0x4ba   :  { %v6428_v15 = vpop.f32.mrf.mxu0  ;;  %v6453_v17 = vadd.f32 %v6450_v24, %v6449_v1 }
 0x4bb   :  { %v6429_v37 = vadd.f32 %v6428_v15, %v6415_v3 }
 0x4bc   :  { %6454 = vadd.xlane.f32.xlu0 %v6453_v17 }
 0x4bd   :  { %vm6434_vm12 = vcmp.gt.f32.partialorder %v6429_v37, 0.0  ;;  %v6438_v52 = vmul.f32 0.2, %v6429_v37 }
 0x4bf   :  { %v6442_v56 = vsel %vm6434_vm12, %v6429_v37, %v6438_v52 }
 0x4c0   :  { %v6452_v46 = vmul.f32 %v6446_v42, %v6442_v56 }
 0x4c2   :  { %v6456_v31 = vadd.f32 %v6452_v46, %v6451_v9 }
 0x4c4   :  { %6457 = vadd.xlane.f32.xlu0 %v6456_v31 }
 0x52f   :  { %v6455_v2 = vpop.xlane.xlu0 %6454 }
 0x530   :  { %v6461_v33 = vadd.f32 %v6460_v49, %v6455_v2 }
 0x532   :  { %v6463_v11 = vsub.f32 0.0, %v6461_v33 }
 0x534   :  { %v6465_v6 = vmul.f32 1.442695, %v6463_v11 }
 0x536   :  { %10419 = vpow2.f32 %v6465_v6 }
 0x537   :  { %v6458_v19 = vpop.xlane.xlu0 %6457 }
 0x538   :  { %v6462_v60 = vadd.f32 %v6460_v49, %v6458_v19 }
 0x53a   :  { %v6464_v44 = vsub.f32 0.0, %v6462_v60 }
 0x53c   :  { %v10420_v18 = vpop.eup %10419  ;;  %v6467_v21 = vmul.f32 1.442695, %v6464_v44 }
 0x53d   :  { %v6469_v7 = vadd.f32 1.0, %v10420_v18 }
 0x53e   :  { %10421 = vpow2.f32 %v6467_v21 }
 0x53f   :  { %10423 = vrcp.f32 %v6469_v7 }
 0x544   :  { %v10422_v30 = vpop.eup %10421 }
 0x545   :  { %v10424_v4 = vpop.eup %10423  ;;  %v6470_v23 = vadd.f32 1.0, %v10422_v30 }
 0x546   :  { %6473 = vxpose.xlu1.b32.start [1/2] (short) (narrow) %v10424_v4, 8 }
 0x547   :  { %10425 = vrcp.f32 %v6470_v23 }
 0x54d   :  { %v10426_v53 = vpop.eup %10425 }
 0x54e   :  { %6474 = vxpose.xlu1.b32.end [2/2] (short) (narrow) %v10426_v53, 8 }
 0x5ea   :  { %v6489_v61 = vpop.trf.xlu1 }
 0x5eb   :  { %6506 = vst.msk [vmem:[%s11249_s11] sm:$0x1] %vm6505_vm13, %v6489_v61 }
 0x5ec   :  { %6511 = vsyncpa [#allocation4], 1 }
 0x5ed   :  { %6512 = vsyncpa [#allocation6], 1 }
 0x5ee   :  { %6513 = vsyncpa [#allocation9], 1 }
 0x5ef   :  { %6514 = vsyncpa [#allocation12], 1 }
 0x5f0   :  { %6515 = vsyncpa [#allocation15], 1 }

</bundles_post_ra>
